<compile_context>
chip_gen: v6e
topology: v6e:2x2x1
jax: 0.10.0
libtpu: 0.0.40
codegen_flags: <defaults>
</compile_context>

<pallas_src>
import functools
import math

import jax
import jax.numpy as jnp
from jax.experimental import pallas as pl
from jax.experimental.pallas import tpu as pltpu

EPS = 1e-5


# ----------------------------------------------------------------------------
# Single fused kernel: conv stack -> maxpool -> 2-layer LSTM -> head
# ----------------------------------------------------------------------------
def fused_lstm_kernel(x_ref,
                      cw1_ref, cs1_ref, ct1_ref,
                      cw2_ref, cs2_ref, ct2_ref,
                      cw3_ref, cs3_ref, ct3_ref,
                      wbig_ref, b0t_ref,
                      whh0_ref, wih1_ref, whh1_ref, b1_ref,
                      nls_ref, nlt_ref,
                      lw_ref, lb_ref,
                      nns_ref, nnt_ref,
                      ow_ref, ob_ref,
                      o_ref,
                      s1_ref, s2_ref,
                      *, B, T, gap):
    K = cw1_ref.shape[0]                  # conv kernel size (5)
    Tp = T // 4                           # pooled sequence length
    H4 = whh0_ref.shape[1]                # 4 * lstm_hidden
    H = H4 // 4
    R = T * B                             # conv rows, time-major (t, b)
    base = gap - 2 * B                    # tap-0 slice offset into padded src

    # ---- Conv1d(k=5, 'same') + folded BatchNorm + ReLU, time-major rows -----
    # src rows: (padded time) * B + b.  Because all tap shifts are multiples of
    # B, batches never mix; the aligned `gap`-row zero halos provide padding.
    def conv_bn_relu(src, w_ref, scale_ref, shift_ref):
        acc = None
        for k in range(K):                # chained dots -> MRB-friendly on v7x
            part = jnp.dot(src[base + k * B: base + k * B + R, :], w_ref[k],
                           preferred_element_type=jnp.float32)
            acc = part if acc is None else acc + part
        return jnp.maximum(acc * scale_ref[...] + shift_ref[...], 0.0)  # (R, C)

    def store_padded(dst_ref, act):
        # Aligned halo-only zeroing + one aligned interior store (no masked
        # sublane stores, no full-buffer rewrite).
        c = act.shape[1]
        dst_ref[0:gap, :] = jnp.zeros((gap, c), jnp.float32)
        dst_ref[R + gap:R + 2 * gap, :] = jnp.zeros((gap, c), jnp.float32)
        dst_ref[gap:gap + R, :] = act

    a1 = conv_bn_relu(x_ref[...], cw1_ref, cs1_ref, ct1_ref)     # (R, 96)
    store_padded(s1_ref, a1)
    a2 = conv_bn_relu(s1_ref[...], cw2_ref, cs2_ref, ct2_ref)    # (R, 64)
    store_padded(s2_ref, a2)
    h3 = conv_bn_relu(s2_ref[...], cw3_ref, cs3_ref, ct3_ref)    # (R, 32)

    # ---- MaxPool1d(4) over time: pure VPU max of contiguous 2-row slices ----
    pooled = []
    for tp in range(Tp):
        r0 = 4 * tp * B
        m = jnp.maximum(
            jnp.maximum(h3[r0:r0 + B, :], h3[r0 + B:r0 + 2 * B, :]),
            jnp.maximum(h3[r0 + 2 * B:r0 + 3 * B, :], h3[r0 + 3 * B:r0 + 4 * B, :]))
        pooled.append(m)                  # (B, 32), rows = batch, P[b, c, tp]

    # ---- Layer-0 LSTM input projection, hoisted off the recurrence ----------
    # wbig[tp] is block-structured so that GX[:, t*4H:(t+1)*4H] equals the
    # PyTorch x-projection at LSTM timestep t (the `.view(B, T//4, 32)`
    # scramble lives entirely inside wbig, built at prep time).
    gx_all = None
    for tp in range(Tp):
        part = jnp.dot(pooled[tp], wbig_ref[tp],
                       preferred_element_type=jnp.float32)       # (B, Tp*4H)
        gx_all = part if gx_all is None else gx_all + part
    gx_all = gx_all + b0t_ref[...]
    gx = [gx_all[:, t * H4:(t + 1) * H4] for t in range(Tp)]     # Tp x (B, 4H)

    # ---- 2-layer LSTM, fully unrolled; state carried in registers -----------
    whh0 = whh0_ref[...]
    wih1 = wih1_ref[...]
    whh1 = whh1_ref[...]
    b1 = jnp.broadcast_to(b1_ref[...], (B, H4))        # hoisted broadcast

    def gates(g):                         # gate column order [i, f, o, g]
        s = jax.nn.sigmoid(g[:, 0:3 * H])
        return (s[:, 0:H], s[:, H:2 * H], s[:, 2 * H:3 * H],
                jnp.tanh(g[:, 3 * H:4 * H]))

    # Initial hidden/cell are zeros (init_hidden); the t==0 special case folds
    # that in and drops the zero-state matmuls from the critical chain.
    h1 = c1 = h2 = c2 = None
    for t in range(Tp):
        if t == 0:
            g0 = gx[0]
        else:
            g0 = gx[t] + jnp.dot(h1, whh0, preferred_element_type=jnp.float32)
        i0, f0, o0, gg0 = gates(g0)
        c1 = (i0 * gg0) if t == 0 else (f0 * c1 + i0 * gg0)
        h1 = o0 * jnp.tanh(c1)

        g1 = jnp.dot(h1, wih1, preferred_element_type=jnp.float32) + b1
        if t > 0:                         # h2_prev projection is off-chain
            g1 = g1 + jnp.dot(h2, whh1, preferred_element_type=jnp.float32)
        i1, f1, o1, gg1 = gates(g1)
        c2 = (i1 * gg1) if t == 0 else (f1 * c2 + i1 * gg1)
        h2 = o1 * jnp.tanh(c2)

    # ---- Head: BN -> Linear -> BN -> Linear -> log_softmax ------------------
    z = h2 * nls_ref[...] + nlt_ref[...]
    z = jnp.dot(z, lw_ref[...], preferred_element_type=jnp.float32) + lb_ref[...]
    z = z * nns_ref[...] + nnt_ref[...]
    z = jnp.dot(z, ow_ref[...], preferred_element_type=jnp.float32) + ob_ref[...]
    m = jnp.max(z, axis=-1, keepdims=True)
    lse = m + jnp.log(jnp.sum(jnp.exp(z - m), axis=-1, keepdims=True))
    o_ref[...] = z - lse


# ----------------------------------------------------------------------------
# Weight-layout preparation (one-time, outside the kernel; const-folded by jit)
# ----------------------------------------------------------------------------
def _prepare_params(p, Tp):
    HD3, H4 = p["wih0"].shape
    H = H4 // 4
    stride = HD3 // Tp
    # Reorder gate columns [i, f, g, o] -> [i, f, o, g] so one sigmoid covers 3H.
    perm = jnp.concatenate([jnp.arange(2 * H), jnp.arange(3 * H, 4 * H),
                            jnp.arange(2 * H, 3 * H)])
    pg = lambda w: w[:, perm]
    wih0 = pg(p["wih0"])
    # Fold the PyTorch `.view(B, T//4, 32)` scramble + per-timestep channel
    # selection into a block-structured weight:
    #   wbig[tp, t*stride + s, t*4H + g] = wih0[s*Tp + tp, g]
    wbig = jnp.zeros((Tp, HD3, Tp * H4), jnp.float32)
    for tp in range(Tp):
        for t in range(Tp):
            wbig = wbig.at[tp, t * stride:(t + 1) * stride,
                           t * H4:(t + 1) * H4].set(wih0[tp::Tp, :])
    return {
        "wbig": wbig,
        "b0t": jnp.tile(pg(p["b0"]), (1, Tp)),
        "whh0": pg(p["whh0"]),
        "wih1": pg(p["wih1"]),
        "whh1": pg(p["whh1"]),
        "b1": pg(p["b1"]),
    }


# ----------------------------------------------------------------------------
# Full forward (reproduces the PyTorch .view()-based reshapes exactly)
# ----------------------------------------------------------------------------
def lstm_model_forward(x, p):
    B, T, D = x.shape
    assert T % 4 == 0, "MaxPool1d(4) expects T divisible by 4 here"
    Tp = T // 4
    assert Tp >= 1
    HD1 = p["cs1"].shape[1]
    HD2 = p["cs2"].shape[1]
    HD3 = p["cs3"].shape[1]
    n_out = p["out_w"].shape[1]
    if HD3 % Tp != 0:
        # TODO(synk): general T where (T // 4) does not divide hidden_dim3=32.
        raise NotImplementedError("weight-fold of the .view scramble needs (T//4) | hidden_dim3")
    q = _prepare_params(p, Tp)

    # Aligned zero halo (>= 2*B rows, rounded up to a sublane tile).
    gap = ((2 * B + 7) // 8) * 8

    # convolve(): X.view(B, D, T) is a PURE RESHAPE of the (B, T, D) buffer
    # (free in XLA).  The kernel wants channels-last, time-major (t, b) rows
    # with the aligned zero halo; only one tiny transpose+pad HLO remains.
    x_tm = jnp.transpose(x.reshape(B, D, T), (2, 0, 1)).reshape(T * B, D)
    x_pad = jnp.pad(x_tm, ((gap, gap), (0, 0)))

    kernel = functools.partial(fused_lstm_kernel, B=B, T=T, gap=gap)
    args = (x_pad,
            p["cw1"], p["cs1"], p["ct1"],
            p["cw2"], p["cs2"], p["ct2"],
            p["cw3"], p["cs3"], p["ct3"],
            q["wbig"], q["b0t"],
            q["whh0"], q["wih1"], q["whh1"], q["b1"],
            p["ns_lstm"], p["nt_lstm"],
            p["lin_w"], p["lin_b"],
            p["ns_lin"], p["nt_lin"],
            p["out_w"], p["out_b"])

    return pl.pallas_call(
        kernel,
        out_shape=jax.ShapeDtypeStruct((B, n_out), jnp.float32),
        in_specs=[pl.BlockSpec(memory_space=pltpu.MemorySpace.VMEM)] * len(args),
        out_specs=pl.BlockSpec(memory_space=pltpu.MemorySpace.VMEM),
        scratch_shapes=[
            pltpu.VMEM((T * B + 2 * gap, HD1), jnp.float32),  # conv1 out, padded
            pltpu.VMEM((T * B + 2 * gap, HD2), jnp.float32),  # conv2 out, padded
        ],
    )(*args)


# ----------------------------------------------------------------------------
# Parameter init (deterministic, PyTorch-like uniform bounds, BN folded)
# ----------------------------------------------------------------------------
def init_params(key, input_dim, output_dim=8):
    K, HD1, HD2, HD3, H, LIN = 5, 96, 64, 32, 64, 32
    keys = iter(jax.random.split(key, 48))

    def uni(shape, bound):
        return jax.random.uniform(next(keys), shape, jnp.float32, -bound, bound)

    def bn_stats(c):
        gamma = 1.0 + 0.1 * jax.random.normal(next(keys), (c,), jnp.float32)
        beta = 0.1 * jax.random.normal(next(keys), (c,), jnp.float32)
        mean = 0.1 * jax.random.normal(next(keys), (c,), jnp.float32)
        var = 1.0 + 0.1 * jnp.abs(jax.random.normal(next(keys), (c,), jnp.float32))
        return gamma, beta, mean, var

    p = {}

    def conv_layer(cin, cout):
        b = 1.0 / math.sqrt(cin * K)
        w = uni((K, cin, cout), b)          # kernel-tap layout (K, Cin, Cout)
        bias = uni((cout,), b)
        gamma, beta, mean, var = bn_stats(cout)
        scale = gamma / jnp.sqrt(var + EPS)
        shift = (bias - mean) * scale + beta       # conv bias folded into BN
        return w, scale[None, :], shift[None, :]

    p["cw1"], p["cs1"], p["ct1"] = conv_layer(input_dim, HD1)
    p["cw2"], p["cs2"], p["ct2"] = conv_layer(HD1, HD2)
    p["cw3"], p["cs3"], p["ct3"] = conv_layer(HD2, HD3)

    bl = 1.0 / math.sqrt(H)                  # gate order: [i, f, g, o]
    p["wih0"] = uni((HD3, 4 * H), bl)
    p["whh0"] = uni((H, 4 * H), bl)
    p["b0"] = uni((1, 4 * H), bl) + uni((1, 4 * H), bl)   # b_ih + b_hh
    p["wih1"] = uni((H, 4 * H), bl)
    p["whh1"] = uni((H, 4 * H), bl)
    p["b1"] = uni((1, 4 * H), bl) + uni((1, 4 * H), bl)

    g, b, m, v = bn_stats(H)
    s = g / jnp.sqrt(v + EPS)
    p["ns_lstm"], p["nt_lstm"] = s[None, :], (b - m * s)[None, :]

    bw = 1.0 / math.sqrt(H)
    p["lin_w"] = uni((H, LIN), bw)
    p["lin_b"] = uni((1, LIN), bw)

    g, b, m, v = bn_stats(LIN)
    s = g / jnp.sqrt(v + EPS)
    p["ns_lin"], p["nt_lin"] = s[None, :], (b - m * s)[None, :]

    bo = 1.0 / math.sqrt(LIN)
    p["out_w"] = uni((LIN, output_dim), bo)
    p["out_b"] = uni((1, output_dim), bo)
    return p


# ----------------------------------------------------------------------------
# Pure-JAX reference (eval mode, exact PyTorch .view()/layout quirks)
# ----------------------------------------------------------------------------
def reference_forward(x, p):
    B, T, D = x.shape
    Tp = T // 4
    K = p["cw1"].shape[0]
    H = p["whh0"].shape[0]
    h = x.reshape(B, D, T)                              # torch: X.view(B, D, T)
    for w, s, sh in ((p["cw1"], p["cs1"], p["ct1"]),
                     (p["cw2"], p["cs2"], p["ct2"]),
                     (p["cw3"], p["cs3"], p["ct3"])):
        hp = jnp.pad(h, ((0, 0), (0, 0), (2, 2)))
        out = sum(jnp.einsum("bct,co->bot", hp[:, :, k:k + T], w[k])
                  for k in range(K))
        h = jnp.maximum(out * s[0][None, :, None] + sh[0][None, :, None], 0.0)
    pooled = h.reshape(B, h.shape[1], Tp, 4).max(axis=-1)   # MaxPool1d(4)
    xl = pooled.reshape(B, Tp, h.shape[1])              # torch: .view(B, T//4, 32)

    def cell(xt, hprev, cprev, wih, whh, b):
        g = xt @ wih + hprev @ whh + b
        i = jax.nn.sigmoid(g[:, 0:H])
        f = jax.nn.sigmoid(g[:, H:2 * H])
        gg = jnp.tanh(g[:, 2 * H:3 * H])
        o = jax.nn.sigmoid(g[:, 3 * H:4 * H])
        c = f * cprev + i * gg
        return o * jnp.tanh(c), c

    h1 = c1 = h2 = c2 = jnp.zeros((B, H), jnp.float32)
    for t in range(Tp):
        h1, c1 = cell(xl[:, t], h1, c1, p["wih0"], p["whh0"], p["b0"])
        h2, c2 = cell(h1, h2, c2, p["wih1"], p["whh1"], p["b1"])
    z = h2 * p["ns_lstm"] + p["nt_lstm"]
    z = z @ p["lin_w"] + p["lin_b"]
    z = z * p["ns_lin"] + p["nt_lin"]
    z = z @ p["out_w"] + p["out_b"]
    return jax.nn.log_softmax(z, axis=-1)


if __name__ == "__main__":
    B, T, D = 2, 16, 8
    key = jax.random.PRNGKey(0)
    kx, kp = jax.random.split(key)
    x = jax.random.normal(kx, (B, T, D), jnp.float32)
    params = init_params(kp, input_dim=D, output_dim=8)

    fwd = jax.jit(lambda xx: lstm_model_forward(xx, params))
    out = jax.block_until_ready(fwd(x))
    assert out.shape == (B, 8), out.shape
    assert bool(jnp.all(jnp.isfinite(out)))
    # log_softmax sanity: probabilities sum to 1 per row.
    assert bool(jnp.allclose(jnp.sum(jnp.exp(out), axis=-1), 1.0, atol=1e-3))
    # Verify the weight-folded scramble / layout tricks against a plain-JAX ref.
    with jax.default_matmul_precision("float32"):
        ref = reference_forward(x, params)
    assert bool(jnp.allclose(out, ref, atol=2e-3, rtol=2e-3))
    print("KERNEL_OK")
</pallas_src>

<mosaic_0001>
module attributes {stable_mosaic.version = 11 : i64} {
  func.func @fused_lstm_kernel(%arg0: memref<48x8xf32, #tpu.memory_space<vmem>>, %arg1: memref<5x8x96xf32, #tpu.memory_space<vmem>>, %arg2: memref<1x96xf32, #tpu.memory_space<vmem>>, %arg3: memref<1x96xf32, #tpu.memory_space<vmem>>, %arg4: memref<5x96x64xf32, #tpu.memory_space<vmem>>, %arg5: memref<1x64xf32, #tpu.memory_space<vmem>>, %arg6: memref<1x64xf32, #tpu.memory_space<vmem>>, %arg7: memref<5x64x32xf32, #tpu.memory_space<vmem>>, %arg8: memref<1x32xf32, #tpu.memory_space<vmem>>, %arg9: memref<1x32xf32, #tpu.memory_space<vmem>>, %arg10: memref<4x32x1024xf32, #tpu.memory_space<vmem>>, %arg11: memref<1x1024xf32, #tpu.memory_space<vmem>>, %arg12: memref<64x256xf32, #tpu.memory_space<vmem>>, %arg13: memref<64x256xf32, #tpu.memory_space<vmem>>, %arg14: memref<64x256xf32, #tpu.memory_space<vmem>>, %arg15: memref<1x256xf32, #tpu.memory_space<vmem>>, %arg16: memref<1x64xf32, #tpu.memory_space<vmem>>, %arg17: memref<1x64xf32, #tpu.memory_space<vmem>>, %arg18: memref<64x32xf32, #tpu.memory_space<vmem>>, %arg19: memref<1x32xf32, #tpu.memory_space<vmem>>, %arg20: memref<1x32xf32, #tpu.memory_space<vmem>>, %arg21: memref<1x32xf32, #tpu.memory_space<vmem>>, %arg22: memref<32x8xf32, #tpu.memory_space<vmem>>, %arg23: memref<1x8xf32, #tpu.memory_space<vmem>>, %arg24: memref<2x8xf32, #tpu.memory_space<vmem>>, %arg25: memref<48x96xf32, #tpu.memory_space<vmem>>, %arg26: memref<48x64xf32, #tpu.memory_space<vmem>>) attributes {dimension_semantics = [], scalar_prefetch = 0 : i64, scratch_operands = 2 : i64, tpu.core_type = #tpu.core_type<tc>} {
    %c0 = arith.constant 0 : index
    %c0_0 = arith.constant 0 : index
    %0 = vector.load %arg0[%c0, %c0_0] : memref<48x8xf32, #tpu.memory_space<vmem>>, vector<48x8xf32>
    %1 = vector.extract_strided_slice %0 {offsets = [4, 0], sizes = [32, 8], strides = [1, 1]} : vector<48x8xf32> to vector<32x8xf32>
    %c0_1 = arith.constant 0 : index
    %c0_2 = arith.constant 0 : index
    %c0_3 = arith.constant 0 : index
    %2 = vector.load %arg1[%c0_1, %c0_2, %c0_3] : memref<5x8x96xf32, #tpu.memory_space<vmem>>, vector<1x8x96xf32>
    %3 = vector.shape_cast %2 : vector<1x8x96xf32> to vector<8x96xf32>
    %cst = arith.constant dense<0.000000e+00> : vector<32x96xf32>
    %4 = tpu.matmul %1, %3, %cst {dimension_numbers = #tpu.dot_dimension_numbers<[1], [0], [0], [1], [0, 0, 1, 1], [], []>} : vector<32x8xf32>, vector<8x96xf32>, vector<32x96xf32> -> vector<32x96xf32>
    %5 = vector.extract_strided_slice %0 {offsets = [6, 0], sizes = [32, 8], strides = [1, 1]} : vector<48x8xf32> to vector<32x8xf32>
    %c1 = arith.constant 1 : index
    %c0_4 = arith.constant 0 : index
    %c0_5 = arith.constant 0 : index
    %6 = vector.load %arg1[%c1, %c0_4, %c0_5] : memref<5x8x96xf32, #tpu.memory_space<vmem>>, vector<1x8x96xf32>
    %7 = vector.shape_cast %6 : vector<1x8x96xf32> to vector<8x96xf32>
    %cst_6 = arith.constant dense<0.000000e+00> : vector<32x96xf32>
    %8 = tpu.matmul %5, %7, %cst_6 {dimension_numbers = #tpu.dot_dimension_numbers<[1], [0], [0], [1], [0, 0, 1, 1], [], []>} : vector<32x8xf32>, vector<8x96xf32>, vector<32x96xf32> -> vector<32x96xf32>
    %9 = arith.addf %4, %8 : vector<32x96xf32>
    %10 = vector.extract_strided_slice %0 {offsets = [8, 0], sizes = [32, 8], strides = [1, 1]} : vector<48x8xf32> to vector<32x8xf32>
    %c2 = arith.constant 2 : index
    %c0_7 = arith.constant 0 : index
    %c0_8 = arith.constant 0 : index
    %11 = vector.load %arg1[%c2, %c0_7, %c0_8] : memref<5x8x96xf32, #tpu.memory_space<vmem>>, vector<1x8x96xf32>
    %12 = vector.shape_cast %11 : vector<1x8x96xf32> to vector<8x96xf32>
    %cst_9 = arith.constant dense<0.000000e+00> : vector<32x96xf32>
    %13 = tpu.matmul %10, %12, %cst_9 {dimension_numbers = #tpu.dot_dimension_numbers<[1], [0], [0], [1], [0, 0, 1, 1], [], []>} : vector<32x8xf32>, vector<8x96xf32>, vector<32x96xf32> -> vector<32x96xf32>
    %14 = arith.addf %9, %13 : vector<32x96xf32>
    %15 = vector.extract_strided_slice %0 {offsets = [10, 0], sizes = [32, 8], strides = [1, 1]} : vector<48x8xf32> to vector<32x8xf32>
    %c3 = arith.constant 3 : index
    %c0_10 = arith.constant 0 : index
    %c0_11 = arith.constant 0 : index
    %16 = vector.load %arg1[%c3, %c0_10, %c0_11] : memref<5x8x96xf32, #tpu.memory_space<vmem>>, vector<1x8x96xf32>
    %17 = vector.shape_cast %16 : vector<1x8x96xf32> to vector<8x96xf32>
    %cst_12 = arith.constant dense<0.000000e+00> : vector<32x96xf32>
    %18 = tpu.matmul %15, %17, %cst_12 {dimension_numbers = #tpu.dot_dimension_numbers<[1], [0], [0], [1], [0, 0, 1, 1], [], []>} : vector<32x8xf32>, vector<8x96xf32>, vector<32x96xf32> -> vector<32x96xf32>
    %19 = arith.addf %14, %18 : vector<32x96xf32>
    %20 = vector.extract_strided_slice %0 {offsets = [12, 0], sizes = [32, 8], strides = [1, 1]} : vector<48x8xf32> to vector<32x8xf32>
    %c4 = arith.constant 4 : index
    %c0_13 = arith.constant 0 : index
    %c0_14 = arith.constant 0 : index
    %21 = vector.load %arg1[%c4, %c0_13, %c0_14] : memref<5x8x96xf32, #tpu.memory_space<vmem>>, vector<1x8x96xf32>
    %22 = vector.shape_cast %21 : vector<1x8x96xf32> to vector<8x96xf32>
    %cst_15 = arith.constant dense<0.000000e+00> : vector<32x96xf32>
    %23 = tpu.matmul %20, %22, %cst_15 {dimension_numbers = #tpu.dot_dimension_numbers<[1], [0], [0], [1], [0, 0, 1, 1], [], []>} : vector<32x8xf32>, vector<8x96xf32>, vector<32x96xf32> -> vector<32x96xf32>
    %24 = arith.addf %19, %23 : vector<32x96xf32>
    %c0_16 = arith.constant 0 : index
    %c0_17 = arith.constant 0 : index
    %25 = vector.load %arg2[%c0_16, %c0_17] : memref<1x96xf32, #tpu.memory_space<vmem>>, vector<1x96xf32>
    %26 = vector.broadcast %25 : vector<1x96xf32> to vector<32x96xf32>
    %27 = arith.mulf %24, %26 : vector<32x96xf32>
    %c0_18 = arith.constant 0 : index
    %c0_19 = arith.constant 0 : index
    %28 = vector.load %arg3[%c0_18, %c0_19] : memref<1x96xf32, #tpu.memory_space<vmem>>, vector<1x96xf32>
    %29 = vector.broadcast %28 : vector<1x96xf32> to vector<32x96xf32>
    %30 = arith.addf %27, %29 : vector<32x96xf32>
    %cst_20 = arith.constant 0.000000e+00 : f32
    %31 = vector.broadcast %cst_20 : f32 to vector<32x96xf32>
    %32 = arith.maximumf %30, %31 : vector<32x96xf32>
    %cst_21 = arith.constant 0.000000e+00 : f32
    %33 = vector.broadcast %cst_21 : f32 to vector<8x96xf32>
    %c0_22 = arith.constant 0 : index
    %c0_23 = arith.constant 0 : index
    %34 = vector.load %arg25[%c0_22, %c0_23] : memref<48x96xf32, #tpu.memory_space<vmem>>, vector<8x96xf32>
    tpu.vector_store %arg25[%c0_22, %c0_23], %33 {strides = array<i32>} : memref<48x96xf32, #tpu.memory_space<vmem>>, vector<8x96xf32>,
    %cst_24 = arith.constant 0.000000e+00 : f32
    %35 = vector.broadcast %cst_24 : f32 to vector<8x96xf32>
    %c40 = arith.constant 40 : index
    %c0_25 = arith.constant 0 : index
    %36 = vector.load %arg25[%c40, %c0_25] : memref<48x96xf32, #tpu.memory_space<vmem>>, vector<8x96xf32>
    tpu.vector_store %arg25[%c40, %c0_25], %35 {strides = array<i32>} : memref<48x96xf32, #tpu.memory_space<vmem>>, vector<8x96xf32>,
    %c8 = arith.constant 8 : index
    %c0_26 = arith.constant 0 : index
    %37 = vector.load %arg25[%c8, %c0_26] : memref<48x96xf32, #tpu.memory_space<vmem>>, vector<32x96xf32>
    tpu.vector_store %arg25[%c8, %c0_26], %32 {strides = array<i32>} : memref<48x96xf32, #tpu.memory_space<vmem>>, vector<32x96xf32>,
    %c0_27 = arith.constant 0 : index
    %c0_28 = arith.constant 0 : index
    %38 = vector.load %arg25[%c0_27, %c0_28] : memref<48x96xf32, #tpu.memory_space<vmem>>, vector<48x96xf32>
    %39 = vector.extract_strided_slice %38 {offsets = [4, 0], sizes = [32, 96], strides = [1, 1]} : vector<48x96xf32> to vector<32x96xf32>
    %c0_29 = arith.constant 0 : index
    %c0_30 = arith.constant 0 : index
    %c0_31 = arith.constant 0 : index
    %40 = vector.load %arg4[%c0_29, %c0_30, %c0_31] : memref<5x96x64xf32, #tpu.memory_space<vmem>>, vector<1x96x64xf32>
    %41 = vector.shape_cast %40 : vector<1x96x64xf32> to vector<96x64xf32>
    %cst_32 = arith.constant dense<0.000000e+00> : vector<32x64xf32>
    %42 = tpu.matmul %39, %41, %cst_32 {dimension_numbers = #tpu.dot_dimension_numbers<[1], [0], [0], [1], [0, 0, 1, 1], [], []>} : vector<32x96xf32>, vector<96x64xf32>, vector<32x64xf32> -> vector<32x64xf32>
    %43 = vector.extract_strided_slice %38 {offsets = [6, 0], sizes = [32, 96], strides = [1, 1]} : vector<48x96xf32> to vector<32x96xf32>
    %c1_33 = arith.constant 1 : index
    %c0_34 = arith.constant 0 : index
    %c0_35 = arith.constant 0 : index
    %44 = vector.load %arg4[%c1_33, %c0_34, %c0_35] : memref<5x96x64xf32, #tpu.memory_space<vmem>>, vector<1x96x64xf32>
    %45 = vector.shape_cast %44 : vector<1x96x64xf32> to vector<96x64xf32>
    %cst_36 = arith.constant dense<0.000000e+00> : vector<32x64xf32>
    %46 = tpu.matmul %43, %45, %cst_36 {dimension_numbers = #tpu.dot_dimension_numbers<[1], [0], [0], [1], [0, 0, 1, 1], [], []>} : vector<32x96xf32>, vector<96x64xf32>, vector<32x64xf32> -> vector<32x64xf32>
    %47 = arith.addf %42, %46 : vector<32x64xf32>
    %48 = vector.extract_strided_slice %38 {offsets = [8, 0], sizes = [32, 96], strides = [1, 1]} : vector<48x96xf32> to vector<32x96xf32>
    %c2_37 = arith.constant 2 : index
    %c0_38 = arith.constant 0 : index
    %c0_39 = arith.constant 0 : index
    %49 = vector.load %arg4[%c2_37, %c0_38, %c0_39] : memref<5x96x64xf32, #tpu.memory_space<vmem>>, vector<1x96x64xf32>
    %50 = vector.shape_cast %49 : vector<1x96x64xf32> to vector<96x64xf32>
    %cst_40 = arith.constant dense<0.000000e+00> : vector<32x64xf32>
    %51 = tpu.matmul %48, %50, %cst_40 {dimension_numbers = #tpu.dot_dimension_numbers<[1], [0], [0], [1], [0, 0, 1, 1], [], []>} : vector<32x96xf32>, vector<96x64xf32>, vector<32x64xf32> -> vector<32x64xf32>
    %52 = arith.addf %47, %51 : vector<32x64xf32>
    %53 = vector.extract_strided_slice %38 {offsets = [10, 0], sizes = [32, 96], strides = [1, 1]} : vector<48x96xf32> to vector<32x96xf32>
    %c3_41 = arith.constant 3 : index
    %c0_42 = arith.constant 0 : index
    %c0_43 = arith.constant 0 : index
    %54 = vector.load %arg4[%c3_41, %c0_42, %c0_43] : memref<5x96x64xf32, #tpu.memory_space<vmem>>, vector<1x96x64xf32>
    %55 = vector.shape_cast %54 : vector<1x96x64xf32> to vector<96x64xf32>
    %cst_44 = arith.constant dense<0.000000e+00> : vector<32x64xf32>
    %56 = tpu.matmul %53, %55, %cst_44 {dimension_numbers = #tpu.dot_dimension_numbers<[1], [0], [0], [1], [0, 0, 1, 1], [], []>} : vector<32x96xf32>, vector<96x64xf32>, vector<32x64xf32> -> vector<32x64xf32>
    %57 = arith.addf %52, %56 : vector<32x64xf32>
    %58 = vector.extract_strided_slice %38 {offsets = [12, 0], sizes = [32, 96], strides = [1, 1]} : vector<48x96xf32> to vector<32x96xf32>
    %c4_45 = arith.constant 4 : index
    %c0_46 = arith.constant 0 : index
    %c0_47 = arith.constant 0 : index
    %59 = vector.load %arg4[%c4_45, %c0_46, %c0_47] : memref<5x96x64xf32, #tpu.memory_space<vmem>>, vector<1x96x64xf32>
    %60 = vector.shape_cast %59 : vector<1x96x64xf32> to vector<96x64xf32>
    %cst_48 = arith.constant dense<0.000000e+00> : vector<32x64xf32>
    %61 = tpu.matmul %58, %60, %cst_48 {dimension_numbers = #tpu.dot_dimension_numbers<[1], [0], [0], [1], [0, 0, 1, 1], [], []>} : vector<32x96xf32>, vector<96x64xf32>, vector<32x64xf32> -> vector<32x64xf32>
    %62 = arith.addf %57, %61 : vector<32x64xf32>
    %c0_49 = arith.constant 0 : index
    %c0_50 = arith.constant 0 : index
    %63 = vector.load %arg5[%c0_49, %c0_50] : memref<1x64xf32, #tpu.memory_space<vmem>>, vector<1x64xf32>
    %64 = vector.broadcast %63 : vector<1x64xf32> to vector<32x64xf32>
    %65 = arith.mulf %62, %64 : vector<32x64xf32>
    %c0_51 = arith.constant 0 : index
    %c0_52 = arith.constant 0 : index
    %66 = vector.load %arg6[%c0_51, %c0_52] : memref<1x64xf32, #tpu.memory_space<vmem>>, vector<1x64xf32>
    %67 = vector.broadcast %66 : vector<1x64xf32> to vector<32x64xf32>
    %68 = arith.addf %65, %67 : vector<32x64xf32>
    %cst_53 = arith.constant 0.000000e+00 : f32
    %69 = vector.broadcast %cst_53 : f32 to vector<32x64xf32>
    %70 = arith.maximumf %68, %69 : vector<32x64xf32>
    %cst_54 = arith.constant 0.000000e+00 : f32
    %71 = vector.broadcast %cst_54 : f32 to vector<8x64xf32>
    %c0_55 = arith.constant 0 : index
    %c0_56 = arith.constant 0 : index
    %72 = vector.load %arg26[%c0_55, %c0_56] : memref<48x64xf32, #tpu.memory_space<vmem>>, vector<8x64xf32>
    tpu.vector_store %arg26[%c0_55, %c0_56], %71 {strides = array<i32>} : memref<48x64xf32, #tpu.memory_space<vmem>>, vector<8x64xf32>,
    %cst_57 = arith.constant 0.000000e+00 : f32
    %73 = vector.broadcast %cst_57 : f32 to vector<8x64xf32>
    %c40_58 = arith.constant 40 : index
    %c0_59 = arith.constant 0 : index
    %74 = vector.load %arg26[%c40_58, %c0_59] : memref<48x64xf32, #tpu.memory_space<vmem>>, vector<8x64xf32>
    tpu.vector_store %arg26[%c40_58, %c0_59], %73 {strides = array<i32>} : memref<48x64xf32, #tpu.memory_space<vmem>>, vector<8x64xf32>,
    %c8_60 = arith.constant 8 : index
    %c0_61 = arith.constant 0 : index
    %75 = vector.load %arg26[%c8_60, %c0_61] : memref<48x64xf32, #tpu.memory_space<vmem>>, vector<32x64xf32>
    tpu.vector_store %arg26[%c8_60, %c0_61], %70 {strides = array<i32>} : memref<48x64xf32, #tpu.memory_space<vmem>>, vector<32x64xf32>,
    %c0_62 = arith.constant 0 : index
    %c0_63 = arith.constant 0 : index
    %76 = vector.load %arg26[%c0_62, %c0_63] : memref<48x64xf32, #tpu.memory_space<vmem>>, vector<48x64xf32>
    %77 = vector.extract_strided_slice %76 {offsets = [4, 0], sizes = [32, 64], strides = [1, 1]} : vector<48x64xf32> to vector<32x64xf32>
    %c0_64 = arith.constant 0 : index
    %c0_65 = arith.constant 0 : index
    %c0_66 = arith.constant 0 : index
    %78 = vector.load %arg7[%c0_64, %c0_65, %c0_66] : memref<5x64x32xf32, #tpu.memory_space<vmem>>, vector<1x64x32xf32>
    %79 = vector.shape_cast %78 : vector<1x64x32xf32> to vector<64x32xf32>
    %cst_67 = arith.constant dense<0.000000e+00> : vector<32x32xf32>
    %80 = tpu.matmul %77, %79, %cst_67 {dimension_numbers = #tpu.dot_dimension_numbers<[1], [0], [0], [1], [0, 0, 1, 1], [], []>} : vector<32x64xf32>, vector<64x32xf32>, vector<32x32xf32> -> vector<32x32xf32>
    %81 = vector.extract_strided_slice %76 {offsets = [6, 0], sizes = [32, 64], strides = [1, 1]} : vector<48x64xf32> to vector<32x64xf32>
    %c1_68 = arith.constant 1 : index
    %c0_69 = arith.constant 0 : index
    %c0_70 = arith.constant 0 : index
    %82 = vector.load %arg7[%c1_68, %c0_69, %c0_70] : memref<5x64x32xf32, #tpu.memory_space<vmem>>, vector<1x64x32xf32>
    %83 = vector.shape_cast %82 : vector<1x64x32xf32> to vector<64x32xf32>
    %cst_71 = arith.constant dense<0.000000e+00> : vector<32x32xf32>
    %84 = tpu.matmul %81, %83, %cst_71 {dimension_numbers = #tpu.dot_dimension_numbers<[1], [0], [0], [1], [0, 0, 1, 1], [], []>} : vector<32x64xf32>, vector<64x32xf32>, vector<32x32xf32> -> vector<32x32xf32>
    %85 = arith.addf %80, %84 : vector<32x32xf32>
    %86 = vector.extract_strided_slice %76 {offsets = [8, 0], sizes = [32, 64], strides = [1, 1]} : vector<48x64xf32> to vector<32x64xf32>
    %c2_72 = arith.constant 2 : index
    %c0_73 = arith.constant 0 : index
    %c0_74 = arith.constant 0 : index
    %87 = vector.load %arg7[%c2_72, %c0_73, %c0_74] : memref<5x64x32xf32, #tpu.memory_space<vmem>>, vector<1x64x32xf32>
    %88 = vector.shape_cast %87 : vector<1x64x32xf32> to vector<64x32xf32>
    %cst_75 = arith.constant dense<0.000000e+00> : vector<32x32xf32>
    %89 = tpu.matmul %86, %88, %cst_75 {dimension_numbers = #tpu.dot_dimension_numbers<[1], [0], [0], [1], [0, 0, 1, 1], [], []>} : vector<32x64xf32>, vector<64x32xf32>, vector<32x32xf32> -> vector<32x32xf32>
    %90 = arith.addf %85, %89 : vector<32x32xf32>
    %91 = vector.extract_strided_slice %76 {offsets = [10, 0], sizes = [32, 64], strides = [1, 1]} : vector<48x64xf32> to vector<32x64xf32>
    %c3_76 = arith.constant 3 : index
    %c0_77 = arith.constant 0 : index
    %c0_78 = arith.constant 0 : index
    %92 = vector.load %arg7[%c3_76, %c0_77, %c0_78] : memref<5x64x32xf32, #tpu.memory_space<vmem>>, vector<1x64x32xf32>
    %93 = vector.shape_cast %92 : vector<1x64x32xf32> to vector<64x32xf32>
    %cst_79 = arith.constant dense<0.000000e+00> : vector<32x32xf32>
    %94 = tpu.matmul %91, %93, %cst_79 {dimension_numbers = #tpu.dot_dimension_numbers<[1], [0], [0], [1], [0, 0, 1, 1], [], []>} : vector<32x64xf32>, vector<64x32xf32>, vector<32x32xf32> -> vector<32x32xf32>
    %95 = arith.addf %90, %94 : vector<32x32xf32>
    %96 = vector.extract_strided_slice %76 {offsets = [12, 0], sizes = [32, 64], strides = [1, 1]} : vector<48x64xf32> to vector<32x64xf32>
    %c4_80 = arith.constant 4 : index
    %c0_81 = arith.constant 0 : index
    %c0_82 = arith.constant 0 : index
    %97 = vector.load %arg7[%c4_80, %c0_81, %c0_82] : memref<5x64x32xf32, #tpu.memory_space<vmem>>, vector<1x64x32xf32>
    %98 = vector.shape_cast %97 : vector<1x64x32xf32> to vector<64x32xf32>
    %cst_83 = arith.constant dense<0.000000e+00> : vector<32x32xf32>
    %99 = tpu.matmul %96, %98, %cst_83 {dimension_numbers = #tpu.dot_dimension_numbers<[1], [0], [0], [1], [0, 0, 1, 1], [], []>} : vector<32x64xf32>, vector<64x32xf32>, vector<32x32xf32> -> vector<32x32xf32>
    %100 = arith.addf %95, %99 : vector<32x32xf32>
    %c0_84 = arith.constant 0 : index
    %c0_85 = arith.constant 0 : index
    %101 = vector.load %arg8[%c0_84, %c0_85] : memref<1x32xf32, #tpu.memory_space<vmem>>, vector<1x32xf32>
    %102 = vector.broadcast %101 : vector<1x32xf32> to vector<32x32xf32>
    %103 = arith.mulf %100, %102 : vector<32x32xf32>
    %c0_86 = arith.constant 0 : index
    %c0_87 = arith.constant 0 : index
    %104 = vector.load %arg9[%c0_86, %c0_87] : memref<1x32xf32, #tpu.memory_space<vmem>>, vector<1x32xf32>
    %105 = vector.broadcast %104 : vector<1x32xf32> to vector<32x32xf32>
    %106 = arith.addf %103, %105 : vector<32x32xf32>
    %cst_88 = arith.constant 0.000000e+00 : f32
    %107 = vector.broadcast %cst_88 : f32 to vector<32x32xf32>
    %108 = arith.maximumf %106, %107 : vector<32x32xf32>
    %109 = vector.extract_strided_slice %108 {offsets = [0, 0], sizes = [2, 32], strides = [1, 1]} : vector<32x32xf32> to vector<2x32xf32>
    %110 = vector.extract_strided_slice %108 {offsets = [2, 0], sizes = [2, 32], strides = [1, 1]} : vector<32x32xf32> to vector<2x32xf32>
    %111 = arith.maximumf %109, %110 : vector<2x32xf32>
    %112 = vector.extract_strided_slice %108 {offsets = [4, 0], sizes = [2, 32], strides = [1, 1]} : vector<32x32xf32> to vector<2x32xf32>
    %113 = vector.extract_strided_slice %108 {offsets = [6, 0], sizes = [2, 32], strides = [1, 1]} : vector<32x32xf32> to vector<2x32xf32>
    %114 = arith.maximumf %112, %113 : vector<2x32xf32>
    %115 = arith.maximumf %111, %114 : vector<2x32xf32>
    %116 = vector.extract_strided_slice %108 {offsets = [8, 0], sizes = [2, 32], strides = [1, 1]} : vector<32x32xf32> to vector<2x32xf32>
    %117 = vector.extract_strided_slice %108 {offsets = [10, 0], sizes = [2, 32], strides = [1, 1]} : vector<32x32xf32> to vector<2x32xf32>
    %118 = arith.maximumf %116, %117 : vector<2x32xf32>
    %119 = vector.extract_strided_slice %108 {offsets = [12, 0], sizes = [2, 32], strides = [1, 1]} : vector<32x32xf32> to vector<2x32xf32>
    %120 = vector.extract_strided_slice %108 {offsets = [14, 0], sizes = [2, 32], strides = [1, 1]} : vector<32x32xf32> to vector<2x32xf32>
    %121 = arith.maximumf %119, %120 : vector<2x32xf32>
    %122 = arith.maximumf %118, %121 : vector<2x32xf32>
    %123 = vector.extract_strided_slice %108 {offsets = [16, 0], sizes = [2, 32], strides = [1, 1]} : vector<32x32xf32> to vector<2x32xf32>
    %124 = vector.extract_strided_slice %108 {offsets = [18, 0], sizes = [2, 32], strides = [1, 1]} : vector<32x32xf32> to vector<2x32xf32>
    %125 = arith.maximumf %123, %124 : vector<2x32xf32>
    %126 = vector.extract_strided_slice %108 {offsets = [20, 0], sizes = [2, 32], strides = [1, 1]} : vector<32x32xf32> to vector<2x32xf32>
    %127 = vector.extract_strided_slice %108 {offsets = [22, 0], sizes = [2, 32], strides = [1, 1]} : vector<32x32xf32> to vector<2x32xf32>
    %128 = arith.maximumf %126, %127 : vector<2x32xf32>
    %129 = arith.maximumf %125, %128 : vector<2x32xf32>
    %130 = vector.extract_strided_slice %108 {offsets = [24, 0], sizes = [2, 32], strides = [1, 1]} : vector<32x32xf32> to vector<2x32xf32>
    %131 = vector.extract_strided_slice %108 {offsets = [26, 0], sizes = [2, 32], strides = [1, 1]} : vector<32x32xf32> to vector<2x32xf32>
    %132 = arith.maximumf %130, %131 : vector<2x32xf32>
    %133 = vector.extract_strided_slice %108 {offsets = [28, 0], sizes = [2, 32], strides = [1, 1]} : vector<32x32xf32> to vector<2x32xf32>
    %134 = vector.extract_strided_slice %108 {offsets = [30, 0], sizes = [2, 32], strides = [1, 1]} : vector<32x32xf32> to vector<2x32xf32>
    %135 = arith.maximumf %133, %134 : vector<2x32xf32>
    %136 = arith.maximumf %132, %135 : vector<2x32xf32>
    %c0_89 = arith.constant 0 : index
    %c0_90 = arith.constant 0 : index
    %c0_91 = arith.constant 0 : index
    %137 = vector.load %arg10[%c0_89, %c0_90, %c0_91] : memref<4x32x1024xf32, #tpu.memory_space<vmem>>, vector<1x32x1024xf32>
    %138 = vector.shape_cast %137 : vector<1x32x1024xf32> to vector<32x1024xf32>
    %cst_92 = arith.constant dense<0.000000e+00> : vector<2x1024xf32>
    %139 = tpu.matmul %115, %138, %cst_92 {dimension_numbers = #tpu.dot_dimension_numbers<[1], [0], [0], [1], [0, 0, 1, 1], [], []>} : vector<2x32xf32>, vector<32x1024xf32>, vector<2x1024xf32> -> vector<2x1024xf32>
    %c1_93 = arith.constant 1 : index
    %c0_94 = arith.constant 0 : index
    %c0_95 = arith.constant 0 : index
    %140 = vector.load %arg10[%c1_93, %c0_94, %c0_95] : memref<4x32x1024xf32, #tpu.memory_space<vmem>>, vector<1x32x1024xf32>
    %141 = vector.shape_cast %140 : vector<1x32x1024xf32> to vector<32x1024xf32>
    %cst_96 = arith.constant dense<0.000000e+00> : vector<2x1024xf32>
    %142 = tpu.matmul %122, %141, %cst_96 {dimension_numbers = #tpu.dot_dimension_numbers<[1], [0], [0], [1], [0, 0, 1, 1], [], []>} : vector<2x32xf32>, vector<32x1024xf32>, vector<2x1024xf32> -> vector<2x1024xf32>
    %143 = arith.addf %139, %142 : vector<2x1024xf32>
    %c2_97 = arith.constant 2 : index
    %c0_98 = arith.constant 0 : index
    %c0_99 = arith.constant 0 : index
    %144 = vector.load %arg10[%c2_97, %c0_98, %c0_99] : memref<4x32x1024xf32, #tpu.memory_space<vmem>>, vector<1x32x1024xf32>
    %145 = vector.shape_cast %144 : vector<1x32x1024xf32> to vector<32x1024xf32>
    %cst_100 = arith.constant dense<0.000000e+00> : vector<2x1024xf32>
    %146 = tpu.matmul %129, %145, %cst_100 {dimension_numbers = #tpu.dot_dimension_numbers<[1], [0], [0], [1], [0, 0, 1, 1], [], []>} : vector<2x32xf32>, vector<32x1024xf32>, vector<2x1024xf32> -> vector<2x1024xf32>
    %147 = arith.addf %143, %146 : vector<2x1024xf32>
    %c3_101 = arith.constant 3 : index
    %c0_102 = arith.constant 0 : index
    %c0_103 = arith.constant 0 : index
    %148 = vector.load %arg10[%c3_101, %c0_102, %c0_103] : memref<4x32x1024xf32, #tpu.memory_space<vmem>>, vector<1x32x1024xf32>
    %149 = vector.shape_cast %148 : vector<1x32x1024xf32> to vector<32x1024xf32>
    %cst_104 = arith.constant dense<0.000000e+00> : vector<2x1024xf32>
    %150 = tpu.matmul %136, %149, %cst_104 {dimension_numbers = #tpu.dot_dimension_numbers<[1], [0], [0], [1], [0, 0, 1, 1], [], []>} : vector<2x32xf32>, vector<32x1024xf32>, vector<2x1024xf32> -> vector<2x1024xf32>
    %151 = arith.addf %147, %150 : vector<2x1024xf32>
    %c0_105 = arith.constant 0 : index
    %c0_106 = arith.constant 0 : index
    %152 = vector.load %arg11[%c0_105, %c0_106] : memref<1x1024xf32, #tpu.memory_space<vmem>>, vector<1x1024xf32>
    %153 = vector.broadcast %152 : vector<1x1024xf32> to vector<2x1024xf32>
    %154 = arith.addf %151, %153 : vector<2x1024xf32>
    %155 = vector.extract_strided_slice %154 {offsets = [0, 0], sizes = [2, 256], strides = [1, 1]} : vector<2x1024xf32> to vector<2x256xf32>
    %156 = vector.extract_strided_slice %154 {offsets = [0, 256], sizes = [2, 256], strides = [1, 1]} : vector<2x1024xf32> to vector<2x256xf32>
    %157 = vector.extract_strided_slice %154 {offsets = [0, 512], sizes = [2, 256], strides = [1, 1]} : vector<2x1024xf32> to vector<2x256xf32>
    %158 = vector.extract_strided_slice %154 {offsets = [0, 768], sizes = [2, 256], strides = [1, 1]} : vector<2x1024xf32> to vector<2x256xf32>
    %c0_107 = arith.constant 0 : index
    %c0_108 = arith.constant 0 : index
    %159 = vector.load %arg12[%c0_107, %c0_108] : memref<64x256xf32, #tpu.memory_space<vmem>>, vector<64x256xf32>
    %c0_109 = arith.constant 0 : index
    %c0_110 = arith.constant 0 : index
    %160 = vector.load %arg13[%c0_109, %c0_110] : memref<64x256xf32, #tpu.memory_space<vmem>>, vector<64x256xf32>
    %c0_111 = arith.constant 0 : index
    %c0_112 = arith.constant 0 : index
    %161 = vector.load %arg14[%c0_111, %c0_112] : memref<64x256xf32, #tpu.memory_space<vmem>>, vector<64x256xf32>
    %c0_113 = arith.constant 0 : index
    %c0_114 = arith.constant 0 : index
    %162 = vector.load %arg15[%c0_113, %c0_114] : memref<1x256xf32, #tpu.memory_space<vmem>>, vector<1x256xf32>
    %163 = vector.shape_cast %162 : vector<1x256xf32> to vector<1x256xf32>
    %164 = vector.broadcast %163 : vector<1x256xf32> to vector<2x256xf32>
    %165 = vector.extract_strided_slice %155 {offsets = [0, 0], sizes = [2, 192], strides = [1, 1]} : vector<2x256xf32> to vector<2x192xf32>
    %166 = arith.negf %165 : vector<2x192xf32>
    %167 = math.exp %166 : vector<2x192xf32>
    %cst_115 = arith.constant 1.000000e+00 : f32
    %168 = vector.broadcast %cst_115 : f32 to vector<2x192xf32>
    %169 = arith.addf %168, %167 : vector<2x192xf32>
    %170 = arith.divf %168, %169 : vector<2x192xf32>
    %171 = vector.extract_strided_slice %170 {offsets = [0, 0], sizes = [2, 64], strides = [1, 1]} : vector<2x192xf32> to vector<2x64xf32>
    %172 = vector.extract_strided_slice %170 {offsets = [0, 128], sizes = [2, 64], strides = [1, 1]} : vector<2x192xf32> to vector<2x64xf32>
    %173 = vector.extract_strided_slice %155 {offsets = [0, 192], sizes = [2, 64], strides = [1, 1]} : vector<2x256xf32> to vector<2x64xf32>
    %174 = math.tanh %173 : vector<2x64xf32>
    %175 = arith.mulf %171, %174 : vector<2x64xf32>
    %176 = math.tanh %175 : vector<2x64xf32>
    %177 = arith.mulf %172, %176 : vector<2x64xf32>
    %cst_116 = arith.constant dense<0.000000e+00> : vector<2x256xf32>
    %178 = tpu.matmul %177, %160, %cst_116 {dimension_numbers = #tpu.dot_dimension_numbers<[1], [0], [0], [1], [0, 0, 1, 1], [], []>} : vector<2x64xf32>, vector<64x256xf32>, vector<2x256xf32> -> vector<2x256xf32>
    %179 = arith.addf %178, %164 : vector<2x256xf32>
    %180 = vector.extract_strided_slice %179 {offsets = [0, 0], sizes = [2, 192], strides = [1, 1]} : vector<2x256xf32> to vector<2x192xf32>
    %181 = arith.negf %180 : vector<2x192xf32>
    %182 = math.exp %181 : vector<2x192xf32>
    %cst_117 = arith.constant 1.000000e+00 : f32
    %183 = vector.broadcast %cst_117 : f32 to vector<2x192xf32>
    %184 = arith.addf %183, %182 : vector<2x192xf32>
    %185 = arith.divf %183, %184 : vector<2x192xf32>
    %186 = vector.extract_strided_slice %185 {offsets = [0, 0], sizes = [2, 64], strides = [1, 1]} : vector<2x192xf32> to vector<2x64xf32>
    %187 = vector.extract_strided_slice %185 {offsets = [0, 128], sizes = [2, 64], strides = [1, 1]} : vector<2x192xf32> to vector<2x64xf32>
    %188 = vector.extract_strided_slice %179 {offsets = [0, 192], sizes = [2, 64], strides = [1, 1]} : vector<2x256xf32> to vector<2x64xf32>
    %189 = math.tanh %188 : vector<2x64xf32>
    %190 = arith.mulf %186, %189 : vector<2x64xf32>
    %191 = math.tanh %190 : vector<2x64xf32>
    %192 = arith.mulf %187, %191 : vector<2x64xf32>
    %cst_118 = arith.constant dense<0.000000e+00> : vector<2x256xf32>
    %193 = tpu.matmul %177, %159, %cst_118 {dimension_numbers = #tpu.dot_dimension_numbers<[1], [0], [0], [1], [0, 0, 1, 1], [], []>} : vector<2x64xf32>, vector<64x256xf32>, vector<2x256xf32> -> vector<2x256xf32>
    %194 = arith.addf %156, %193 : vector<2x256xf32>
    %195 = vector.extract_strided_slice %194 {offsets = [0, 0], sizes = [2, 192], strides = [1, 1]} : vector<2x256xf32> to vector<2x192xf32>
    %196 = arith.negf %195 : vector<2x192xf32>
    %197 = math.exp %196 : vector<2x192xf32>
    %cst_119 = arith.constant 1.000000e+00 : f32
    %198 = vector.broadcast %cst_119 : f32 to vector<2x192xf32>
    %199 = arith.addf %198, %197 : vector<2x192xf32>
    %200 = arith.divf %198, %199 : vector<2x192xf32>
    %201 = vector.extract_strided_slice %200 {offsets = [0, 0], sizes = [2, 64], strides = [1, 1]} : vector<2x192xf32> to vector<2x64xf32>
    %202 = vector.extract_strided_slice %200 {offsets = [0, 64], sizes = [2, 64], strides = [1, 1]} : vector<2x192xf32> to vector<2x64xf32>
    %203 = vector.extract_strided_slice %200 {offsets = [0, 128], sizes = [2, 64], strides = [1, 1]} : vector<2x192xf32> to vector<2x64xf32>
    %204 = vector.extract_strided_slice %194 {offsets = [0, 192], sizes = [2, 64], strides = [1, 1]} : vector<2x256xf32> to vector<2x64xf32>
    %205 = math.tanh %204 : vector<2x64xf32>
    %206 = arith.mulf %202, %175 : vector<2x64xf32>
    %207 = arith.mulf %201, %205 : vector<2x64xf32>
    %208 = arith.addf %206, %207 : vector<2x64xf32>
    %209 = math.tanh %208 : vector<2x64xf32>
    %210 = arith.mulf %203, %209 : vector<2x64xf32>
    %cst_120 = arith.constant dense<0.000000e+00> : vector<2x256xf32>
    %211 = tpu.matmul %210, %160, %cst_120 {dimension_numbers = #tpu.dot_dimension_numbers<[1], [0], [0], [1], [0, 0, 1, 1], [], []>} : vector<2x64xf32>, vector<64x256xf32>, vector<2x256xf32> -> vector<2x256xf32>
    %212 = arith.addf %211, %164 : vector<2x256xf32>
    %cst_121 = arith.constant dense<0.000000e+00> : vector<2x256xf32>
    %213 = tpu.matmul %192, %161, %cst_121 {dimension_numbers = #tpu.dot_dimension_numbers<[1], [0], [0], [1], [0, 0, 1, 1], [], []>} : vector<2x64xf32>, vector<64x256xf32>, vector<2x256xf32> -> vector<2x256xf32>
    %214 = arith.addf %212, %213 : vector<2x256xf32>
    %215 = vector.extract_strided_slice %214 {offsets = [0, 0], sizes = [2, 192], strides = [1, 1]} : vector<2x256xf32> to vector<2x192xf32>
    %216 = arith.negf %215 : vector<2x192xf32>
    %217 = math.exp %216 : vector<2x192xf32>
    %cst_122 = arith.constant 1.000000e+00 : f32
    %218 = vector.broadcast %cst_122 : f32 to vector<2x192xf32>
    %219 = arith.addf %218, %217 : vector<2x192xf32>
    %220 = arith.divf %218, %219 : vector<2x192xf32>
    %221 = vector.extract_strided_slice %220 {offsets = [0, 0], sizes = [2, 64], strides = [1, 1]} : vector<2x192xf32> to vector<2x64xf32>
    %222 = vector.extract_strided_slice %220 {offsets = [0, 64], sizes = [2, 64], strides = [1, 1]} : vector<2x192xf32> to vector<2x64xf32>
    %223 = vector.extract_strided_slice %220 {offsets = [0, 128], sizes = [2, 64], strides = [1, 1]} : vector<2x192xf32> to vector<2x64xf32>
    %224 = vector.extract_strided_slice %214 {offsets = [0, 192], sizes = [2, 64], strides = [1, 1]} : vector<2x256xf32> to vector<2x64xf32>
    %225 = math.tanh %224 : vector<2x64xf32>
    %226 = arith.mulf %222, %190 : vector<2x64xf32>
    %227 = arith.mulf %221, %225 : vector<2x64xf32>
    %228 = arith.addf %226, %227 : vector<2x64xf32>
    %229 = math.tanh %228 : vector<2x64xf32>
    %230 = arith.mulf %223, %229 : vector<2x64xf32>
    %cst_123 = arith.constant dense<0.000000e+00> : vector<2x256xf32>
    %231 = tpu.matmul %210, %159, %cst_123 {dimension_numbers = #tpu.dot_dimension_numbers<[1], [0], [0], [1], [0, 0, 1, 1], [], []>} : vector<2x64xf32>, vector<64x256xf32>, vector<2x256xf32> -> vector<2x256xf32>
    %232 = arith.addf %157, %231 : vector<2x256xf32>
    %233 = vector.extract_strided_slice %232 {offsets = [0, 0], sizes = [2, 192], strides = [1, 1]} : vector<2x256xf32> to vector<2x192xf32>
    %234 = arith.negf %233 : vector<2x192xf32>
    %235 = math.exp %234 : vector<2x192xf32>
    %cst_124 = arith.constant 1.000000e+00 : f32
    %236 = vector.broadcast %cst_124 : f32 to vector<2x192xf32>
    %237 = arith.addf %236, %235 : vector<2x192xf32>
    %238 = arith.divf %236, %237 : vector<2x192xf32>
    %239 = vector.extract_strided_slice %238 {offsets = [0, 0], sizes = [2, 64], strides = [1, 1]} : vector<2x192xf32> to vector<2x64xf32>
    %240 = vector.extract_strided_slice %238 {offsets = [0, 64], sizes = [2, 64], strides = [1, 1]} : vector<2x192xf32> to vector<2x64xf32>
    %241 = vector.extract_strided_slice %238 {offsets = [0, 128], sizes = [2, 64], strides = [1, 1]} : vector<2x192xf32> to vector<2x64xf32>
    %242 = vector.extract_strided_slice %232 {offsets = [0, 192], sizes = [2, 64], strides = [1, 1]} : vector<2x256xf32> to vector<2x64xf32>
    %243 = math.tanh %242 : vector<2x64xf32>
    %244 = arith.mulf %240, %208 : vector<2x64xf32>
    %245 = arith.mulf %239, %243 : vector<2x64xf32>
    %246 = arith.addf %244, %245 : vector<2x64xf32>
    %247 = math.tanh %246 : vector<2x64xf32>
    %248 = arith.mulf %241, %247 : vector<2x64xf32>
    %cst_125 = arith.constant dense<0.000000e+00> : vector<2x256xf32>
    %249 = tpu.matmul %248, %160, %cst_125 {dimension_numbers = #tpu.dot_dimension_numbers<[1], [0], [0], [1], [0, 0, 1, 1], [], []>} : vector<2x64xf32>, vector<64x256xf32>, vector<2x256xf32> -> vector<2x256xf32>
    %250 = arith.addf %249, %164 : vector<2x256xf32>
    %cst_126 = arith.constant dense<0.000000e+00> : vector<2x256xf32>
    %251 = tpu.matmul %230, %161, %cst_126 {dimension_numbers = #tpu.dot_dimension_numbers<[1], [0], [0], [1], [0, 0, 1, 1], [], []>} : vector<2x64xf32>, vector<64x256xf32>, vector<2x256xf32> -> vector<2x256xf32>
    %252 = arith.addf %250, %251 : vector<2x256xf32>
    %253 = vector.extract_strided_slice %252 {offsets = [0, 0], sizes = [2, 192], strides = [1, 1]} : vector<2x256xf32> to vector<2x192xf32>
    %254 = arith.negf %253 : vector<2x192xf32>
    %255 = math.exp %254 : vector<2x192xf32>
    %cst_127 = arith.constant 1.000000e+00 : f32
    %256 = vector.broadcast %cst_127 : f32 to vector<2x192xf32>
    %257 = arith.addf %256, %255 : vector<2x192xf32>
    %258 = arith.divf %256, %257 : vector<2x192xf32>
    %259 = vector.extract_strided_slice %258 {offsets = [0, 0], sizes = [2, 64], strides = [1, 1]} : vector<2x192xf32> to vector<2x64xf32>
    %260 = vector.extract_strided_slice %258 {offsets = [0, 64], sizes = [2, 64], strides = [1, 1]} : vector<2x192xf32> to vector<2x64xf32>
    %261 = vector.extract_strided_slice %258 {offsets = [0, 128], sizes = [2, 64], strides = [1, 1]} : vector<2x192xf32> to vector<2x64xf32>
    %262 = vector.extract_strided_slice %252 {offsets = [0, 192], sizes = [2, 64], strides = [1, 1]} : vector<2x256xf32> to vector<2x64xf32>
    %263 = math.tanh %262 : vector<2x64xf32>
    %264 = arith.mulf %260, %228 : vector<2x64xf32>
    %265 = arith.mulf %259, %263 : vector<2x64xf32>
    %266 = arith.addf %264, %265 : vector<2x64xf32>
    %267 = math.tanh %266 : vector<2x64xf32>
    %268 = arith.mulf %261, %267 : vector<2x64xf32>
    %cst_128 = arith.constant dense<0.000000e+00> : vector<2x256xf32>
    %269 = tpu.matmul %248, %159, %cst_128 {dimension_numbers = #tpu.dot_dimension_numbers<[1], [0], [0], [1], [0, 0, 1, 1], [], []>} : vector<2x64xf32>, vector<64x256xf32>, vector<2x256xf32> -> vector<2x256xf32>
    %270 = arith.addf %158, %269 : vector<2x256xf32>
    %271 = vector.extract_strided_slice %270 {offsets = [0, 0], sizes = [2, 192], strides = [1, 1]} : vector<2x256xf32> to vector<2x192xf32>
    %272 = arith.negf %271 : vector<2x192xf32>
    %273 = math.exp %272 : vector<2x192xf32>
    %cst_129 = arith.constant 1.000000e+00 : f32
    %274 = vector.broadcast %cst_129 : f32 to vector<2x192xf32>
    %275 = arith.addf %274, %273 : vector<2x192xf32>
    %276 = arith.divf %274, %275 : vector<2x192xf32>
    %277 = vector.extract_strided_slice %276 {offsets = [0, 0], sizes = [2, 64], strides = [1, 1]} : vector<2x192xf32> to vector<2x64xf32>
    %278 = vector.extract_strided_slice %276 {offsets = [0, 64], sizes = [2, 64], strides = [1, 1]} : vector<2x192xf32> to vector<2x64xf32>
    %279 = vector.extract_strided_slice %276 {offsets = [0, 128], sizes = [2, 64], strides = [1, 1]} : vector<2x192xf32> to vector<2x64xf32>
    %280 = vector.extract_strided_slice %270 {offsets = [0, 192], sizes = [2, 64], strides = [1, 1]} : vector<2x256xf32> to vector<2x64xf32>
    %281 = math.tanh %280 : vector<2x64xf32>
    %282 = arith.mulf %278, %246 : vector<2x64xf32>
    %283 = arith.mulf %277, %281 : vector<2x64xf32>
    %284 = arith.addf %282, %283 : vector<2x64xf32>
    %285 = math.tanh %284 : vector<2x64xf32>
    %286 = arith.mulf %279, %285 : vector<2x64xf32>
    %cst_130 = arith.constant dense<0.000000e+00> : vector<2x256xf32>
    %287 = tpu.matmul %286, %160, %cst_130 {dimension_numbers = #tpu.dot_dimension_numbers<[1], [0], [0], [1], [0, 0, 1, 1], [], []>} : vector<2x64xf32>, vector<64x256xf32>, vector<2x256xf32> -> vector<2x256xf32>
    %288 = arith.addf %287, %164 : vector<2x256xf32>
    %cst_131 = arith.constant dense<0.000000e+00> : vector<2x256xf32>
    %289 = tpu.matmul %268, %161, %cst_131 {dimension_numbers = #tpu.dot_dimension_numbers<[1], [0], [0], [1], [0, 0, 1, 1], [], []>} : vector<2x64xf32>, vector<64x256xf32>, vector<2x256xf32> -> vector<2x256xf32>
    %290 = arith.addf %288, %289 : vector<2x256xf32>
    %291 = vector.extract_strided_slice %290 {offsets = [0, 0], sizes = [2, 192], strides = [1, 1]} : vector<2x256xf32> to vector<2x192xf32>
    %292 = arith.negf %291 : vector<2x192xf32>
    %293 = math.exp %292 : vector<2x192xf32>
    %cst_132 = arith.constant 1.000000e+00 : f32
    %294 = vector.broadcast %cst_132 : f32 to vector<2x192xf32>
    %295 = arith.addf %294, %293 : vector<2x192xf32>
    %296 = arith.divf %294, %295 : vector<2x192xf32>
    %297 = vector.extract_strided_slice %296 {offsets = [0, 0], sizes = [2, 64], strides = [1, 1]} : vector<2x192xf32> to vector<2x64xf32>
    %298 = vector.extract_strided_slice %296 {offsets = [0, 64], sizes = [2, 64], strides = [1, 1]} : vector<2x192xf32> to vector<2x64xf32>
    %299 = vector.extract_strided_slice %296 {offsets = [0, 128], sizes = [2, 64], strides = [1, 1]} : vector<2x192xf32> to vector<2x64xf32>
    %300 = vector.extract_strided_slice %290 {offsets = [0, 192], sizes = [2, 64], strides = [1, 1]} : vector<2x256xf32> to vector<2x64xf32>
    %301 = math.tanh %300 : vector<2x64xf32>
    %302 = arith.mulf %298, %266 : vector<2x64xf32>
    %303 = arith.mulf %297, %301 : vector<2x64xf32>
    %304 = arith.addf %302, %303 : vector<2x64xf32>
    %305 = math.tanh %304 : vector<2x64xf32>
    %306 = arith.mulf %299, %305 : vector<2x64xf32>
    %c0_133 = arith.constant 0 : index
    %c0_134 = arith.constant 0 : index
    %307 = vector.load %arg16[%c0_133, %c0_134] : memref<1x64xf32, #tpu.memory_space<vmem>>, vector<1x64xf32>
    %308 = vector.broadcast %307 : vector<1x64xf32> to vector<2x64xf32>
    %309 = arith.mulf %306, %308 : vector<2x64xf32>
    %c0_135 = arith.constant 0 : index
    %c0_136 = arith.constant 0 : index
    %310 = vector.load %arg17[%c0_135, %c0_136] : memref<1x64xf32, #tpu.memory_space<vmem>>, vector<1x64xf32>
    %311 = vector.broadcast %310 : vector<1x64xf32> to vector<2x64xf32>
    %312 = arith.addf %309, %311 : vector<2x64xf32>
    %c0_137 = arith.constant 0 : index
    %c0_138 = arith.constant 0 : index
    %313 = vector.load %arg18[%c0_137, %c0_138] : memref<64x32xf32, #tpu.memory_space<vmem>>, vector<64x32xf32>
    %cst_139 = arith.constant dense<0.000000e+00> : vector<2x32xf32>
    %314 = tpu.matmul %312, %313, %cst_139 {dimension_numbers = #tpu.dot_dimension_numbers<[1], [0], [0], [1], [0, 0, 1, 1], [], []>} : vector<2x64xf32>, vector<64x32xf32>, vector<2x32xf32> -> vector<2x32xf32>
    %c0_140 = arith.constant 0 : index
    %c0_141 = arith.constant 0 : index
    %315 = vector.load %arg19[%c0_140, %c0_141] : memref<1x32xf32, #tpu.memory_space<vmem>>, vector<1x32xf32>
    %316 = vector.broadcast %315 : vector<1x32xf32> to vector<2x32xf32>
    %317 = arith.addf %314, %316 : vector<2x32xf32>
    %c0_142 = arith.constant 0 : index
    %c0_143 = arith.constant 0 : index
    %318 = vector.load %arg20[%c0_142, %c0_143] : memref<1x32xf32, #tpu.memory_space<vmem>>, vector<1x32xf32>
    %319 = vector.broadcast %318 : vector<1x32xf32> to vector<2x32xf32>
    %320 = arith.mulf %317, %319 : vector<2x32xf32>
    %c0_144 = arith.constant 0 : index
    %c0_145 = arith.constant 0 : index
    %321 = vector.load %arg21[%c0_144, %c0_145] : memref<1x32xf32, #tpu.memory_space<vmem>>, vector<1x32xf32>
    %322 = vector.broadcast %321 : vector<1x32xf32> to vector<2x32xf32>
    %323 = arith.addf %320, %322 : vector<2x32xf32>
    %c0_146 = arith.constant 0 : index
    %c0_147 = arith.constant 0 : index
    %324 = vector.load %arg22[%c0_146, %c0_147] : memref<32x8xf32, #tpu.memory_space<vmem>>, vector<32x8xf32>
    %cst_148 = arith.constant dense<0.000000e+00> : vector<2x8xf32>
    %325 = tpu.matmul %323, %324, %cst_148 {dimension_numbers = #tpu.dot_dimension_numbers<[1], [0], [0], [1], [0, 0, 1, 1], [], []>} : vector<2x32xf32>, vector<32x8xf32>, vector<2x8xf32> -> vector<2x8xf32>
    %c0_149 = arith.constant 0 : index
    %c0_150 = arith.constant 0 : index
    %326 = vector.load %arg23[%c0_149, %c0_150] : memref<1x8xf32, #tpu.memory_space<vmem>>, vector<1x8xf32>
    %327 = vector.broadcast %326 : vector<1x8xf32> to vector<2x8xf32>
    %328 = arith.addf %325, %327 : vector<2x8xf32>
    %cst_151 = arith.constant dense<0xFF800000> : vector<2xf32>
    %329 = vector.multi_reduction <maximumf>, %328, %cst_151 [1] : vector<2x8xf32> to vector<2xf32>
    %330 = vector.shape_cast %329 : vector<2xf32> to vector<2x1xf32>
    %331 = vector.broadcast %330 : vector<2x1xf32> to vector<2x8xf32>
    %332 = arith.subf %328, %331 : vector<2x8xf32>
    %333 = math.exp %332 : vector<2x8xf32>
    %cst_152 = arith.constant dense<0.000000e+00> : vector<2xf32>
    %334 = vector.multi_reduction <add>, %333, %cst_152 [1] : vector<2x8xf32> to vector<2xf32>
    %335 = vector.shape_cast %334 : vector<2xf32> to vector<2x1xf32>
    %336 = math.log %335 : vector<2x1xf32>
    %337 = arith.addf %330, %336 : vector<2x1xf32>
    %338 = vector.broadcast %337 : vector<2x1xf32> to vector<2x8xf32>
    %339 = arith.subf %328, %338 : vector<2x8xf32>
    %c0_153 = arith.constant 0 : index
    %c0_154 = arith.constant 0 : index
    %340 = vector.load %arg24[%c0_153, %c0_154] : memref<2x8xf32, #tpu.memory_space<vmem>>, vector<2x8xf32>
    tpu.vector_store %arg24[%c0_153, %c0_154], %339 {strides = array<i32>} : memref<2x8xf32, #tpu.memory_space<vmem>>, vector<2x8xf32>,
    return
  }
}

</mosaic_0001>

<bundles_post_ra>
// kernel: _lambda_.1
= control target key start
LH: loop header
LB: loop body
LE: loop exit
PB: predicated region body
PF: predicated region fallthrough
CT: control target
= control target key end

     0   :  { %s7141_s0 = inlined_call_operand.vmem [shape: f32[48,8], index: 0, kind: input, shape index: {}]   ;;  %s7142_s1 = inlined_call_operand.vmem [shape: f32[5,8,96], index: 1, kind: input, shape index: {}]   ;;  %s7143_s2 = inlined_call_operand.vmem [shape: f32[1,96], index: 2, kind: input, shape index: {}]   ;;  %s7144_s3 = inlined_call_operand.vmem [shape: f32[1,96], index: 3, kind: input, shape index: {}]   ;;  %s7145_s4 = inlined_call_operand.vmem [shape: f32[5,96,64], index: 4, kind: input, shape index: {}]   ;;  %s7146_s5 = inlined_call_operand.vmem [shape: f32[1,64], index: 5, kind: input, shape index: {}]   ;;  %s7147_s6 = inlined_call_operand.vmem [shape: f32[1,64], index: 6, kind: input, shape index: {}]   ;;  %s7148_s7 = inlined_call_operand.vmem [shape: f32[5,64,32], index: 7, kind: input, shape index: {}]   ;;  %s7149_s8 = inlined_call_operand.vmem [shape: f32[1,32], index: 8, kind: input, shape index: {}]   ;;  %s7150_s9 = inlined_call_operand.vmem [shape: f32[1,32], index: 9, kind: input, shape index: {}]   ;;  %s7151_s10 = inlined_call_operand.vmem [shape: f32[4,32,1024], index: 10, kind: input, shape index: {}]   ;;  %s7152_s11 = inlined_call_operand.vmem [shape: f32[1,1024], index: 11, kind: input, shape index: {}]   ;;  %s7153_s12 = inlined_call_operand.vmem [shape: f32[64,256], index: 12, kind: input, shape index: {}]   ;;  %s7154_s13 = inlined_call_operand.vmem [shape: f32[64,256], index: 13, kind: input, shape index: {}]   ;;  %s7155_s14 = inlined_call_operand.vmem [shape: f32[64,256], index: 14, kind: input, shape index: {}]   ;;  %s7156_s15 = inlined_call_operand.vmem [shape: f32[1,256], index: 15, kind: input, shape index: {}]   ;;  %s7157_s16 = inlined_call_operand.vmem [shape: f32[1,64], index: 16, kind: input, shape index: {}]   ;;  %s7158_s17 = inlined_call_operand.vmem [shape: f32[1,64], index: 17, kind: input, shape index: {}]   ;;  %s7159_s18 = inlined_call_operand.vmem [shape: f32[64,32], index: 18, kind: input, shape index: {}]   ;;  %s7160_s19 = inlined_call_operand.vmem [shape: f32[1,32], index: 19, kind: input, shape index: {}]   ;;  %s7161_s20 = inlined_call_operand.vmem [shape: f32[1,32], index: 20, kind: input, shape index: {}]   ;;  %s7162_s21 = inlined_call_operand.vmem [shape: f32[1,32], index: 21, kind: input, shape index: {}]   ;;  %s7163_s22 = inlined_call_operand.vmem [shape: f32[32,8], index: 22, kind: input, shape index: {}]   ;;  %s7164_s23 = inlined_call_operand.vmem [shape: f32[1,8], index: 23, kind: input, shape index: {}]   ;;  %s7165_s24 = inlined_call_operand.hbm [shape: f32[2,8], index: 24, kind: output, shape index: {}]  }
   0x1   :  { %7181 = sst [smem:[#allocation17_spill]] %s7141_s0 }
   0x2   :  { %7182 = sst [smem:[#allocation18_spill]] %s7142_s1 }
   0x3   :  { %7183 = sst [smem:[#allocation19_spill]] %s7143_s2 }
   0x4   :  { %7184 = sst [smem:[#allocation20_spill]] %s7144_s3 }
   0x5   :  { %7185 = sst [smem:[#allocation21_spill]] %s7145_s4 }
   0x6   :  { %7186 = sst [smem:[#allocation22_spill]] %s7146_s5 }
   0x7   :  { %7187 = sst [smem:[#allocation23_spill]] %s7147_s6 }
   0x8   :  { %7188 = sst [smem:[#allocation24_spill]] %s7148_s7 }
   0x9   :  { %7189 = sst [smem:[#allocation25_spill]] %s7149_s8 }
   0xa   :  { %7190 = sst [smem:[#allocation26_spill]] %s7160_s19 }
   0xb   :  { %s7191_s27 = sld [smem:[#allocation18_spill]]  ;;  %vm92_vm0 = vcmask 1041408   ;;  %vm102_vm1 = vcmask 64512   ;;  %vm196_vm2 = vcmask 1043456  }
   0xc   :  { %s7192_s19 = sld [smem:[#allocation17_spill]] }
  0x11   :  { %v4469_v0 = vld [vmem:[%s7191_s27 + $0x8] sm:$0xff]  ;;  %v84_v8 = vld [vmem:[%s7191_s27] sm:$0xff]  ;;  %v4478_v12 = vld [vmem:[%s7191_s27 + $0x10] sm:$0xff] }
  0x12   :  { %v78_v1 = vld [vmem:[%s7192_s19] sm:$0xff]  ;;  %v79_v2 = vld [vmem:[%s7192_s19 + $0x8] sm:$0xff]  ;;  %5274 = vmatprep.subr.mxu1 %v4469_v0  ;;  %4944 = vmatprep.subr.mxu0 %v4469_v0  ;;  %v80_v6 = vld [vmem:[%s7192_s19 + $0x10] sm:$0xff] }
  0x13   :  { %v93_v3 = vrot.slane %v78_v1, 6  ;;  %v94_v4 = vrot.slane %v79_v2, 6  ;;  %v197_v5 = vrot.slane %v78_v1, 4  ;;  %v81_v7 = vld [vmem:[%s7192_s19 + $0x18] sm:$0xff]  ;;  %5275 = vmatpush3.msra.mxu1 %v4469_v0  ;;  %4945 = vmatpush3.msra.mxu0 %v4469_v0  ;;  %v96_v9 = vrot.slane %v80_v6, 6  ;;  %v82_v11 = vld [vmem:[%s7192_s19 + $0x20] sm:$0xff] }
  0x14   :  { %v98_v10 = vrot.slane %v81_v7, 6  ;;  %v198_v13 = vrot.slane %v79_v2, 4  ;;  %4952 = vmatprep.subr.mxu1 %v84_v8  ;;  %v100_v15 = vrot.slane %v82_v11, 6  ;;  %4960 = vmatprep.subr.mxu0 %v4478_v12  ;;  %v200_v16 = vrot.slane %v80_v6, 4 }
  0x15   :  { %v95_v14 = vsel %vm92_vm0, %v93_v3, %v94_v4  ;;  %v97_v18 = vsel %vm92_vm0, %v94_v4, %v96_v9  ;;  %v202_v20 = vrot.slane %v81_v7, 4 }
  0x16   :  { %4946 = vmatprep.mubr.msk.f32.mxu0 %vm102_vm1, %v95_v14  ;;  %v99_v17 = vsel %vm92_vm0, %v96_v9, %v98_v10  ;;  %v199_v19 = vsel %vm196_vm2, %v197_v5, %v198_v13 }
  0x17   :  { %29 = vsyncpa [#allocation5], 0  ;;  %4949 = vmatprep.mubr.msk.f32.mxu1 %vm102_vm1, %v99_v17  ;;  %4947 = vmatmul.mubr.msk.f32.vlgmr.msra.gmra.mxu0 %vm102_vm1, %v97_v18  ;;  %v101_v21 = vsel %vm92_vm0, %v98_v10, %v100_v15  ;;  %v4483_v22 = vld [vmem:[%s7191_s27 + $0x18] sm:$0xff]  ;;  %v4488_v23 = vld [vmem:[%s7191_s27 + $0x20] sm:$0xff]  ;;  %v201_v24 = vsel %vm196_vm2, %v198_v13, %v200_v16  ;;  %v204_v25 = vrot.slane %v82_v11, 4  ;;  %v203_v26 = vsel %vm196_vm2, %v200_v16, %v202_v20  ;;  %s7193_s30 = sld [smem:[#allocation21_spill]] }
  0x18   :  { %4950 = vmatmul.mubr.msk.f32.vlgmr.msra.gmra.mxu1 %vm102_vm1, %v101_v21  ;;  %4961 = vmatpush3.msra.mxu0 %v4478_v12  ;;  %v402_v27 = vrot.slane %v79_v2, 2  ;;  %v403_v28 = vrot.slane %v80_v6, 2  ;;  %vm401_vm3 = vcmask 1045504   ;;  %v405_v30 = vrot.slane %v81_v7, 2  ;;  %v83_v33 = vld [vmem:[%s7192_s19 + $0x28] sm:$0xff]  ;;  %s7194_s28 = sld [smem:[#allocation19_spill]] }
  0x19   :  { %4953 = vmatpush3.msra.mxu1 %v84_v8  ;;  %4954 = vmatprep.mubr.msk.f32.mxu1 %vm102_vm1, %v199_v19  ;;  %v205_v29 = vsel %vm196_vm2, %v202_v20, %v204_v25  ;;  %v407_v32 = vrot.slane %v82_v11, 2  ;;  %v510_v34 = vrot.slane %v83_v33, 4  ;;  %v409_v36 = vrot.slane %v83_v33, 2  ;;  %s7195_s29 = sld [smem:[#allocation20_spill]]  ;;  %s5403_s8 = smov 64  }
  0x1a   :  { %4962 = vmatprep.mubr.msk.f32.mxu0 %vm102_vm1, %v79_v2  ;;  %4968 = vmatprep.subr.mxu1 %v4483_v22  ;;  %v404_v31 = vsel %vm401_vm3, %v402_v27, %v403_v28  ;;  %v406_v35 = vsel %vm401_vm3, %v403_v28, %v405_v30  ;;  %vm629_vm4 = vcmask 785408   ;;  %v7170_v56 = vmov 0.0   ;;  %s7197_s0 = sld [smem:[#allocation22_spill]] }
  0x1b   :  { %4963 = vmatmul.mubr.msk.f32.vlgmr.msra.gmra.mxu0 %vm102_vm1, %v80_v6  ;;  %4976 = vmatprep.subr.mxu0 %v4488_v23  ;;  %v408_v37 = vsel %vm401_vm3, %v405_v30, %v407_v32  ;;  %v511_v38 = vsel %vm196_vm2, %v204_v25, %v510_v34  ;;  %v410_v39 = vsel %vm401_vm3, %v407_v32, %v409_v36  ;;  %vm1238_vm5 = vcmask 523264   ;;  %s7198_s3 = sld [smem:[#allocation23_spill]] }
  0x1c   :  { %4955 = vmatmul.mubr.msk.f32.vlgmr.msra.gmra.mxu1 %vm102_vm1, %v201_v24  ;;  %4977 = vmatpush3.msra.mxu0 %v4488_v23  ;;  %630 = vst.msk [vmem:[#allocation2] sm:$0xff] %vm629_vm4, %v7170_v56  ;;  %631 = vst.msk [vmem:[#allocation2 + $0x28] sm:$0xff] %vm629_vm4, %v7170_v56  ;;  %s7199_s5 = sld [smem:[#allocation25_spill]]  ;;  %vm1924_vm6 = vcmask 261120   ;;  %vm5404_vm7 = vmmov 0   ;;  %vm4440_vm8 = vcmask 58368  }
  0x1d   :  { %4969 = vmatpush3.msra.mxu1 %v4483_v22  ;;  %4957 = vmatprep.mubr.msk.f32.mxu1 %vm102_vm1, %v203_v26  ;;  %v4506_v40 = vld [vmem:[%s7193_s30 + $0xb8] sm:$0xff]  ;;  %v4505_v42 = vld [vmem:[%s7193_s30 + $0xb0] sm:$0xff]  ;;  %v4504_v44 = vld [vmem:[%s7193_s30 + $0xa8] sm:$0xff]  ;;  %1239 = vst.msk [vmem:[#allocation3] sm:$0xff] %vm1238_vm5, %v7170_v56  ;;  %s7224_s2 = sld [smem:[#allocation26_spill]] }
  0x1e   :  { %4965 = vmatprep.mubr.msk.f32.mxu0 %vm102_vm1, %v81_v7  ;;  %v653_v41 = vld [vmem:[%s7193_s30 + $0x58] sm:$0xff]  ;;  %4984 = vmatprep.subr.mxu1 %v4506_v40  ;;  %v652_v43 = vld [vmem:[%s7193_s30 + $0x50] sm:$0xff]  ;;  %v651_v45 = vld [vmem:[%s7193_s30 + $0x48] sm:$0xff]  ;;  %1240 = vst.msk [vmem:[#allocation3 + $0x28] sm:$0xff] %vm1238_vm5, %v7170_v56 }
  0x1f   :  { %4966 = vmatmul.mubr.msk.f32.gmra.mxu0 %vm102_vm1, %v82_v11  ;;  %5014 = vmatprep.subr.mxu0 %v653_v41  ;;  %v4503_v46 = vld [vmem:[%s7193_s30 + $0xa0] sm:$0xff]  ;;  %v4502_v48 = vld [vmem:[%s7193_s30 + $0x98] sm:$0xff]  ;;  %v4501_v50 = vld [vmem:[%s7193_s30 + $0x90] sm:$0xff] }
  0x20   :  { %4958 = vmatmul.mubr.msk.f32.gmra.mxu1 %vm102_vm1, %v205_v29  ;;  %4978 = vmatprep.mubr.msk.f32.mxu0 %vm102_vm1, %v201_v24  ;;  %v650_v47 = vld [vmem:[%s7193_s30 + $0x40] sm:$0xff]  ;;  %v649_v49 = vld [vmem:[%s7193_s30 + $0x38] sm:$0xff]  ;;  %v648_v51 = vld [vmem:[%s7193_s30 + $0x30] sm:$0xff] }
  0x21   :  { %4970 = vmatprep.mubr.msk.f32.mxu1 %vm102_vm1, %v404_v31  ;;  %v4500_v52 = vld [vmem:[%s7193_s30 + $0x88] sm:$0xff]  ;;  %v4499_v54 = vld [vmem:[%s7193_s30 + $0x80] sm:$0xff]  ;;  %v4498_v57 = vld [vmem:[%s7193_s30 + $0x78] sm:$0xff] }
  0x22   :  { %v647_v53 = vld [vmem:[%s7193_s30 + $0x28] sm:$0xff]  ;;  %v646_v55 = vld [vmem:[%s7193_s30 + $0x20] sm:$0xff]  ;;  %v645_v58 = vld [vmem:[%s7193_s30 + $0x18] sm:$0xff] }
  0x23   :  { %4979 = vmatmul.mubr.msk.f32.vlgmr.msra.gmra.mxu0 %vm102_vm1, %v203_v26  ;;  %v4497_v59 = vld [vmem:[%s7193_s30 + $0x70] sm:$0xff]  ;;  %v4496_v61 = vld [vmem:[%s7193_s30 + $0x68] sm:$0xff]  ;;  %v4495_v63 = vld [vmem:[%s7193_s30 + $0x60] sm:$0xff] }
  0x24   :  { %4971 = vmatmul.mubr.msk.f32.vlgmr.msra.gmra.mxu1 %vm102_vm1, %v406_v35  ;;  %4981 = vmatprep.mubr.msk.f32.mxu0 %vm102_vm1, %v205_v29  ;;  %v644_v60 = vld [vmem:[%s7193_s30 + $0x10] sm:$0xff]  ;;  %v643_v62 = vld [vmem:[%s7193_s30 + $0x8] sm:$0xff]  ;;  %v642_v0 = vld [vmem:[%s7193_s30] sm:$0xff] }
  0x25   :  { %4973 = vmatprep.mubr.msk.f32.mxu1 %vm102_vm1, %v408_v37  ;;  %4985 = vmatpush3.msra.mxu1 %v4506_v40  ;;  %v5676_v1 = vld [vmem:[%s7193_s30 + $0x118] sm:$0xff]  ;;  %v4493_v25 = vld [vmem:[%s7194_s28] ss:$0 sm:$0xff] }
  0x26   :  { %5015 = vmatpush3.msra.mxu0 %v653_v41  ;;  %4986 = vmatprep.subr.mxu1 %v4505_v42  ;;  %v5681_v2 = vld [vmem:[%s7193_s30 + $0x178] sm:$0xff]  ;;  %v4494_v31 = vld [vmem:[%s7195_s29] ss:$0 sm:$0xff] }
  0x27   :  { %4982 = vmatmul.mubr.msk.f32.gmra.mxu0 %vm102_vm1, %v511_v38  ;;  %5016 = vmatprep.subr.mxu0 %v652_v43 }
  0x28   :  { %4974 = vmatmul.mubr.msk.f32.gmra.mxu1 %vm102_vm1, %v410_v39  ;;  %5017 = vmatpush3.msra.mxu0 %v652_v43 }
  0x29   :  { %4987 = vmatpush3.msra.mxu1 %v4505_v42  ;;  %5018 = vmatprep.subr.mxu0 %v651_v45 }
  0x2a   :  { %4988 = vmatprep.subr.mxu1 %v4504_v44  ;;  %5019 = vmatpush3.msra.mxu0 %v651_v45 }
  0x2b   :  { %4989 = vmatpush3.msra.mxu1 %v4504_v44  ;;  %5020 = vmatprep.subr.mxu0 %v650_v47 }
  0x2c   :  { %4990 = vmatprep.subr.mxu1 %v4503_v46  ;;  %5021 = vmatpush3.msra.mxu0 %v650_v47 }
  0x2d   :  { %4991 = vmatpush3.msra.mxu1 %v4503_v46  ;;  %5022 = vmatprep.subr.mxu0 %v649_v49 }
  0x2e   :  { %4992 = vmatprep.subr.mxu1 %v4502_v48  ;;  %5023 = vmatpush3.msra.mxu0 %v649_v49 }
  0x2f   :  { %4993 = vmatpush3.msra.mxu1 %v4502_v48  ;;  %5024 = vmatprep.subr.mxu0 %v648_v51 }
  0x30   :  { %4994 = vmatprep.subr.mxu1 %v4501_v50  ;;  %5025 = vmatpush3.msra.mxu0 %v648_v51 }
  0x31   :  { %4995 = vmatpush3.msra.mxu1 %v4501_v50  ;;  %5026 = vmatprep.subr.mxu0 %v647_v53 }
  0x32   :  { %4996 = vmatprep.subr.mxu1 %v4500_v52  ;;  %5027 = vmatpush3.msra.mxu0 %v647_v53  ;;  %v636_v53 = vld [vmem:[#allocation2] sm:$0xff] }
  0x33   :  { %4997 = vmatpush3.msra.mxu1 %v4500_v52  ;;  %5028 = vmatprep.subr.mxu0 %v646_v55 }
  0x34   :  { %4998 = vmatprep.subr.mxu1 %v4499_v54  ;;  %5029 = vmatpush3.msra.mxu0 %v646_v55  ;;  %v672_v55 = vrot.slane %v636_v53, 6 }
  0x35   :  { %4999 = vmatpush3.msra.mxu1 %v4499_v54  ;;  %5030 = vmatprep.subr.mxu0 %v645_v58 }
  0x36   :  { %5000 = vmatprep.subr.mxu1 %v4498_v57  ;;  %5031 = vmatpush3.msra.mxu0 %v645_v58 }
  0x37   :  { %5001 = vmatpush3.msra.mxu1 %v4498_v57  ;;  %5032 = vmatprep.subr.mxu0 %v644_v60  ;;  %v774_v57 = vrot.slane %v636_v53, 4  ;;  %v4550_v53 = vld [vmem:[%s7193_s30 + $0x198] sm:$0xff] }
  0x38   :  { %5002 = vmatprep.subr.mxu1 %v4497_v59  ;;  %5033 = vmatpush3.msra.mxu0 %v644_v60 }
  0x39   :  { %5003 = vmatpush3.msra.mxu1 %v4497_v59  ;;  %5034 = vmatprep.subr.mxu0 %v643_v62 }
  0x3a   :  { %5004 = vmatprep.subr.mxu1 %v4496_v61  ;;  %5035 = vmatpush3.msra.mxu0 %v643_v62 }
  0x3b   :  { %5005 = vmatpush3.msra.mxu1 %v4496_v61  ;;  %5036 = vmatprep.subr.mxu0 %v642_v0 }
  0x3c   :  { %5006 = vmatprep.subr.mxu1 %v4495_v63  ;;  %5037 = vmatpush3.msra.mxu0 %v642_v0 }
  0x3d   :  { %5007 = vmatpush3.msra.mxu1 %v4495_v63  ;;  %5074 = vmatprep.subr.mxu0 %v5681_v2 }
  0x3e   :  { %5044 = vmatprep.subr.mxu1 %v5676_v1 }
  0xd7   :  { %v4948_v3 = vpop.f32.mrf.mxu0 }
  0xd8   :  { %v4951_v4 = vpop.f32.mrf.mxu1 }
  0xd9   :  { %v177_v5 = vpop.f32.mrf.mxu0 }
  0xda   :  { %v187_v6 = vpop.f32.mrf.mxu1 }
  0xdb   :  { %v4964_v7 = vpop.f32.mrf.mxu0 }
  0xdc   :  { %v4956_v8 = vpop.f32.mrf.mxu1 }
  0xdd   :  { %v375_v9 = vpop.f32.mrf.mxu0  ;;  %v286_v11 = vadd.f32 %v4956_v8, %v4948_v3 }
  0xde   :  { %v280_v10 = vpop.f32.mrf.mxu1 }
  0xdf   :  { %v4967_v12 = vpop.f32.mrf.mxu0  ;;  %v281_v14 = vadd.f32 %v280_v10, %v177_v5  ;;  %v395_v17 = vadd.f32 %v4964_v7, %v286_v11  ;;  %v4541_v7 = vld [vmem:[%s7193_s30 + $0x170] sm:$0xff] }
  0xe0   :  { %v4959_v13 = vpop.f32.mrf.mxu1 }
  0xe1   :  { %v385_v15 = vpop.f32.mrf.mxu0  ;;  %v296_v18 = vadd.f32 %v4959_v13, %v4951_v4  ;;  %v394_v21 = vadd.f32 %v375_v9, %v281_v14 }
  0xe2   :  { %v290_v16 = vpop.f32.mrf.mxu1 }
  0xe3   :  { %v4980_v19 = vpop.f32.mrf.mxu0  ;;  %v291_v22 = vadd.f32 %v290_v16, %v187_v6  ;;  %v397_v27 = vadd.f32 %v4967_v12, %v296_v18  ;;  %v4525_v6 = vld [vmem:[%s7193_s30 + $0x110] sm:$0xff]  ;;  %v4523_v18 = vld [vmem:[%s7193_s30 + $0x100] sm:$0xff] }
  0xe4   :  { %v4972_v20 = vpop.f32.mrf.mxu1 }
  0xe5   :  { %v505_v23 = vadd.f32 %v4972_v20, %v395_v17  ;;  %v580_v24 = vpop.f32.mrf.mxu0  ;;  %v396_v33 = vadd.f32 %v385_v15, %v291_v22  ;;  %v4524_v15 = vld [vmem:[%s7193_s30 + $0x108] sm:$0xff]  ;;  %v4522_v22 = vld [vmem:[%s7193_s30 + $0xf8] sm:$0xff] }
  0xe6   :  { %v485_v26 = vpop.f32.mrf.mxu1 }
  0xe7   :  { %v600_v28 = vadd.f32 %v4980_v19, %v505_v23  ;;  %v504_v29 = vadd.f32 %v485_v26, %v394_v21  ;;  %v4983_v30 = vpop.f32.mrf.mxu0  ;;  %v4539_v19 = vld [vmem:[%s7193_s30 + $0x160] sm:$0xff]  ;;  %v4538_v23 = vld [vmem:[%s7193_s30 + $0x158] sm:$0xff]  ;;  %v4520_v26 = vld [vmem:[%s7193_s30 + $0xe8] sm:$0xff] }
  0xe8   :  { %v4975_v32 = vpop.f32.mrf.mxu1 }
  0xe9   :  { %v611_v34 = vmul.f32 %v4493_v25, %v600_v28  ;;  %v599_v35 = vadd.f32 %v580_v24, %v504_v29  ;;  %v507_v36 = vadd.f32 %v4975_v32, %v397_v27  ;;  %v590_v38 = vpop.f32.mrf.mxu0  ;;  %v4521_v24 = vld [vmem:[%s7193_s30 + $0xf0] sm:$0xff]  ;;  %v4536_v27 = vld [vmem:[%s7193_s30 + $0x148] sm:$0xff]  ;;  %v4519_v28 = vld [vmem:[%s7193_s30 + $0xe0] sm:$0xff] }
  0xea   :  { %v495_v37 = vpop.f32.mrf.mxu1  ;;  %v4535_v29 = vld [vmem:[%s7193_s30 + $0x140] sm:$0xff]  ;;  %v4517_v32 = vld [vmem:[%s7193_s30 + $0xd0] sm:$0xff] }
  0xeb   :  { %v622_v39 = vadd.f32 %v4494_v31, %v611_v34  ;;  %v610_v40 = vmul.f32 %v4493_v25, %v599_v35  ;;  %v506_v41 = vadd.f32 %v495_v37, %v396_v33  ;;  %v602_v42 = vadd.f32 %v4983_v30, %v507_v36  ;;  %v4518_v30 = vld [vmem:[%s7193_s30 + $0xd8] sm:$0xff]  ;;  %v4533_v33 = vld [vmem:[%s7193_s30 + $0x130] sm:$0xff]  ;;  %v4516_v34 = vld [vmem:[%s7193_s30 + $0xc8] sm:$0xff] }
  0xec   :  { %v4532_v35 = vld [vmem:[%s7193_s30 + $0x128] sm:$0xff]  ;;  %v4515_v36 = vld [vmem:[%s7193_s30 + $0xc0] sm:$0xff] }
  0xed   :  { %v626_v43 = vmax.f32 %v622_v39, 0.0  ;;  %v621_v44 = vadd.f32 %v4494_v31, %v610_v40  ;;  %v613_v45 = vmul.f32 %v4493_v25, %v602_v42  ;;  %v601_v46 = vadd.f32 %v590_v38, %v506_v41  ;;  %v4531_v37 = vld [vmem:[%s7193_s30 + $0x120] sm:$0xff]  ;;  %v641_v39 = vld [vmem:[#allocation2 + $0x28] sm:$0xff]  ;;  %v4558_v40 = vld [vmem:[%s7193_s30 + $0x1d8] sm:$0xff] }
  0xef   :  { %633 = vst.msk [vmem:[#allocation2 + $0x10] sm:$0xff] %vm629_vm4, %v626_v43  ;;  %v625_v47 = vmax.f32 %v621_v44, 0.0  ;;  %v624_v48 = vadd.f32 %v4494_v31, %v613_v45  ;;  %v612_v49 = vmul.f32 %v4493_v25, %v601_v46  ;;  %v4537_v25 = vld [vmem:[%s7193_s30 + $0x150] sm:$0xff]  ;;  %v1007_v43 = vrot.slane %v641_v39, 2  ;;  %v4556_v46 = vld [vmem:[%s7193_s30 + $0x1c8] sm:$0xff] }
  0xf0   :  { %v4557_v44 = vld [vmem:[%s7193_s30 + $0x1d0] sm:$0xff] }
  0xf1   :  { %632 = vst.msk [vmem:[#allocation2 + $0x8] sm:$0xff] %vm629_vm4, %v625_v47  ;;  %v628_v50 = vmax.f32 %v624_v48, 0.0  ;;  %v623_v51 = vadd.f32 %v4494_v31, %v612_v49  ;;  %v4534_v31 = vld [vmem:[%s7193_s30 + $0x138] sm:$0xff]  ;;  %v4555_v48 = vld [vmem:[%s7193_s30 + $0x1c0] sm:$0xff] }
  0xf2   :  { %v4554_v49 = vld [vmem:[%s7193_s30 + $0x1b8] sm:$0xff] }
  0xf3   :  { %635 = vst.msk [vmem:[#allocation2 + $0x20] sm:$0xff] %vm629_vm4, %v628_v50  ;;  %v627_v52 = vmax.f32 %v623_v51, 0.0  ;;  %v4553_v50 = vld [vmem:[%s7193_s30 + $0x1b0] sm:$0xff]  ;;  %v4552_v51 = vld [vmem:[%s7193_s30 + $0x1a8] sm:$0xff] }
  0xf5   :  { %634 = vst.msk [vmem:[#allocation2 + $0x18] sm:$0xff] %vm629_vm4, %v627_v52  ;;  %v4551_v52 = vld [vmem:[%s7193_s30 + $0x1a0] sm:$0xff] }
  0xf6   :  { %v5695_v54 = vld [vmem:[#allocation2 + $0x10] sm:$0xff] }
  0xf7   :  { %v675_v61 = vrot.slane %v5695_v54, 6  ;;  %v777_v62 = vrot.slane %v5695_v54, 4  ;;  %v1001_v20 = vrot.slane %v5695_v54, 2 }
  0xf8   :  { %v637_v58 = vld [vmem:[#allocation2 + $0x8] sm:$0xff] }
  0xf9   :  { %v673_v59 = vrot.slane %v637_v58, 6  ;;  %v775_v60 = vrot.slane %v637_v58, 4  ;;  %v1000_v17 = vrot.slane %v637_v58, 2 }
  0xfa   :  { %v5705_v5 = vld [vmem:[#allocation2 + $0x20] sm:$0xff] }
  0xfb   :  { %v674_v63 = vsel %vm92_vm0, %v672_v55, %v673_v59  ;;  %v776_v0 = vsel %vm196_vm2, %v774_v57, %v775_v60  ;;  %v676_v3 = vsel %vm92_vm0, %v673_v59, %v675_v61  ;;  %v5703_v4 = vsel %vm196_vm2, %v775_v60, %v777_v62  ;;  %v4548_v55 = vld [vmem:[%s7193_s30 + $0x188] sm:$0xff]  ;;  %v4547_v57 = vld [vmem:[%s7193_s30 + $0x180] sm:$0xff] }
  0xfc   :  { %5008 = vmatprep.mubr.msk.f32.mxu1 %vm629_vm4, %v674_v63  ;;  %5038 = vmatprep.mubr.msk.f32.mxu0 %vm629_vm4, %v776_v0  ;;  %v5715_v8 = vld [vmem:[#allocation2 + $0x18] sm:$0xff]  ;;  %v679_v11 = vrot.slane %v5705_v5, 6  ;;  %v781_v12 = vrot.slane %v5705_v5, 4  ;;  %v1002_v21 = vsel %vm401_vm3, %v1000_v17, %v1001_v20  ;;  %v1005_v42 = vrot.slane %v5705_v5, 2 }
  0xfd   :  { %5009 = vmatmul.mubr.msk.f32.vlgmr.msra.gmra.mxu1 %vm629_vm4, %v676_v3  ;;  %5039 = vmatmul.mubr.msk.f32.vlgmr.msra.gmra.mxu0 %vm629_vm4, %v5703_v4  ;;  %v677_v9 = vrot.slane %v5715_v8, 6  ;;  %v779_v10 = vrot.slane %v5715_v8, 4  ;;  %v1003_v38 = vrot.slane %v5715_v8, 2 }
  0xfe   :  { %5045 = vmatpush3.msra.mxu1 %v5676_v1  ;;  %5075 = vmatpush3.msra.mxu0 %v5681_v2  ;;  %v4540_v1 = vld [vmem:[%s7193_s30 + $0x168] sm:$0xff]  ;;  %v1008_v47 = vsel %vm401_vm3, %v1005_v42, %v1007_v43 }
  0xff   :  { %5046 = vmatprep.subr.mxu1 %v4525_v6  ;;  %5076 = vmatprep.subr.mxu0 %v4541_v7  ;;  %v678_v13 = vsel %vm92_vm0, %v675_v61, %v677_v9  ;;  %v5728_v14 = vsel %vm196_vm2, %v777_v62, %v779_v10  ;;  %v680_v2 = vsel %vm92_vm0, %v677_v9, %v679_v11 }
 0x100   :  { %5047 = vmatpush3.msra.mxu1 %v4525_v6  ;;  %5077 = vmatpush3.msra.mxu0 %v4541_v7  ;;  %v5740_v16 = vsel %vm196_vm2, %v779_v10, %v781_v12  ;;  %v1004_v41 = vsel %vm401_vm3, %v1001_v20, %v1003_v38  ;;  %v1006_v45 = vsel %vm401_vm3, %v1003_v38, %v1005_v42  ;;  %v4563_v38 = vld [vmem:[%s7197_s0] ss:$0 sm:$0xff] }
 0x101   :  { %5011 = vmatprep.mubr.msk.f32.mxu1 %vm629_vm4, %v678_v13  ;;  %5041 = vmatprep.mubr.msk.f32.mxu0 %vm629_vm4, %v5728_v14  ;;  %v4564_v42 = vld [vmem:[%s7198_s3] ss:$0 sm:$0xff] }
 0x102   :  { %5048 = vmatprep.subr.mxu1 %v4524_v15  ;;  %5078 = vmatprep.subr.mxu0 %v4540_v1 }
 0x103   :  { %5012 = vmatmul.mubr.msk.f32.gmra.mxu1 %vm629_vm4, %v680_v2  ;;  %5042 = vmatmul.mubr.msk.f32.gmra.mxu0 %vm629_vm4, %v5740_v16 }
 0x104   :  { %5049 = vmatpush3.msra.mxu1 %v4524_v15  ;;  %5079 = vmatpush3.msra.mxu0 %v4540_v1 }
 0x105   :  { %5050 = vmatprep.subr.mxu1 %v4523_v18  ;;  %5068 = vmatprep.mubr.msk.f32.mxu1 %vm629_vm4, %v637_v58  ;;  %v1119_v58 = vrot.slane %v641_v39, 4 }
 0x106   :  { %5080 = vmatprep.subr.mxu0 %v4539_v19  ;;  %5098 = vmatprep.mubr.msk.f32.mxu0 %vm629_vm4, %v1002_v21 }
 0x107   :  { %5051 = vmatpush3.msra.mxu1 %v4523_v18  ;;  %5081 = vmatpush3.msra.mxu0 %v4539_v19  ;;  %v1120_v59 = vsel %vm196_vm2, %v781_v12, %v1119_v58 }
 0x108   :  { %5052 = vmatprep.subr.mxu1 %v4522_v22  ;;  %5082 = vmatprep.subr.mxu0 %v4538_v23 }
 0x109   :  { %5053 = vmatpush3.msra.mxu1 %v4522_v22  ;;  %5083 = vmatpush3.msra.mxu0 %v4538_v23 }
 0x10a   :  { %5054 = vmatprep.subr.mxu1 %v4521_v24  ;;  %5084 = vmatprep.subr.mxu0 %v4537_v25 }
 0x10b   :  { %5055 = vmatpush3.msra.mxu1 %v4521_v24  ;;  %5085 = vmatpush3.msra.mxu0 %v4537_v25 }
 0x10c   :  { %5056 = vmatprep.subr.mxu1 %v4520_v26  ;;  %5086 = vmatprep.subr.mxu0 %v4536_v27 }
 0x10d   :  { %5057 = vmatpush3.msra.mxu1 %v4520_v26  ;;  %5087 = vmatpush3.msra.mxu0 %v4536_v27 }
 0x10e   :  { %5058 = vmatprep.subr.mxu1 %v4519_v28  ;;  %5088 = vmatprep.subr.mxu0 %v4535_v29 }
 0x10f   :  { %5059 = vmatpush3.msra.mxu1 %v4519_v28  ;;  %5089 = vmatpush3.msra.mxu0 %v4535_v29 }
 0x110   :  { %5060 = vmatprep.subr.mxu1 %v4518_v30  ;;  %5090 = vmatprep.subr.mxu0 %v4534_v31 }
 0x111   :  { %5061 = vmatpush3.msra.mxu1 %v4518_v30  ;;  %5091 = vmatpush3.msra.mxu0 %v4534_v31 }
 0x112   :  { %5062 = vmatprep.subr.mxu1 %v4517_v32  ;;  %5092 = vmatprep.subr.mxu0 %v4533_v33 }
 0x113   :  { %5063 = vmatpush3.msra.mxu1 %v4517_v32  ;;  %5093 = vmatpush3.msra.mxu0 %v4533_v33 }
 0x114   :  { %5064 = vmatprep.subr.mxu1 %v4516_v34  ;;  %5094 = vmatprep.subr.mxu0 %v4532_v35 }
 0x115   :  { %5065 = vmatpush3.msra.mxu1 %v4516_v34  ;;  %5095 = vmatpush3.msra.mxu0 %v4532_v35 }
 0x116   :  { %5066 = vmatprep.subr.mxu1 %v4515_v36  ;;  %5096 = vmatprep.subr.mxu0 %v4531_v37 }
 0x117   :  { %5067 = vmatpush3.msra.mxu1 %v4515_v36  ;;  %5097 = vmatpush3.msra.mxu0 %v4531_v37 }
 0x118   :  { %5069 = vmatmul.mubr.msk.f32.vlgmr.msra.gmra.mxu1 %vm629_vm4, %v5695_v54  ;;  %5099 = vmatmul.mubr.msk.f32.vlgmr.msra.gmra.mxu0 %vm629_vm4, %v1004_v41  ;;  %v4549_v54 = vld [vmem:[%s7193_s30 + $0x190] sm:$0xff]  ;;  %s7196_s30 = sld [smem:[#allocation24_spill]] }
 0x119   :  { %5104 = vmatprep.subr.mxu1 %v4558_v40  ;;  %5071 = vmatprep.mubr.msk.f32.mxu1 %vm629_vm4, %v5715_v8 }
 0x11a   :  { %5101 = vmatprep.mubr.msk.f32.mxu0 %vm629_vm4, %v1006_v45  ;;  %5105 = vmatpush3.msra.mxu1 %v4558_v40 }
 0x11b   :  { %5106 = vmatprep.subr.mxu1 %v4557_v44 }
 0x11c   :  { %5107 = vmatpush3.msra.mxu1 %v4557_v44  ;;  %5102 = vmatmul.mubr.msk.f32.gmra.mxu0 %vm629_vm4, %v1008_v47 }
 0x11d   :  { %5072 = vmatmul.mubr.msk.f32.gmra.mxu1 %vm629_vm4, %v5705_v5  ;;  %5108 = vmatprep.subr.mxu1 %v4556_v46 }
 0x11e   :  { %5109 = vmatpush3.msra.mxu1 %v4556_v46  ;;  %5128 = vmatprep.mubr.msk.f32.mxu1 %vm629_vm4, %v5703_v4  ;;  %v4588_v60 = vld [vmem:[%s7196_s30 + $0xb8] sm:$0xff]  ;;  %v4587_v61 = vld [vmem:[%s7196_s30 + $0xb0] sm:$0xff]  ;;  %v4586_v63 = vld [vmem:[%s7196_s30 + $0xa8] sm:$0xff] }
 0x11f   :  { %5110 = vmatprep.subr.mxu1 %v4555_v48  ;;  %v4572_v62 = vld [vmem:[%s7196_s30 + $0x78] sm:$0xff]  ;;  %v4571_v0 = vld [vmem:[%s7196_s30 + $0x70] sm:$0xff]  ;;  %v4585_v3 = vld [vmem:[%s7196_s30 + $0xa0] sm:$0xff] }
 0x120   :  { %5111 = vmatpush3.msra.mxu1 %v4555_v48  ;;  %5134 = vmatprep.subr.mxu0 %v4572_v62  ;;  %v4570_v4 = vld [vmem:[%s7196_s30 + $0x68] sm:$0xff]  ;;  %v4584_v5 = vld [vmem:[%s7196_s30 + $0x98] sm:$0xff]  ;;  %v4569_v6 = vld [vmem:[%s7196_s30 + $0x60] sm:$0xff] }
 0x121   :  { %5112 = vmatprep.subr.mxu1 %v4554_v49  ;;  %5135 = vmatpush3.msra.mxu0 %v4572_v62  ;;  %v4583_v7 = vld [vmem:[%s7196_s30 + $0x90] sm:$0xff]  ;;  %v4568_v8 = vld [vmem:[%s7196_s30 + $0x58] sm:$0xff]  ;;  %v4582_v9 = vld [vmem:[%s7196_s30 + $0x88] sm:$0xff] }
 0x122   :  { %5113 = vmatpush3.msra.mxu1 %v4554_v49  ;;  %5136 = vmatprep.subr.mxu0 %v4571_v0  ;;  %v4567_v10 = vld [vmem:[%s7196_s30 + $0x50] sm:$0xff]  ;;  %v4581_v11 = vld [vmem:[%s7196_s30 + $0x80] sm:$0xff]  ;;  %v4566_v12 = vld [vmem:[%s7196_s30 + $0x48] sm:$0xff] }
 0x123   :  { %5114 = vmatprep.subr.mxu1 %v4553_v50  ;;  %5137 = vmatpush3.msra.mxu0 %v4571_v0  ;;  %v5918_v13 = vld [vmem:[%s7196_s30 + $0x138] sm:$0xff] }
 0x124   :  { %5115 = vmatpush3.msra.mxu1 %v4553_v50  ;;  %5138 = vmatprep.subr.mxu0 %v4570_v4  ;;  %v5927_v15 = vld [vmem:[%s7196_s30 + $0x38] sm:$0xff] }
 0x125   :  { %5116 = vmatprep.subr.mxu1 %v4552_v51  ;;  %5139 = vmatpush3.msra.mxu0 %v4570_v4 }
 0x126   :  { %5117 = vmatpush3.msra.mxu1 %v4552_v51  ;;  %5140 = vmatprep.subr.mxu0 %v4569_v6 }
 0x127   :  { %5118 = vmatprep.subr.mxu1 %v4551_v52  ;;  %5141 = vmatpush3.msra.mxu0 %v4569_v6 }
 0x128   :  { %5119 = vmatpush3.msra.mxu1 %v4551_v52  ;;  %5142 = vmatprep.subr.mxu0 %v4568_v8 }
 0x129   :  { %5120 = vmatprep.subr.mxu1 %v4550_v53  ;;  %5143 = vmatpush3.msra.mxu0 %v4568_v8 }
 0x12a   :  { %5121 = vmatpush3.msra.mxu1 %v4550_v53  ;;  %5144 = vmatprep.subr.mxu0 %v4567_v10 }
 0x12b   :  { %5122 = vmatprep.subr.mxu1 %v4549_v54  ;;  %5145 = vmatpush3.msra.mxu0 %v4567_v10 }
 0x12c   :  { %5123 = vmatpush3.msra.mxu1 %v4549_v54  ;;  %5146 = vmatprep.subr.mxu0 %v4566_v12 }
 0x12d   :  { %5124 = vmatprep.subr.mxu1 %v4548_v55  ;;  %5147 = vmatpush3.msra.mxu0 %v4566_v12  ;;  %v4610_v12 = vld [vmem:[%s7196_s30 + $0x128] sm:$0xff] }
 0x12e   :  { %5125 = vmatpush3.msra.mxu1 %v4548_v55 }
 0x12f   :  { %5126 = vmatprep.subr.mxu1 %v4547_v57 }
 0x130   :  { %5127 = vmatpush3.msra.mxu1 %v4547_v57 }
 0x131   :  { %5129 = vmatmul.mubr.msk.f32.vlgmr.msra.gmra.mxu1 %vm629_vm4, %v5728_v14  ;;  %5178 = vmatprep.subr.mxu1 %v4588_v60  ;;  %v4565_v14 = vld [vmem:[%s7196_s30 + $0x40] sm:$0xff] }
 0x132   :  { %5131 = vmatprep.mubr.msk.f32.mxu1 %vm629_vm4, %v5740_v16  ;;  %5179 = vmatpush3.msra.mxu1 %v4588_v60 }
 0x133   :  { %5180 = vmatprep.subr.mxu1 %v4587_v61  ;;  %5148 = vmatprep.subr.mxu0 %v4565_v14 }
 0x134   :  { %5181 = vmatpush3.msra.mxu1 %v4587_v61  ;;  %5149 = vmatpush3.msra.mxu0 %v4565_v14 }
 0x135   :  { %5132 = vmatmul.mubr.msk.f32.gmra.mxu1 %vm629_vm4, %v1120_v59  ;;  %5182 = vmatprep.subr.mxu1 %v4586_v63 }
 0x136   :  { %5183 = vmatpush3.msra.mxu1 %v4586_v63  ;;  %5156 = vmatprep.subr.mxu0 %v5927_v15 }
 0x137   :  { %5184 = vmatprep.subr.mxu1 %v4585_v3 }
 0x138   :  { %5185 = vmatpush3.msra.mxu1 %v4585_v3  ;;  %v1245_v3 = vld [vmem:[#allocation3] sm:$0xff] }
 0x139   :  { %5186 = vmatprep.subr.mxu1 %v4584_v5 }
 0x13a   :  { %5187 = vmatpush3.msra.mxu1 %v4584_v5  ;;  %v1273_v5 = vrot.slane %v1245_v3, 6 }
 0x13b   :  { %5188 = vmatprep.subr.mxu1 %v4583_v7 }
 0x13c   :  { %5189 = vmatpush3.msra.mxu1 %v4583_v7 }
 0x13d   :  { %5190 = vmatprep.subr.mxu1 %v4582_v9 }
 0x13e   :  { %5191 = vmatpush3.msra.mxu1 %v4582_v9  ;;  %v4611_v9 = vld [vmem:[%s7196_s30 + $0x130] sm:$0xff] }
 0x13f   :  { %5192 = vmatprep.subr.mxu1 %v4581_v11 }
 0x140   :  { %5193 = vmatpush3.msra.mxu1 %v4581_v11 }
 0x141   :  { %5222 = vmatprep.subr.mxu1 %v5918_v13 }
 0x1bd   :  { %v5010_v1 = vpop.f32.mrf.mxu1  ;;  %v5040_v16 = vpop.f32.mrf.mxu0 }
 0x1be   :  { %v863_v25 = vadd.f32 %v5040_v16, %v5010_v1 }
 0x1bf   :  { %v755_v2 = vpop.f32.mrf.mxu1  ;;  %v857_v18 = vpop.f32.mrf.mxu0 }
 0x1c0   :  { %v858_v27 = vadd.f32 %v857_v18, %v755_v2  ;;  %v1257_v2 = vld [vmem:[%s7196_s30 + $0x30] sm:$0xff] }
 0x1c3   :  { %v5013_v17 = vpop.f32.mrf.mxu1  ;;  %v5043_v20 = vpop.f32.mrf.mxu0 }
 0x1c4   :  { %v873_v30 = vadd.f32 %v5043_v20, %v5013_v17 }
 0x1c5   :  { %v765_v19 = vpop.f32.mrf.mxu1  ;;  %v867_v22 = vpop.f32.mrf.mxu0 }
 0x1c6   :  { %v868_v33 = vadd.f32 %v867_v22, %v765_v19  ;;  %v4609_v19 = vld [vmem:[%s7196_s30 + $0x120] sm:$0xff]  ;;  %v1375_v22 = vrot.slane %v1245_v3, 4 }
 0x1c7   :  { %v4635_v3 = vld [vmem:[%s7151_s10 + $0x180] sm:$0xff] }
 0x1d8   :  { %v5070_v21 = vpop.f32.mrf.mxu1  ;;  %v5100_v24 = vpop.f32.mrf.mxu0 }
 0x1d9   :  { %v983_v28 = vadd.f32 %v5070_v21, %v863_v25  ;;  %v1256_v21 = vld [vmem:[%s7196_s30 + $0x28] sm:$0xff]  ;;  %v1255_v25 = vld [vmem:[%s7196_s30 + $0x20] sm:$0xff] }
 0x1da   :  { %v963_v23 = vpop.f32.mrf.mxu1  ;;  %v1083_v29 = vpop.f32.mrf.mxu0 }
 0x1db   :  { %v982_v31 = vadd.f32 %v963_v23, %v858_v27  ;;  %v1103_v34 = vadd.f32 %v5100_v24, %v983_v28  ;;  %v4608_v24 = vld [vmem:[%s7196_s30 + $0x118] sm:$0xff]  ;;  %v4607_v27 = vld [vmem:[%s7196_s30 + $0x110] sm:$0xff] }
 0x1dc   :  { %v5103_v36 = vpop.f32.mrf.mxu0  ;;  %v1254_v28 = vld [vmem:[%s7196_s30 + $0x18] sm:$0xff] }
 0x1dd   :  { %v5073_v26 = vpop.f32.mrf.mxu1  ;;  %v1102_v39 = vadd.f32 %v1083_v29, %v982_v31  ;;  %v4606_v29 = vld [vmem:[%s7196_s30 + $0x108] sm:$0xff] }
 0x1de   :  { %v985_v35 = vadd.f32 %v5073_v26, %v873_v30  ;;  %v1093_v47 = vpop.f32.mrf.mxu0  ;;  %v1253_v30 = vld [vmem:[%s7196_s30 + $0x10] sm:$0xff] }
 0x1df   :  { %v973_v32 = vpop.f32.mrf.mxu1 }
 0x1e0   :  { %v984_v40 = vadd.f32 %v973_v32, %v868_v33  ;;  %v1105_v44 = vadd.f32 %v5103_v36, %v985_v35  ;;  %v4605_v32 = vld [vmem:[%s7196_s30 + $0x100] sm:$0xff]  ;;  %v1252_v33 = vld [vmem:[%s7196_s30 + $0x8] sm:$0xff] }
 0x1e1   :  { %v1251_v36 = vld [vmem:[%s7196_s30] sm:$0xff] }
 0x1e2   :  { %v1104_v49 = vadd.f32 %v1093_v47, %v984_v40 }
 0x1f1   :  { %v5130_v37 = vpop.f32.mrf.mxu1 }
 0x1f2   :  { %v1209_v41 = vadd.f32 %v5130_v37, %v1103_v34  ;;  %v1250_v34 = vld [vmem:[#allocation3 + $0x28] sm:$0xff] }
 0x1f3   :  { %v1189_v43 = vpop.f32.mrf.mxu1  ;;  %v1708_v40 = vrot.slane %v1250_v34, 4 }
 0x1f4   :  { %v1220_v45 = vmul.f32 %v4563_v38, %v1209_v41  ;;  %v1208_v46 = vadd.f32 %v1189_v43, %v1102_v39  ;;  %v4600_v39 = vld [vmem:[%s7196_s30 + $0xf8] sm:$0xff]  ;;  %v4599_v41 = vld [vmem:[%s7196_s30 + $0xf0] sm:$0xff] }
 0x1f5   :  { %v5133_v48 = vpop.f32.mrf.mxu1 }
 0x1f6   :  { %v1231_v50 = vadd.f32 %v4564_v42, %v1220_v45  ;;  %v1219_v51 = vmul.f32 %v4563_v38, %v1208_v46  ;;  %v1211_v52 = vadd.f32 %v5133_v48, %v1105_v44  ;;  %v4598_v44 = vld [vmem:[%s7196_s30 + $0xe8] sm:$0xff]  ;;  %v4597_v46 = vld [vmem:[%s7196_s30 + $0xe0] sm:$0xff]  ;;  %v4596_v48 = vld [vmem:[%s7196_s30 + $0xd8] sm:$0xff] }
 0x1f7   :  { %v1199_v53 = vpop.f32.mrf.mxu1 }
 0x1f8   :  { %v1235_v54 = vmax.f32 %v1231_v50, 0.0  ;;  %v1230_v55 = vadd.f32 %v4564_v42, %v1219_v51  ;;  %v1222_v57 = vmul.f32 %v4563_v38, %v1211_v52  ;;  %v1210_v58 = vadd.f32 %v1199_v53, %v1104_v49  ;;  %v4595_v49 = vld [vmem:[%s7196_s30 + $0xd0] sm:$0xff]  ;;  %v4594_v50 = vld [vmem:[%s7196_s30 + $0xc8] sm:$0xff]  ;;  %v4593_v52 = vld [vmem:[%s7196_s30 + $0xc0] sm:$0xff] }
 0x1fa   :  { %1242 = vst.msk [vmem:[#allocation3 + $0x10] sm:$0xff] %vm1238_vm5, %v1235_v54  ;;  %v1234_v59 = vmax.f32 %v1230_v55, 0.0  ;;  %v1233_v60 = vadd.f32 %v4564_v42, %v1222_v57  ;;  %v1221_v61 = vmul.f32 %v4563_v38, %v1210_v58  ;;  %v1600_v55 = vrot.slane %v1250_v34, 2 }
 0x1fc   :  { %1241 = vst.msk [vmem:[#allocation3 + $0x8] sm:$0xff] %vm1238_vm5, %v1234_v59  ;;  %v1237_v62 = vmax.f32 %v1233_v60, 0.0  ;;  %v1232_v63 = vadd.f32 %v4564_v42, %v1221_v61  ;;  %v4644_v59 = vld [vmem:[%s7151_s10 + $0x1c8] sm:$0xff]  ;;  %v4646_v60 = vld [vmem:[%s7151_s10 + $0x1d8] sm:$0xff]  ;;  %v4643_v61 = vld [vmem:[%s7151_s10 + $0x1c0] sm:$0xff] }
 0x1fe   :  { %1244 = vst.msk [vmem:[#allocation3 + $0x20] sm:$0xff] %vm1238_vm5, %v1237_v62  ;;  %v1236_v0 = vmax.f32 %v1232_v63, 0.0  ;;  %v4645_v62 = vld [vmem:[%s7151_s10 + $0x1d0] sm:$0xff]  ;;  %v4636_v63 = vld [vmem:[%s7151_s10 + $0x188] sm:$0xff] }
 0x200   :  { %1243 = vst.msk [vmem:[#allocation3 + $0x18] sm:$0xff] %vm1238_vm5, %v1236_v0  ;;  %v4638_v0 = vld [vmem:[%s7151_s10 + $0x198] sm:$0xff] }
 0x201   :  { %v5940_v4 = vld [vmem:[#allocation3 + $0x10] sm:$0xff] }
 0x202   :  { %v1276_v8 = vrot.slane %v5940_v4, 6  ;;  %v1378_v17 = vrot.slane %v5940_v4, 4  ;;  %v1594_v45 = vrot.slane %v5940_v4, 2 }
 0x203   :  { %v5942_v6 = vld [vmem:[#allocation3 + $0x8] sm:$0xff] }
 0x204   :  { %v1274_v7 = vrot.slane %v5942_v6, 6  ;;  %5194 = vmatprep.mubr.msk.f32.mxu1 %vm1238_vm5, %v5942_v6  ;;  %v1376_v14 = vrot.slane %v5942_v6, 4  ;;  %v1593_v42 = vrot.slane %v5942_v6, 2  ;;  %v4630_v6 = vld [vmem:[%s7151_s10 + $0x158] sm:$0xff] }
 0x205   :  { %5195 = vmatmul.mubr.msk.f32.vlgmr.msra.gmra.mxu1 %vm1238_vm5, %v5940_v4  ;;  %v4637_v4 = vld [vmem:[%s7151_s10 + $0x190] sm:$0xff] }
 0x206   :  { %5223 = vmatpush3.msra.mxu1 %v5918_v13  ;;  %v1275_v10 = vsel %vm92_vm0, %v1273_v5, %v1274_v7  ;;  %v1277_v11 = vsel %vm92_vm0, %v1274_v7, %v1276_v8  ;;  %v5966_v13 = vld [vmem:[#allocation3 + $0x20] sm:$0xff]  ;;  %v1377_v26 = vsel %vm196_vm2, %v1375_v22, %v1376_v14  ;;  %v1595_v47 = vsel %vm401_vm3, %v1593_v42, %v1594_v45  ;;  %v4628_v5 = vld [vmem:[%s7151_s10 + $0x148] sm:$0xff]  ;;  %v4627_v7 = vld [vmem:[%s7151_s10 + $0x140] sm:$0xff] }
 0x207   :  { %5224 = vmatprep.subr.mxu1 %v4611_v9  ;;  %5150 = vmatprep.mubr.msk.f32.mxu0 %vm1238_vm5, %v1275_v10  ;;  %v5961_v1 = vld [vmem:[#allocation3 + $0x18] sm:$0xff]  ;;  %v1280_v18 = vrot.slane %v5966_v13, 6  ;;  %v1382_v35 = vrot.slane %v5966_v13, 4  ;;  %v1598_v53 = vrot.slane %v5966_v13, 2  ;;  %v4622_v10 = vld [vmem:[%s7151_s10 + $0x118] sm:$0xff] }
 0x208   :  { %5225 = vmatpush3.msra.mxu1 %v4611_v9  ;;  %5151 = vmatmul.mubr.msk.f32.vlgmr.msra.gmra.mxu0 %vm1238_vm5, %v1277_v11  ;;  %v1278_v16 = vrot.slane %v5961_v1, 6  ;;  %v1380_v31 = vrot.slane %v5961_v1, 4  ;;  %v1596_v51 = vrot.slane %v5961_v1, 2  ;;  %v4620_v9 = vld [vmem:[%s7151_s10 + $0x108] sm:$0xff]  ;;  %v4619_v11 = vld [vmem:[%s7151_s10 + $0x100] sm:$0xff] }
 0x209   :  { %5157 = vmatpush3.msra.mxu0 %v5927_v15  ;;  %5197 = vmatprep.mubr.msk.f32.mxu1 %vm1238_vm5, %v5961_v1  ;;  %v1379_v15 = vsel %vm196_vm2, %v1376_v14, %v1378_v17  ;;  %v1709_v43 = vsel %vm196_vm2, %v1382_v35, %v1708_v40  ;;  %v1601_v58 = vsel %vm401_vm3, %v1598_v53, %v1600_v55  ;;  %v4648_v14 = vld [vmem:[%s7151_s10 + $0x1e8] sm:$0xff]  ;;  %v4650_v1 = vld [vmem:[%s7151_s10 + $0x1f8] sm:$0xff]  ;;  %v4641_v55 = vld [vmem:[%s7151_s10 + $0x1b0] sm:$0xff] }
 0x20a   :  { %5226 = vmatprep.subr.mxu1 %v4610_v12  ;;  %5158 = vmatprep.subr.mxu0 %v1257_v2  ;;  %v1279_v20 = vsel %vm92_vm0, %v1276_v8, %v1278_v16  ;;  %v1281_v23 = vsel %vm92_vm0, %v1278_v16, %v1280_v18  ;;  %v1381_v37 = vsel %vm196_vm2, %v1378_v17, %v1380_v31  ;;  %v4629_v8 = vld [vmem:[%s7151_s10 + $0x150] sm:$0xff] }
 0x20b   :  { %5198 = vmatmul.mubr.msk.f32.gmra.mxu1 %vm1238_vm5, %v5966_v13  ;;  %5159 = vmatpush3.msra.mxu0 %v1257_v2  ;;  %v1383_v38 = vsel %vm196_vm2, %v1380_v31, %v1382_v35  ;;  %v1597_v54 = vsel %vm401_vm3, %v1594_v45, %v1596_v51  ;;  %v1599_v57 = vsel %vm401_vm3, %v1596_v51, %v1598_v53  ;;  %v6130_v31 = vld [vmem:[%s7199_s5] ss:$0 sm:$0xff]  ;;  %v4642_v53 = vld [vmem:[%s7151_s10 + $0x1b8] sm:$0xff] }
 0x20c   :  { %5227 = vmatpush3.msra.mxu1 %v4610_v12  ;;  %5238 = vmatprep.mubr.msk.f32.mxu1 %vm1238_vm5, %v1379_v15  ;;  %v4621_v12 = vld [vmem:[%s7151_s10 + $0x110] sm:$0xff]  ;;  %v6135_v35 = vld [vmem:[%s7150_s9] ss:$0 sm:$0xff] }
 0x20d   :  { %5228 = vmatprep.subr.mxu1 %v4609_v19  ;;  %5153 = vmatprep.mubr.msk.f32.mxu0 %vm1238_vm5, %v1279_v20 }
 0x20e   :  { %5160 = vmatprep.subr.mxu0 %v1256_v21  ;;  %5229 = vmatpush3.msra.mxu1 %v4609_v19 }
 0x20f   :  { %5154 = vmatmul.mubr.msk.f32.gmra.mxu0 %vm1238_vm5, %v1281_v23  ;;  %5230 = vmatprep.subr.mxu1 %v4608_v24 }
 0x210   :  { %5161 = vmatpush3.msra.mxu0 %v1256_v21  ;;  %5172 = vmatprep.mubr.msk.f32.mxu0 %vm1238_vm5, %v1377_v26 }
 0x211   :  { %5162 = vmatprep.subr.mxu0 %v1255_v25  ;;  %5231 = vmatpush3.msra.mxu1 %v4608_v24 }
 0x212   :  { %5163 = vmatpush3.msra.mxu0 %v1255_v25  ;;  %5232 = vmatprep.subr.mxu1 %v4607_v27 }
 0x213   :  { %5164 = vmatprep.subr.mxu0 %v1254_v28  ;;  %5233 = vmatpush3.msra.mxu1 %v4607_v27 }
 0x214   :  { %5165 = vmatpush3.msra.mxu0 %v1254_v28  ;;  %5234 = vmatprep.subr.mxu1 %v4606_v29 }
 0x215   :  { %5166 = vmatprep.subr.mxu0 %v1253_v30  ;;  %5235 = vmatpush3.msra.mxu1 %v4606_v29 }
 0x216   :  { %5167 = vmatpush3.msra.mxu0 %v1253_v30  ;;  %5236 = vmatprep.subr.mxu1 %v4605_v32 }
 0x217   :  { %5168 = vmatprep.subr.mxu0 %v1252_v33  ;;  %5237 = vmatpush3.msra.mxu1 %v4605_v32 }
 0x218   :  { %5169 = vmatpush3.msra.mxu0 %v1252_v33  ;;  %5239 = vmatmul.mubr.msk.f32.vlgmr.msra.gmra.mxu1 %vm1238_vm5, %v1381_v37 }
 0x219   :  { %5170 = vmatprep.subr.mxu0 %v1251_v36  ;;  %5241 = vmatprep.mubr.msk.f32.mxu1 %vm1238_vm5, %v1383_v38 }
 0x21a   :  { %5171 = vmatpush3.msra.mxu0 %v1251_v36  ;;  %2023 = vmatprep.subr.mxu1 %v4646_v60 }
 0x21b   :  { %5173 = vmatmul.mubr.msk.f32.vlgmr.msra.gmra.mxu0 %vm1238_vm5, %v1379_v15  ;;  %5200 = vmatprep.subr.mxu0 %v4600_v39 }
 0x21c   :  { %5175 = vmatprep.mubr.msk.f32.mxu0 %vm1238_vm5, %v1381_v37  ;;  %5201 = vmatpush3.msra.mxu0 %v4600_v39 }
 0x21d   :  { %5242 = vmatmul.mubr.msk.f32.gmra.mxu1 %vm1238_vm5, %v1709_v43  ;;  %5202 = vmatprep.subr.mxu0 %v4599_v41 }
 0x21e   :  { %5203 = vmatpush3.msra.mxu0 %v4599_v41  ;;  %2063 = vmatprep.mubr.f32.mxu1 %v7170_v56 }
 0x21f   :  { %5176 = vmatmul.mubr.msk.f32.gmra.mxu0 %vm1238_vm5, %v1383_v38  ;;  %5204 = vmatprep.subr.mxu0 %v4598_v44 }
 0x220   :  { %5205 = vmatpush3.msra.mxu0 %v4598_v44  ;;  %5216 = vmatprep.mubr.msk.f32.mxu0 %vm1238_vm5, %v1595_v47 }
 0x221   :  { %5206 = vmatprep.subr.mxu0 %v4597_v46  ;;  %2024 = vmatpush1.msra.mxu1 %v4645_v62  ;;  %v4633_v62 = vld [vmem:[%s7151_s10 + $0x170] sm:$0xff] }
 0x222   :  { %5207 = vmatpush3.msra.mxu0 %v4597_v46  ;;  %2025 = vmatprep.subr.mxu1 %v4638_v0  ;;  %v4624_v0 = vld [vmem:[%s7151_s10 + $0x128] sm:$0xff] }
 0x223   :  { %5208 = vmatprep.subr.mxu0 %v4596_v48  ;;  %2026 = vmatpush1.msra.mxu1 %v4637_v4 }
 0x224   :  { %5209 = vmatpush3.msra.mxu0 %v4596_v48  ;;  %2027 = vmatprep.subr.mxu1 %v4630_v6 }
 0x225   :  { %5210 = vmatprep.subr.mxu0 %v4595_v49  ;;  %2028 = vmatpush1.msra.mxu1 %v4629_v8  ;;  %v4625_v8 = vld [vmem:[%s7151_s10 + $0x130] sm:$0xff] }
 0x226   :  { %5211 = vmatpush3.msra.mxu0 %v4595_v49  ;;  %2029 = vmatprep.subr.mxu1 %v4622_v10  ;;  %v4647_v49 = vld [vmem:[%s7151_s10 + $0x1e0] sm:$0xff]  ;;  %v1886_v10 = vld [vmem:[%s7151_s10 + $0xd8] sm:$0xff] }
 0x227   :  { %5212 = vmatprep.subr.mxu0 %v4594_v50  ;;  %2030 = vmatpush1.msra.mxu1 %v4621_v12  ;;  %v1883_v12 = vld [vmem:[%s7151_s10 + $0xc0] sm:$0xff] }
 0x228   :  { %5213 = vmatpush3.msra.mxu0 %v4594_v50  ;;  %2165 = vmatprep.subr.mxu1 %v4650_v1  ;;  %v4649_v50 = vld [vmem:[%s7151_s10 + $0x1f0] sm:$0xff] }
 0x229   :  { %5214 = vmatprep.subr.mxu0 %v4593_v52 }
 0x22a   :  { %5215 = vmatpush3.msra.mxu0 %v4593_v52  ;;  %v4640_v52 = vld [vmem:[%s7151_s10 + $0x1a8] sm:$0xff] }
 0x22b   :  { %5217 = vmatmul.mubr.msk.f32.vlgmr.msra.gmra.mxu0 %vm1238_vm5, %v1597_v54  ;;  %1952 = vmatprep.subr.mxu0 %v4644_v59  ;;  %v4639_v54 = vld [vmem:[%s7151_s10 + $0x1a0] sm:$0xff]  ;;  %v4634_v59 = vld [vmem:[%s7151_s10 + $0x178] sm:$0xff] }
 0x22c   :  { %5219 = vmatprep.mubr.msk.f32.mxu0 %vm1238_vm5, %v1599_v57  ;;  %1953 = vmatpush1.msra.mxu0 %v4643_v61  ;;  %v4631_v61 = vld [vmem:[%s7151_s10 + $0x160] sm:$0xff] }
 0x22d   :  { %1954 = vmatprep.subr.mxu0 %v4636_v63 }
 0x22e   :  { %1955 = vmatpush1.msra.mxu0 %v4635_v3  ;;  %v4626_v3 = vld [vmem:[%s7151_s10 + $0x138] sm:$0xff] }
 0x22f   :  { %5220 = vmatmul.mubr.msk.f32.gmra.mxu0 %vm1238_vm5, %v1601_v58  ;;  %1956 = vmatprep.subr.mxu0 %v4628_v5  ;;  %v4632_v58 = vld [vmem:[%s7151_s10 + $0x168] sm:$0xff]  ;;  %v4623_v5 = vld [vmem:[%s7151_s10 + $0x120] sm:$0xff] }
 0x230   :  { %1992 = vmatprep.mubr.f32.mxu0 %v7170_v56  ;;  %1957 = vmatpush1.msra.mxu0 %v4627_v7 }
 0x231   :  { %1958 = vmatprep.subr.mxu0 %v4620_v9  ;;  %v1884_v9 = vld [vmem:[%s7151_s10 + $0xc8] sm:$0xff] }
 0x232   :  { %1959 = vmatpush1.msra.mxu0 %v4619_v11 }
 0x233   :  { %2094 = vmatprep.subr.mxu0 %v4648_v14  ;;  %v1885_v14 = vld [vmem:[%s7151_s10 + $0xd0] sm:$0xff] }
 0x2c5   :  { %v5196_v19 = vpop.f32.mrf.mxu1 }
 0x2c7   :  { %v1560_v15 = vpop.f32.mrf.mxu1 }
 0x2c8   :  { %v5152_v2 = vpop.f32.mrf.mxu0 }
 0x2ca   :  { %v1356_v13 = vpop.f32.mrf.mxu0 }
 0x2cb   :  { %v6125_v23 = vpop.f32.mrf.mxu1 }
 0x2cd   :  { %v1570_v27 = vpop.f32.mrf.mxu1 }
 0x2cf   :  { %v6121_v16 = vpop.f32.mrf.mxu0 }
 0x2d1   :  { %v1366_v17 = vpop.f32.mrf.mxu0 }
 0x2d8   :  { %v5240_v30 = vpop.f32.mrf.mxu1 }
 0x2da   :  { %v1778_v38 = vpop.f32.mrf.mxu1 }
 0x2db   :  { %v5174_v18 = vpop.f32.mrf.mxu0 }
 0x2dc   :  { %v1464_v22 = vadd.f32 %v5174_v18, %v5152_v2  ;;  %v1875_v18 = vld [vmem:[%s7151_s10 + $0x80] sm:$0xff] }
 0x2dd   :  { %v1458_v20 = vpop.f32.mrf.mxu0  ;;  %v6181_v4 = vpop.f32.mrf.mxu1 }
 0x2de   :  { %v1459_v24 = vadd.f32 %v1458_v20, %v1356_v13  ;;  %v1580_v26 = vadd.f32 %v5196_v19, %v1464_v22  ;;  %v1876_v13 = vld [vmem:[%s7151_s10 + $0x88] sm:$0xff]  ;;  %v1877_v19 = vld [vmem:[%s7151_s10 + $0x90] sm:$0xff]  ;;  %v1867_v22 = vld [vmem:[%s7151_s10 + $0x40] sm:$0xff] }
 0x2df   :  { %v6123_v21 = vpop.f32.mrf.mxu0  ;;  %v1788_v11 = vpop.f32.mrf.mxu1  ;;  %v1868_v20 = vld [vmem:[%s7151_s10 + $0x48] sm:$0xff] }
 0x2e0   :  { %v1579_v32 = vadd.f32 %v1560_v15, %v1459_v24  ;;  %v1870_v15 = vld [vmem:[%s7151_s10 + $0x58] sm:$0xff]  ;;  %v1869_v24 = vld [vmem:[%s7151_s10 + $0x50] sm:$0xff] }
 0x2e1   :  { %v1468_v25 = vpop.f32.mrf.mxu0 }
 0x2e2   :  { %v1469_v51 = vadd.f32 %v1468_v25, %v1366_v17  ;;  %v1878_v17 = vld [vmem:[%s7151_s10 + $0x98] sm:$0xff] }
 0x2e4   :  { %v1581_v63 = vadd.f32 %v1570_v27, %v1469_v51  ;;  %v1860_v27 = vld [vmem:[%s7151_s10 + $0x8] sm:$0xff]  ;;  %v1863_v51 = vld [vmem:[%s7151_s10 + $0x20] sm:$0xff] }
 0x2eb   :  { %v5218_v28 = vpop.f32.mrf.mxu0 }
 0x2ec   :  { %v1696_v29 = vadd.f32 %v5218_v28, %v1580_v26  ;;  %v1862_v28 = vld [vmem:[%s7151_s10 + $0x18] sm:$0xff] }
 0x2ed   :  { %v1676_v33 = vpop.f32.mrf.mxu0 }
 0x2ee   :  { %v1798_v34 = vadd.f32 %v5240_v30, %v1696_v29  ;;  %v1695_v36 = vadd.f32 %v1676_v33, %v1579_v32  ;;  %v1859_v29 = vld [vmem:[%s7151_s10] sm:$0xff]  ;;  %v1861_v30 = vld [vmem:[%s7151_s10 + $0x10] sm:$0xff] }
 0x2ef   :  { %v6141_v48 = vpop.f32.mrf.mxu0 }
 0x2f0   :  { %v1809_v37 = vmul.f32 %v6130_v31, %v1798_v34  ;;  %v1797_v40 = vadd.f32 %v1778_v38, %v1695_v36  ;;  %v1888_v34 = vld [vmem:[%s7151_s10 + $0xe8] sm:$0xff]  ;;  %v1890_v36 = vld [vmem:[%s7151_s10 + $0xf8] sm:$0xff]  ;;  %v1889_v38 = vld [vmem:[%s7151_s10 + $0xf0] sm:$0xff] }
 0x2f1   :  { %v1686_v60 = vpop.f32.mrf.mxu0 }
 0x2f2   :  { %v1820_v39 = vadd.f32 %v6135_v35, %v1809_v37  ;;  %v1808_v43 = vmul.f32 %v6130_v31, %v1797_v40  ;;  %v1697_v7 = vadd.f32 %v1686_v60, %v1581_v63  ;;  %v1887_v37 = vld [vmem:[%s7151_s10 + $0xe0] sm:$0xff]  ;;  %v1880_v40 = vld [vmem:[%s7151_s10 + $0xa8] sm:$0xff]  ;;  %v4677_v63 = vld [vmem:[%s7151_s10 + $0x290] sm:$0xff] }
 0x2f3   :  { %v4676_v60 = vld [vmem:[%s7151_s10 + $0x288] sm:$0xff] }
 0x2f4   :  { %v1824_v41 = vmax.f32 %v1820_v39, 0.0  ;;  %v1819_v46 = vadd.f32 %v6135_v35, %v1808_v43  ;;  %v1799_v2 = vadd.f32 %v1788_v11, %v1697_v7  ;;  %v1474_v39 = vadd.f32 %v6123_v21, %v6121_v16  ;;  %v1881_v16 = vld [vmem:[%s7151_s10 + $0xb0] sm:$0xff]  ;;  %v1872_v43 = vld [vmem:[%s7151_s10 + $0x68] sm:$0xff] }
 0x2f6   :  { %v1836_v42 = vrot.slane %v1824_v41, 2  ;;  %v1823_v57 = vmax.f32 %v1819_v46, 0.0  ;;  %v1810_v26 = vmul.f32 %v6130_v31, %v1799_v2  ;;  %v1873_v46 = vld [vmem:[%s7151_s10 + $0x70] sm:$0xff]  ;;  %v4687_v2 = vld [vmem:[%s7151_s10 + $0x2e0] sm:$0xff] }
 0x2f8   :  { %v1838_v44 = vmax.f32 %v1824_v41, %v1836_v42  ;;  %v1828_v6 = vrot.slane %v1823_v57, 2  ;;  %v1821_v33 = vadd.f32 %v6135_v35, %v1810_v26  ;;  %v1882_v41 = vld [vmem:[%s7151_s10 + $0xb8] sm:$0xff]  ;;  %v1879_v42 = vld [vmem:[%s7151_s10 + $0xa0] sm:$0xff]  ;;  %v4664_v26 = vld [vmem:[%s7151_s10 + $0x228] sm:$0xff] }
 0x2fa   :  { %v1840_v45 = vrot.slane %v1838_v44, 4  ;;  %v1830_v1 = vmax.f32 %v1823_v57, %v1828_v6  ;;  %v1825_v21 = vmax.f32 %v1821_v33, 0.0  ;;  %v4685_v57 = vld [vmem:[%s7151_s10 + $0x2d0] sm:$0xff]  ;;  %v4722_v33 = vld [vmem:[%s7151_s10 + $0x3d8] sm:$0xff] }
 0x2fc   :  { %v1842_v47 = vmax.f32 %v1838_v44, %v1840_v45  ;;  %v1832_v25 = vrot.slane %v1830_v1, 4  ;;  %v1874_v44 = vld [vmem:[%s7151_s10 + $0x78] sm:$0xff]  ;;  %v1871_v45 = vld [vmem:[%s7151_s10 + $0x60] sm:$0xff] }
 0x2fe   :  { %4651 = vmatmul.mubr.msk.f32.vlgmr.msra.gmra.mxu0 %vm1924_vm6, %v1842_v47  ;;  %4652 = vmatmul.mubr.msk.f32.vlgmr.msra.gmra.mxu1 %vm1924_vm6, %v1842_v47  ;;  %v1834_v32 = vmax.f32 %v1830_v1, %v1832_v25  ;;  %v4690_v1 = vld [vmem:[%s7151_s10 + $0x2f8] sm:$0xff]  ;;  %v4673_v25 = vld [vmem:[%s7151_s10 + $0x270] sm:$0xff] }
 0x2ff   :  { %2095 = vmatpush1.msra.mxu0 %v4647_v49  ;;  %2166 = vmatpush1.msra.mxu1 %v4649_v50  ;;  %v1864_v49 = vld [vmem:[%s7151_s10 + $0x28] sm:$0xff]  ;;  %v1866_v50 = vld [vmem:[%s7151_s10 + $0x38] sm:$0xff] }
 0x300   :  { %2096 = vmatprep.subr.mxu0 %v4640_v52  ;;  %2167 = vmatprep.subr.mxu1 %v4642_v53  ;;  %v1844_v53 = vrot.slane %v1825_v21, 2 }
 0x301   :  { %2097 = vmatpush1.msra.mxu0 %v4639_v54  ;;  %2168 = vmatpush1.msra.mxu1 %v4641_v55  ;;  %v4684_v54 = vld [vmem:[%s7151_s10 + $0x2c8] sm:$0xff]  ;;  %v4683_v55 = vld [vmem:[%s7151_s10 + $0x2c0] sm:$0xff] }
 0x302   :  { %2098 = vmatprep.subr.mxu0 %v4632_v58  ;;  %2169 = vmatprep.subr.mxu1 %v4634_v59  ;;  %v1846_v59 = vmax.f32 %v1825_v21, %v1844_v53  ;;  %v4703_v21 = vld [vmem:[%s7151_s10 + $0x340] sm:$0xff] }
 0x303   :  { %2099 = vmatpush1.msra.mxu0 %v4631_v61  ;;  %2170 = vmatpush1.msra.mxu1 %v4633_v62  ;;  %v4678_v61 = vld [vmem:[%s7151_s10 + $0x298] sm:$0xff]  ;;  %v4675_v62 = vld [vmem:[%s7151_s10 + $0x280] sm:$0xff] }
 0x304   :  { %2100 = vmatprep.subr.mxu0 %v4624_v0  ;;  %2171 = vmatprep.subr.mxu1 %v4626_v3  ;;  %v4668_v0 = vld [vmem:[%s7151_s10 + $0x248] sm:$0xff]  ;;  %v4670_v3 = vld [vmem:[%s7151_s10 + $0x258] sm:$0xff]  ;;  %v1848_v7 = vrot.slane %v1846_v59, 4  ;;  %v4723_v53 = vld [vmem:[%s7151_s10 + $0x3e0] sm:$0xff] }
 0x305   :  { %2101 = vmatpush1.msra.mxu0 %v4623_v5  ;;  %2134 = vmatprep.mubr.f32.mxu0 %v7170_v56  ;;  %v4669_v5 = vld [vmem:[%s7151_s10 + $0x250] sm:$0xff] }
 0x306   :  { %2172 = vmatpush1.msra.mxu1 %v4625_v8  ;;  %2205 = vmatprep.mubr.f32.mxu1 %v7170_v56  ;;  %v4660_v8 = vld [vmem:[%s7151_s10 + $0x208] sm:$0xff] }
 0x307   :  { %4653 = vmatmul.mubr.msk.f32.vlgmr.msra.gmra.mxu0 %vm1924_vm6, %v1842_v47  ;;  %4654 = vmatmul.mubr.msk.f32.vlgmr.msra.gmra.mxu1 %vm1924_vm6, %v1842_v47  ;;  %v1582_v47 = vadd.f32 %v6125_v23, %v1474_v39  ;;  %v1865_v23 = vld [vmem:[%s7151_s10 + $0x30] sm:$0xff]  ;;  %v4714_v39 = vld [vmem:[%s7151_s10 + $0x398] sm:$0xff] }
 0x308   :  { %2239 = vmatprep.subr.mxu0 %v1884_v9  ;;  %2310 = vmatprep.subr.mxu1 %v1886_v10  ;;  %v4662_v9 = vld [vmem:[%s7151_s10 + $0x218] sm:$0xff]  ;;  %v4659_v10 = vld [vmem:[%s7151_s10 + $0x200] sm:$0xff] }
 0x309   :  { %2240 = vmatpush1.msra.mxu0 %v1883_v12  ;;  %2311 = vmatpush1.msra.mxu1 %v1885_v14  ;;  %v1698_v52 = vadd.f32 %v6141_v48, %v1582_v47  ;;  %v4686_v48 = vld [vmem:[%s7151_s10 + $0x2d8] sm:$0xff]  ;;  %v1850_v12 = vmax.f32 %v1846_v59, %v1848_v7  ;;  %v4688_v14 = vld [vmem:[%s7151_s10 + $0x2e8] sm:$0xff]  ;;  %v4695_v47 = vld [vmem:[%s7151_s10 + $0x300] sm:$0xff] }
 0x30a   :  { %2241 = vmatprep.subr.mxu0 %v1876_v13  ;;  %2312 = vmatprep.subr.mxu1 %v1878_v17  ;;  %v4680_v13 = vld [vmem:[%s7151_s10 + $0x2a8] sm:$0xff]  ;;  %v4682_v17 = vld [vmem:[%s7151_s10 + $0x2b8] sm:$0xff] }
 0x30b   :  { %2242 = vmatpush1.msra.mxu0 %v1875_v18  ;;  %2313 = vmatpush1.msra.mxu1 %v1877_v19  ;;  %v1800_v58 = vadd.f32 %v6181_v4, %v1698_v52  ;;  %v4667_v4 = vld [vmem:[%s7151_s10 + $0x240] sm:$0xff]  ;;  %v4681_v19 = vld [vmem:[%s7151_s10 + $0x2b0] sm:$0xff]  ;;  %v4726_v52 = vld [vmem:[%s7151_s10 + $0x3f8] sm:$0xff] }
 0x30c   :  { %2243 = vmatprep.subr.mxu0 %v1868_v20  ;;  %2314 = vmatprep.subr.mxu1 %v1870_v15  ;;  %v4679_v18 = vld [vmem:[%s7151_s10 + $0x2a0] sm:$0xff]  ;;  %v4672_v15 = vld [vmem:[%s7151_s10 + $0x268] sm:$0xff]  ;;  %v4710_v59 = vld [vmem:[%s7151_s10 + $0x378] sm:$0xff] }
 0x30d   :  { %2244 = vmatpush1.msra.mxu0 %v1867_v22  ;;  %2315 = vmatpush1.msra.mxu1 %v1869_v24  ;;  %v1811_v6 = vmul.f32 %v6130_v31, %v1800_v58  ;;  %v4661_v31 = vld [vmem:[%s7151_s10 + $0x210] sm:$0xff]  ;;  %v4674_v22 = vld [vmem:[%s7151_s10 + $0x278] sm:$0xff]  ;;  %v4671_v24 = vld [vmem:[%s7151_s10 + $0x260] sm:$0xff] }
 0x30e   :  { %2245 = vmatprep.subr.mxu0 %v1860_v27  ;;  %2316 = vmatprep.subr.mxu1 %v1862_v28  ;;  %v4666_v27 = vld [vmem:[%s7151_s10 + $0x238] sm:$0xff]  ;;  %v4663_v28 = vld [vmem:[%s7151_s10 + $0x220] sm:$0xff]  ;;  %v4708_v58 = vld [vmem:[%s7151_s10 + $0x368] sm:$0xff] }
 0x30f   :  { %2246 = vmatpush1.msra.mxu0 %v1859_v29  ;;  %2279 = vmatprep.mubr.f32.mxu0 %v7170_v56  ;;  %v1822_v11 = vadd.f32 %v6135_v35, %v1811_v6  ;;  %v4689_v35 = vld [vmem:[%s7151_s10 + $0x2f0] sm:$0xff]  ;;  %v3155_v6 = vld [vmem:[%s7152_s11] sm:$0xff] }
 0x310   :  { %2317 = vmatpush1.msra.mxu1 %v1861_v30  ;;  %2350 = vmatprep.mubr.f32.mxu1 %v7170_v56  ;;  %v4665_v30 = vld [vmem:[%s7151_s10 + $0x230] sm:$0xff] }
 0x311   :  { %4655 = vmatmul.mubr.msk.f32.vlgmr.msra.gmra.mxu0 %vm1924_vm6, %v1834_v32  ;;  %4656 = vmatmul.mubr.msk.f32.vlgmr.msra.gmra.mxu1 %vm1924_vm6, %v1834_v32  ;;  %v1826_v20 = vmax.f32 %v1822_v11, 0.0 }
 0x312   :  { %2381 = vmatprep.subr.mxu0 %v1888_v34  ;;  %2452 = vmatprep.subr.mxu1 %v1890_v36  ;;  %v4719_v34 = vld [vmem:[%s7151_s10 + $0x3c0] sm:$0xff]  ;;  %v4721_v36 = vld [vmem:[%s7151_s10 + $0x3d0] sm:$0xff] }
 0x313   :  { %2382 = vmatpush1.msra.mxu0 %v1887_v37  ;;  %2453 = vmatpush1.msra.mxu1 %v1889_v38  ;;  %v1852_v29 = vrot.slane %v1826_v20, 2  ;;  %v4712_v38 = vld [vmem:[%s7151_s10 + $0x388] sm:$0xff] }
 0x314   :  { %2383 = vmatprep.subr.mxu0 %v1880_v40  ;;  %2454 = vmatprep.subr.mxu1 %v1882_v41  ;;  %v4711_v40 = vld [vmem:[%s7151_s10 + $0x380] sm:$0xff]  ;;  %v4713_v41 = vld [vmem:[%s7151_s10 + $0x390] sm:$0xff] }
 0x315   :  { %2384 = vmatpush1.msra.mxu0 %v1879_v42  ;;  %2455 = vmatpush1.msra.mxu1 %v1881_v16  ;;  %v1854_v37 = vmax.f32 %v1826_v20, %v1852_v29  ;;  %v4704_v42 = vld [vmem:[%s7151_s10 + $0x348] sm:$0xff]  ;;  %v4706_v16 = vld [vmem:[%s7151_s10 + $0x358] sm:$0xff] }
 0x316   :  { %2385 = vmatprep.subr.mxu0 %v1872_v43  ;;  %2456 = vmatprep.subr.mxu1 %v1874_v44  ;;  %v4705_v43 = vld [vmem:[%s7151_s10 + $0x350] sm:$0xff] }
 0x317   :  { %2386 = vmatpush1.msra.mxu0 %v1871_v45  ;;  %2457 = vmatpush1.msra.mxu1 %v1873_v46  ;;  %v1856_v44 = vrot.slane %v1854_v37, 4  ;;  %v4696_v45 = vld [vmem:[%s7151_s10 + $0x308] sm:$0xff]  ;;  %v4698_v46 = vld [vmem:[%s7151_s10 + $0x318] sm:$0xff] }
 0x318   :  { %2387 = vmatprep.subr.mxu0 %v1864_v49  ;;  %2458 = vmatprep.subr.mxu1 %v1866_v50  ;;  %v4697_v49 = vld [vmem:[%s7151_s10 + $0x310] sm:$0xff] }
 0x319   :  { %2388 = vmatpush1.msra.mxu0 %v1863_v51  ;;  %2421 = vmatprep.mubr.f32.mxu0 %v7170_v56  ;;  %v1858_v50 = vmax.f32 %v1854_v37, %v1856_v44  ;;  %v4724_v51 = vld [vmem:[%s7151_s10 + $0x3e8] sm:$0xff] }
 0x31a   :  { %2459 = vmatpush1.msra.mxu1 %v1865_v23  ;;  %2492 = vmatprep.mubr.f32.mxu1 %v7170_v56  ;;  %v4725_v23 = vld [vmem:[%s7151_s10 + $0x3f0] sm:$0xff] }
 0x31b   :  { %4657 = vmatmul.mubr.msk.f32.vlgmr.msra.gmra.mxu0 %vm1924_vm6, %v1834_v32  ;;  %4658 = vmatmul.mubr.msk.f32.vlgmr.msra.gmra.mxu1 %vm1924_vm6, %v1834_v32  ;;  %v4720_v32 = vld [vmem:[%s7151_s10 + $0x3c8] sm:$0xff] }
 0x31c   :  { %2559 = vmatprep.subr.mxu0 %v4684_v54  ;;  %2630 = vmatprep.subr.mxu1 %v4686_v48  ;;  %v4716_v54 = vld [vmem:[%s7151_s10 + $0x3a8] sm:$0xff]  ;;  %v4718_v48 = vld [vmem:[%s7151_s10 + $0x3b8] sm:$0xff] }
 0x31d   :  { %2560 = vmatpush1.msra.mxu0 %v4683_v55  ;;  %2631 = vmatpush1.msra.mxu1 %v4685_v57  ;;  %v4715_v55 = vld [vmem:[%s7151_s10 + $0x3a0] sm:$0xff]  ;;  %v4717_v57 = vld [vmem:[%s7151_s10 + $0x3b0] sm:$0xff] }
 0x31e   :  { %2561 = vmatprep.subr.mxu0 %v4676_v60  ;;  %2632 = vmatprep.subr.mxu1 %v4678_v61  ;;  %v4707_v60 = vld [vmem:[%s7151_s10 + $0x360] sm:$0xff]  ;;  %v4709_v61 = vld [vmem:[%s7151_s10 + $0x370] sm:$0xff] }
 0x31f   :  { %2562 = vmatpush1.msra.mxu0 %v4675_v62  ;;  %2633 = vmatpush1.msra.mxu1 %v4677_v63  ;;  %v4700_v62 = vld [vmem:[%s7151_s10 + $0x328] sm:$0xff]  ;;  %v4702_v63 = vld [vmem:[%s7151_s10 + $0x338] sm:$0xff] }
 0x320   :  { %2563 = vmatprep.subr.mxu0 %v4668_v0  ;;  %2634 = vmatprep.subr.mxu1 %v4670_v3  ;;  %v4699_v0 = vld [vmem:[%s7151_s10 + $0x320] sm:$0xff]  ;;  %v4701_v3 = vld [vmem:[%s7151_s10 + $0x330] sm:$0xff] }
 0x321   :  { %2564 = vmatpush1.msra.mxu0 %v4667_v4  ;;  %2635 = vmatpush1.msra.mxu1 %v4669_v5  ;;  %v3157_v4 = vlaneseq }
 0x322   :  { %2565 = vmatprep.subr.mxu0 %v4660_v8  ;;  %2636 = vmatprep.subr.mxu1 %v4662_v9 }
 0x323   :  { %2566 = vmatpush1.msra.mxu0 %v4659_v10  ;;  %2599 = vmatprep.mubr.f32.mxu0 %v7170_v56  ;;  %v6516_v5 = vshrl.u32 %v3157_v4, 7 }
 0x324   :  { %2637 = vmatpush1.msra.mxu1 %v4661_v31  ;;  %2670 = vmatprep.mubr.f32.mxu1 %v7170_v56 }
 0x325   :  { %4691 = vmatmul.mubr.msk.f32.vlgmr.msra.gmra.mxu0 %vm1924_vm6, %v1850_v12  ;;  %4692 = vmatmul.mubr.msk.f32.vlgmr.msra.gmra.mxu1 %vm1924_vm6, %v1850_v12  ;;  %v3167_v7 = vsub.s32 2, %v6516_v5  ;;  %v3171_v9 = vsub.s32 3, %v6516_v5  ;;  %v3175_v31 = vsub.s32 4, %v6516_v5 }
 0x326   :  { %2701 = vmatprep.subr.mxu0 %v4688_v14  ;;  %2772 = vmatprep.subr.mxu1 %v4690_v1  ;;  %v3183_v14 = vsub.s32 6, %v6516_v5 }
 0x327   :  { %2702 = vmatpush1.msra.mxu0 %v4687_v2  ;;  %2773 = vmatpush1.msra.mxu1 %v4689_v35  ;;  %v3168_v8 = vrot.slane %v3155_v6, %v3167_v7  ;;  %v6523_v10 = vrot.slane %v3155_v6, %v3171_v9  ;;  %v6526_v11 = vrot.slane %v3155_v6, %v3175_v31  ;;  %v3187_v35 = vsub.s32 7, %v6516_v5 }
 0x328   :  { %2703 = vmatprep.subr.mxu0 %v4680_v13  ;;  %2774 = vmatprep.subr.mxu1 %v4682_v17  ;;  %v6532_v2 = vrot.slane %v3155_v6, %v3183_v14 }
 0x329   :  { %2704 = vmatpush1.msra.mxu0 %v4679_v18  ;;  %2775 = vmatpush1.msra.mxu1 %v4681_v19  ;;  %v6535_v13 = vrot.slane %v3155_v6, %v3187_v35 }
 0x32a   :  { %2705 = vmatprep.subr.mxu0 %v4672_v15  ;;  %2776 = vmatprep.subr.mxu1 %v4674_v22 }
 0x32b   :  { %2706 = vmatpush1.msra.mxu0 %v4671_v24  ;;  %2777 = vmatpush1.msra.mxu1 %v4673_v25 }
 0x32c   :  { %2707 = vmatprep.subr.mxu0 %v4664_v26  ;;  %2778 = vmatprep.subr.mxu1 %v4666_v27 }
 0x32d   :  { %2708 = vmatpush1.msra.mxu0 %v4663_v28  ;;  %2741 = vmatprep.mubr.f32.mxu0 %v7170_v56 }
 0x32e   :  { %2779 = vmatpush1.msra.mxu1 %v4665_v30  ;;  %2812 = vmatprep.mubr.f32.mxu1 %v7170_v56 }
 0x32f   :  { %4693 = vmatmul.mubr.msk.f32.vlgmr.msra.gmra.mxu0 %vm1924_vm6, %v1850_v12  ;;  %4694 = vmatmul.mubr.msk.f32.vlgmr.msra.gmra.mxu1 %vm1924_vm6, %v1850_v12  ;;  %v3179_v12 = vsub.s32 5, %v6516_v5 }
 0x330   :  { %2887 = vmatprep.subr.mxu0 %v4720_v32  ;;  %2958 = vmatprep.subr.mxu1 %v4722_v33 }
 0x331   :  { %2888 = vmatpush1.msra.mxu0 %v4719_v34  ;;  %2959 = vmatpush1.msra.mxu1 %v4721_v36  ;;  %v6530_v1 = vrot.slane %v3155_v6, %v3179_v12 }
 0x332   :  { %2889 = vmatprep.subr.mxu0 %v4712_v38  ;;  %2960 = vmatprep.subr.mxu1 %v4714_v39 }
 0x333   :  { %2890 = vmatpush1.msra.mxu0 %v4711_v40  ;;  %2961 = vmatpush1.msra.mxu1 %v4713_v41 }
 0x334   :  { %2891 = vmatprep.subr.mxu0 %v4704_v42  ;;  %2962 = vmatprep.subr.mxu1 %v4706_v16 }
 0x335   :  { %2892 = vmatpush1.msra.mxu0 %v4703_v21  ;;  %2963 = vmatpush1.msra.mxu1 %v4705_v43 }
 0x336   :  { %2893 = vmatprep.subr.mxu0 %v4696_v45  ;;  %2964 = vmatprep.subr.mxu1 %v4698_v46 }
 0x337   :  { %2894 = vmatpush1.msra.mxu0 %v4695_v47  ;;  %2927 = vmatprep.mubr.f32.mxu0 %v7170_v56 }
 0x338   :  { %2965 = vmatpush1.msra.mxu1 %v4697_v49  ;;  %2998 = vmatprep.mubr.f32.mxu1 %v7170_v56 }
 0x339   :  { %4727 = vmatmul.mubr.msk.f32.vlgmr.msra.gmra.mxu0 %vm1924_vm6, %v1858_v50  ;;  %4728 = vmatmul.mubr.msk.f32.vlgmr.msra.gmra.mxu1 %vm1924_vm6, %v1858_v50 }
 0x33a   :  { %3029 = vmatprep.subr.mxu0 %v4724_v51  ;;  %3100 = vmatprep.subr.mxu1 %v4726_v52 }
 0x33b   :  { %3030 = vmatpush1.msra.mxu0 %v4723_v53  ;;  %3101 = vmatpush1.msra.mxu1 %v4725_v23 }
 0x33c   :  { %3031 = vmatprep.subr.mxu0 %v4716_v54  ;;  %3102 = vmatprep.subr.mxu1 %v4718_v48  ;;  %v3159_v54 = vsub.s32 0, %v6516_v5  ;;  %v3163_v48 = vsub.s32 1, %v6516_v5 }
 0x33d   :  { %3032 = vmatpush1.msra.mxu0 %v4715_v55  ;;  %3103 = vmatpush1.msra.mxu1 %v4717_v57 }
 0x33e   :  { %3033 = vmatprep.subr.mxu0 %v4708_v58  ;;  %3104 = vmatprep.subr.mxu1 %v4710_v59  ;;  %v3160_v57 = vrot.slane %v3155_v6, %v3159_v54 }
 0x33f   :  { %3034 = vmatpush1.msra.mxu0 %v4707_v60  ;;  %3105 = vmatpush1.msra.mxu1 %v4709_v61 }
 0x340   :  { %3035 = vmatprep.subr.mxu0 %v4700_v62  ;;  %3106 = vmatprep.subr.mxu1 %v4702_v63  ;;  %v3164_v63 = vrot.slane %v3155_v6, %v3163_v48  ;;  %v6561_v6 = vld [vmem:[%s7154_s13 + $0x78] sm:$0xff] }
 0x341   :  { %3036 = vmatpush1.msra.mxu0 %v4699_v0  ;;  %3069 = vmatprep.mubr.f32.mxu0 %v7170_v56  ;;  %7200 = vst [vmem:[#allocation7_spill] sm:$0xff] %v6561_v6 }
 0x342   :  { %3107 = vmatpush1.msra.mxu1 %v4701_v3  ;;  %3140 = vmatprep.mubr.f32.mxu1 %v7170_v56 }
 0x343   :  { %4729 = vmatmul.mubr.msk.f32.vlgmr.msra.gmra.mxu0 %vm1924_vm6, %v1858_v50  ;;  %4730 = vmatmul.mubr.msk.f32.vlgmr.msra.gmra.mxu1 %vm1924_vm6, %v1858_v50 }
 0x344   :  { %3352 = vmatprep.mubr.f32.mxu0 %v7170_v56  ;;  %3443 = vmatprep.mubr.f32.mxu1 %v7170_v56 }
 0x345   :  { %3304 = vmatprep.subr.mxu0 %v6561_v6 }
 0x3be   :  { %v1994_v17 = vpop.f32.mrf.mxu0  ;;  %v2065_v18 = vpop.f32.mrf.mxu1 }
 0x3c0   :  { %v1996_v19 = vpop.f32.mrf.mxu0  ;;  %v6537_v20 = vpop.f32.mrf.mxu1 }
 0x3c7   :  { %v2136_v15 = vpop.f32.mrf.mxu0  ;;  %v2207_v22 = vpop.f32.mrf.mxu1 }
 0x3c9   :  { %v2138_v24 = vpop.f32.mrf.mxu0  ;;  %v2209_v25 = vpop.f32.mrf.mxu1 }
 0x3d1   :  { %v2281_v26 = vpop.f32.mrf.mxu0  ;;  %v2352_v27 = vpop.f32.mrf.mxu1 }
 0x3d2   :  { %v2282_v28 = vadd.f32 %v2281_v26, %v1994_v17  ;;  %v2353_v29 = vadd.f32 %v2352_v27, %v2065_v18  ;;  %v6571_v18 = vld [vmem:[%s7154_s13 + $0x70] sm:$0xff] }
 0x3d3   :  { %v2283_v30 = vpop.f32.mrf.mxu0  ;;  %v6539_v32 = vpop.f32.mrf.mxu1  ;;  %3305 = vmatpush1.msra.mxu0 %v6571_v18 }
 0x3d4   :  { %v2284_v55 = vadd.f32 %v2283_v30, %v1996_v19  ;;  %v6605_v30 = vld [vmem:[%s7154_s13 + $0x58] sm:$0xff] }
 0x3db   :  { %v2423_v33 = vpop.f32.mrf.mxu0  ;;  %v2494_v34 = vpop.f32.mrf.mxu1 }
 0x3dc   :  { %v2424_v36 = vadd.f32 %v2423_v33, %v2136_v15  ;;  %v2495_v37 = vadd.f32 %v2494_v34, %v2207_v22  ;;  %v6578_v22 = vld [vmem:[%s7153_s12 + $0x70] sm:$0xff]  ;;  %v6615_v34 = vld [vmem:[%s7153_s12 + $0x58] sm:$0xff] }
 0x3dd   :  { %v2425_v38 = vpop.f32.mrf.mxu0  ;;  %v2496_v39 = vpop.f32.mrf.mxu1 }
 0x3de   :  { %v2426_v40 = vadd.f32 %v2425_v38, %v2138_v24  ;;  %v2497_v41 = vadd.f32 %v2496_v39, %v2209_v25  ;;  %v6583_v24 = vld [vmem:[%s7154_s13 + $0x68] sm:$0xff] }
 0x3df   :  { %v6588_v25 = vld [vmem:[%s7153_s12 + $0x68] sm:$0xff]  ;;  %3306 = vmatprep.subr.mxu0 %v6583_v24 }
 0x3e0   :  { %v6635_v38 = vld [vmem:[%s7154_s13 + $0x48] sm:$0xff] }
 0x3e1   :  { %v6640_v39 = vld [vmem:[%s7153_s12 + $0x48] sm:$0xff] }
 0x3e5   :  { %v2601_v42 = vpop.f32.mrf.mxu0  ;;  %v2672_v16 = vpop.f32.mrf.mxu1 }
 0x3e6   :  { %v2819_v21 = vadd.f32 %v2601_v42, %v2282_v28  ;;  %v2821_v43 = vadd.f32 %v2672_v16, %v2353_v29  ;;  %v6595_v28 = vld [vmem:[%s7154_s13 + $0x60] sm:$0xff]  ;;  %v6677_v16 = vld [vmem:[%s7154_s13 + $0x30] sm:$0xff] }
 0x3e7   :  { %v2603_v44 = vpop.f32.mrf.mxu0  ;;  %v6541_v45 = vpop.f32.mrf.mxu1  ;;  %v6600_v29 = vld [vmem:[%s7153_s12 + $0x60] sm:$0xff]  ;;  %3307 = vmatpush1.msra.mxu0 %v6595_v28 }
 0x3e8   :  { %v2820_v60 = vadd.f32 %v2603_v44, %v2284_v55  ;;  %3308 = vmatprep.subr.mxu0 %v6605_v30  ;;  %v6658_v42 = vld [vmem:[%s7153_s12 + $0x40] sm:$0xff]  ;;  %v6696_v44 = vld [vmem:[%s7153_s12 + $0x28] sm:$0xff] }
 0x3e9   :  { %v6744_v55 = vld [vmem:[%s7153_s12 + $0x8] sm:$0xff] }
 0x3ef   :  { %v2743_v46 = vpop.f32.mrf.mxu0  ;;  %v2814_v47 = vpop.f32.mrf.mxu1 }
 0x3f0   :  { %v2823_v49 = vadd.f32 %v2743_v46, %v2424_v36  ;;  %v2825_v50 = vadd.f32 %v2814_v47, %v2495_v37  ;;  %v6620_v36 = vld [vmem:[%s7154_s13 + $0x50] sm:$0xff]  ;;  %v6701_v46 = vld [vmem:[%s7154_s13 + $0x20] sm:$0xff] }
 0x3f1   :  { %v2745_v51 = vpop.f32.mrf.mxu0  ;;  %v2816_v52 = vpop.f32.mrf.mxu1  ;;  %v6625_v37 = vld [vmem:[%s7153_s12 + $0x50] sm:$0xff]  ;;  %3309 = vmatpush1.msra.mxu0 %v6620_v36 }
 0x3f2   :  { %v2824_v53 = vadd.f32 %v2745_v51, %v2426_v40  ;;  %v2826_v23 = vadd.f32 %v2816_v52, %v2497_v41  ;;  %v6653_v41 = vld [vmem:[%s7154_s13 + $0x40] sm:$0xff]  ;;  %3310 = vmatprep.subr.mxu0 %v6635_v38  ;;  %v6720_v51 = vld [vmem:[%s7153_s12 + $0x18] sm:$0xff]  ;;  %v6725_v52 = vld [vmem:[%s7154_s13 + $0x10] sm:$0xff] }
 0x3f3   :  { %3311 = vmatpush1.msra.mxu0 %v6653_v41 }
 0x3f9   :  { %v2929_v58 = vpop.f32.mrf.mxu0  ;;  %v3000_v59 = vpop.f32.mrf.mxu1 }
 0x3fa   :  { %v3147_v61 = vadd.f32 %v2929_v58, %v2819_v21  ;;  %v3149_v62 = vadd.f32 %v3000_v59, %v2821_v43  ;;  %v6682_v21 = vld [vmem:[%s7153_s12 + $0x30] sm:$0xff]  ;;  %v6689_v43 = vld [vmem:[%s7154_s13 + $0x28] sm:$0xff]  ;;  %v6756_v58 = vld [vmem:[%s7153_s12] sm:$0xff] }
 0x3fb   :  { %v2931_v0 = vpop.f32.mrf.mxu0  ;;  %v6556_v31 = vpop.f32.mrf.mxu1 }
 0x3fc   :  { %v6549_v3 = vadd.f32 %v3160_v57, %v3147_v61  ;;  %v3148_v4 = vadd.f32 %v2931_v0, %v2820_v60  ;;  %v6551_v7 = vadd.f32 %v3168_v8, %v3149_v62  ;;  %v6566_v8 = vld [vmem:[%s7153_s12 + $0x78] sm:$0xff]  ;;  %v6749_v57 = vld [vmem:[%s7154_s13] sm:$0xff] }
 0x3fd   :  { %3395 = vmatprep.subr.mxu1 %v6566_v8 }
 0x3fe   :  { %v6553_v9 = vadd.f32 %v3164_v63, %v3148_v4  ;;  %3396 = vmatpush1.msra.mxu1 %v6578_v22  ;;  %v4731_v59 = vmul.f32 -1.442695, %v6549_v3  ;;  %v2355_v3 = vadd.f32 %v6539_v32, %v6537_v20 }
 0x3ff   :  { %3397 = vmatprep.subr.mxu1 %v6588_v25 }
 0x400   :  { %5280 = vtanh.f32 %v6553_v9  ;;  %3398 = vmatpush1.msra.mxu1 %v6600_v29  ;;  %v4732_v60 = vmul.f32 -1.442695, %v6553_v9  ;;  %v2822_v9 = vadd.f32 %v6541_v45, %v2355_v3 }
 0x401   :  { %3399 = vmatprep.subr.mxu1 %v6615_v34  ;;  %5282 = vpow2.f32 %v4731_v59 }
 0x402   :  { %3400 = vmatpush1.msra.mxu1 %v6625_v37  ;;  %5284 = vpow2.f32 %v4732_v60 }
 0x403   :  { %v3071_v12 = vpop.f32.mrf.mxu0  ;;  %v3142_v14 = vpop.f32.mrf.mxu1  ;;  %3401 = vmatprep.subr.mxu1 %v6640_v39 }
 0x404   :  { %v3151_v35 = vadd.f32 %v3071_v12, %v2823_v49  ;;  %v3153_v17 = vadd.f32 %v3142_v14, %v2825_v50  ;;  %3402 = vmatpush1.msra.mxu1 %v6658_v42  ;;  %v6708_v49 = vld [vmem:[%s7153_s12 + $0x20] sm:$0xff]  ;;  %v6713_v50 = vld [vmem:[%s7154_s13 + $0x18] sm:$0xff] }
 0x405   :  { %v3073_v19 = vpop.f32.mrf.mxu0  ;;  %v3144_v15 = vpop.f32.mrf.mxu1 }
 0x406   :  { %v3152_v26 = vadd.f32 %v3073_v19, %v2824_v53  ;;  %v3154_v27 = vadd.f32 %v3144_v15, %v2826_v23  ;;  %v6608_v33 = vadd.f32 %v6526_v11, %v3151_v35  ;;  %v6628_v11 = vadd.f32 %v6532_v2, %v3153_v17  ;;  %v6732_v53 = vld [vmem:[%s7153_s12 + $0x10] sm:$0xff]  ;;  %v6737_v23 = vld [vmem:[%s7154_s13 + $0x8] sm:$0xff] }
 0x407   :  { %v3150_v15 = vadd.f32 %v6556_v31, %v2822_v9  ;;  %v3253_v31 = vld [vmem:[%s7156_s15] sm:$0x3] }
 0x408   :  { %7201 = vst [vmem:[#allocation8_spill] sm:$0xff] %v6608_v33  ;;  %7202 = vst [vmem:[#allocation9_spill] sm:$0xff] %v6628_v11  ;;  %v6643_v40 = vadd.f32 %v6530_v1, %v3152_v26  ;;  %v6646_v2 = vadd.f32 %v6535_v13, %v3154_v27  ;;  %v6665_v1 = vld [vmem:[%s7154_s13 + $0x38] sm:$0xff]  ;;  %v6848_v9 = vld [vmem:[%s7155_s14 + $0x40] sm:$0xff] }
 0x409   :  { %v6670_v13 = vld [vmem:[%s7153_s12 + $0x38] sm:$0xff]  ;;  %3312 = vmatprep.subr.mxu0 %v6665_v1  ;;  %v3200_v59 = vadd.f32 %v6523_v10, %v3150_v15 }
 0x40a   :  { %7203 = vst [vmem:[#allocation10_spill] sm:$0xff] %v6643_v40  ;;  %7204 = vst [vmem:[#allocation11_spill] sm:$0xff] %v6646_v2  ;;  %3403 = vmatprep.subr.mxu1 %v6670_v13  ;;  %3313 = vmatpush1.msra.mxu0 %v6677_v16 }
 0x40b   :  { %3404 = vmatpush1.msra.mxu1 %v6682_v21  ;;  %3314 = vmatprep.subr.mxu0 %v6689_v43 }
 0x40c   :  { %3405 = vmatprep.subr.mxu1 %v6696_v44  ;;  %3315 = vmatpush1.msra.mxu0 %v6701_v46 }
 0x40d   :  { %v5281_v47 = vpop.eup %5280  ;;  %3406 = vmatpush1.msra.mxu1 %v6708_v49  ;;  %3316 = vmatprep.subr.mxu0 %v6713_v50 }
 0x40e   :  { %3279 = vrot.lane.b32.xlu0 %v5281_v47, %s5403_s8  ;;  %3407 = vmatprep.subr.mxu1 %v6720_v51  ;;  %v5283_v61 = vpop.eup %5282 }
 0x40f   :  { %3317 = vmatpush1.msra.mxu0 %v6725_v52  ;;  %3408 = vmatpush1.msra.mxu1 %v6732_v53  ;;  %v3271_v62 = vadd.f32 1.0, %v5283_v61  ;;  %v5285_v63 = vpop.eup %5284 }
 0x410   :  { %3318 = vmatprep.subr.mxu0 %v6737_v23  ;;  %3409 = vmatprep.subr.mxu1 %v6744_v55  ;;  %v3272_v0 = vadd.f32 1.0, %v5285_v63 }
 0x411   :  { %3319 = vmatpush1.msra.mxu0 %v6749_v57  ;;  %3410 = vmatpush1.msra.mxu1 %v6756_v58  ;;  %5286 = vrcp.f32 %v3271_v62 }
 0x412   :  { %3505 = vmatprep.subr.mxu0 %v6561_v6  ;;  %5288 = vrcp.f32 %v3272_v0  ;;  %v6808_v0 = vld [vmem:[%s7155_s14 + $0x78] sm:$0xff] }
 0x413   :  { %3579 = vmatprep.subr.mxu1 %v6808_v0 }
 0x41e   :  { %v5287_v4 = vpop.eup %5286 }
 0x41f   :  { %v5289_v35 = vpop.eup %5288 }
 0x480   :  { %v3280_v12 = vpop.permute.xlu0 %3279 }
 0x481   :  { %v3282_v14 = vmul.f32 %v5287_v4, %v3280_v12  ;;  %v6814_v4 = vld [vmem:[%s7155_s14 + $0x70] sm:$0xff]  ;;  %v6824_v12 = vld [vmem:[%s7155_s14 + $0x60] sm:$0xff] }
 0x483   :  { %5290 = vtanh.f32 %v3282_v14  ;;  %3466 = vrot.lane.b32.xlu1 %v3282_v14, %s5403_s8  ;;  %v6830_v14 = vld [vmem:[%s7155_s14 + $0x58] sm:$0xff] }
 0x490   :  { %v5291_v17 = vpop.eup %5290 }
 0x491   :  { %v3284_v19 = vmul.f32 %v5291_v17, %v5289_v35  ;;  %v6836_v35 = vld [vmem:[%s7155_s14 + $0x50] sm:$0xff]  ;;  %v6842_v17 = vld [vmem:[%s7155_s14 + $0x48] sm:$0xff] }
 0x493   :  { %4733 = vmatmul.mubr.msk.f32.vlgmr.msra.gmra.mxu0 %vm1238_vm5, %v3284_v19  ;;  %4736 = vmatmul.mubr.msk.f32.vlgmr.msra.gmra.mxu1 %vm1238_vm5, %v3284_v19 }
 0x494   :  { %3627 = vmatprep.mubr.f32.mxu1 %v7170_v56  ;;  %3506 = vmatpush1.msra.mxu0 %v6571_v18 }
 0x495   :  { %3507 = vmatprep.subr.mxu0 %v6583_v24  ;;  %3553 = vmatprep.mubr.f32.mxu0 %v7170_v56 }
 0x496   :  { %3508 = vmatpush1.msra.mxu0 %v6595_v28  ;;  %3580 = vmatpush1.msra.mxu1 %v6814_v4 }
 0x497   :  { %3509 = vmatprep.subr.mxu0 %v6605_v30 }
 0x498   :  { %3510 = vmatpush1.msra.mxu0 %v6620_v36 }
 0x499   :  { %3511 = vmatprep.subr.mxu0 %v6635_v38 }
 0x49a   :  { %3512 = vmatpush1.msra.mxu0 %v6653_v41 }
 0x49b   :  { %3513 = vmatprep.subr.mxu0 %v6665_v1 }
 0x49c   :  { %3514 = vmatpush1.msra.mxu0 %v6677_v16 }
 0x49d   :  { %3515 = vmatprep.subr.mxu0 %v6689_v43 }
 0x49e   :  { %3516 = vmatpush1.msra.mxu0 %v6701_v46 }
 0x49f   :  { %3517 = vmatprep.subr.mxu0 %v6713_v50 }
 0x4a0   :  { %3518 = vmatpush1.msra.mxu0 %v6725_v52 }
 0x4a1   :  { %3519 = vmatprep.subr.mxu0 %v6737_v23 }
 0x4a2   :  { %3520 = vmatpush1.msra.mxu0 %v6749_v57 }
 0x4a3   :  { %3686 = vmatprep.subr.mxu0 %v6566_v8 }
 0x4f5   :  { %v3467_v40 = vpop.permute.xlu1 %3466 }
 0x553   :  { %v3445_v26 = vpop.f32.mrf.mxu1  ;;  %v3354_v32 = vpop.f32.mrf.mxu0 }
 0x554   :  { %v3450_v27 = vadd.f32 %v3445_v26, %v6551_v7  ;;  %v6802_v7 = vrot.slane %v3253_v31, %v3163_v48  ;;  %v6819_v48 = vld [vmem:[%s7155_s14 + $0x68] sm:$0xff]  ;;  %v6854_v26 = vld [vmem:[%s7155_s14 + $0x38] sm:$0xff] }
 0x555   :  { %v3447_v47 = vpop.f32.mrf.mxu1  ;;  %v3356_v10 = vpop.f32.mrf.mxu0  ;;  %3581 = vmatprep.subr.mxu1 %v6819_v48 }
 0x556   :  { %v6793_v60 = vadd.f32 %v3447_v47, %v3200_v59  ;;  %v4737_v62 = vmul.f32 -1.442695, %v3450_v27  ;;  %7205 = vst [vmem:[#allocation12_spill] sm:$0xff] %v6802_v7  ;;  %v3357_v63 = vadd.f32 %v3356_v10, %v6802_v7  ;;  %3582 = vmatpush1.msra.mxu1 %v6824_v12  ;;  %v6860_v27 = vld [vmem:[%s7155_s14 + $0x30] sm:$0xff]  ;;  %v6867_v47 = vld [vmem:[%s7155_s14 + $0x28] sm:$0xff]  ;;  %v6898_v10 = vld [vmem:[%s7155_s14] sm:$0xff] }
 0x557   :  { %3583 = vmatprep.subr.mxu1 %v6830_v14  ;;  %7209 = vst [vmem:[#allocation16_spill] sm:$0xff] %v6898_v10 }
 0x558   :  { %5292 = vtanh.f32 %v6793_v60  ;;  %3584 = vmatpush1.msra.mxu1 %v6836_v35  ;;  %v4735_v56 = vmul.f32 -1.442695, %v3357_v63 }
 0x559   :  { %5294 = vpow2.f32 %v4737_v62  ;;  %3585 = vmatprep.subr.mxu1 %v6842_v17  ;;  %v6880_v62 = vld [vmem:[%s7155_s14 + $0x18] sm:$0xff] }
 0x55a   :  { %3586 = vmatpush1.msra.mxu1 %v6848_v9  ;;  %7206 = vst [vmem:[#allocation13_spill] sm:$0xff] %v6880_v62 }
 0x55b   :  { %3587 = vmatprep.subr.mxu1 %v6854_v26 }
 0x55c   :  { %3588 = vmatpush1.msra.mxu1 %v6860_v27 }
 0x55d   :  { %3589 = vmatprep.subr.mxu1 %v6867_v47 }
 0x565   :  { %v5293_v61 = vpop.eup %5292 }
 0x566   :  { %3471 = vrot.lane.b32.xlu0 %v5293_v61, %s5403_s8  ;;  %v5295_v20 = vpop.eup %5294  ;;  %v6875_v61 = vld [vmem:[%s7155_s14 + $0x20] sm:$0xff] }
 0x567   :  { %v3458_v45 = vadd.f32 1.0, %v5295_v20  ;;  %v6885_v20 = vld [vmem:[%s7155_s14 + $0x10] sm:$0xff]  ;;  %3590 = vmatpush1.msra.mxu1 %v6875_v61 }
 0x568   :  { %7207 = vst [vmem:[#allocation14_spill] sm:$0xff] %v6885_v20  ;;  %3591 = vmatprep.subr.mxu1 %v6880_v62 }
 0x569   :  { %5296 = vrcp.f32 %v3458_v45  ;;  %v6892_v45 = vld [vmem:[%s7155_s14 + $0x8] sm:$0xff]  ;;  %3592 = vmatpush1.msra.mxu1 %v6885_v20 }
 0x56a   :  { %5298 = vtanh.f32 %v3357_v63  ;;  %7208 = vst [vmem:[#allocation15_spill] sm:$0xff] %v6892_v45  ;;  %3593 = vmatprep.subr.mxu1 %v6892_v45 }
 0x56b   :  { %3594 = vmatpush1.msra.mxu1 %v6898_v10 }
 0x56c   :  { %3792 = vmatprep.subr.mxu1 %v6561_v6 }
 0x576   :  { %v5297_v19 = vpop.eup %5296 }
 0x577   :  { %v5299_v59 = vpop.eup %5298  ;;  %v3469_v7 = vmul.f32 %v5297_v19, %v3467_v40 }
 0x5d8   :  { %v3472_v3 = vpop.permute.xlu0 %3471 }
 0x5d9   :  { %v3474_v15 = vmul.f32 %v5297_v19, %v3472_v3  ;;  %v6906_v3 = vrot.slane %v3253_v31, %v3159_v54 }
 0x5db   :  { %3476 = vrot.lane.b32.xlu1 %v3474_v15, %s5403_s8  ;;  %v3355_v15 = vadd.f32 %v3354_v32, %v6906_v3 }
 0x5df   :  { %3373 = vrot.lane.b32.xlu1 %v5299_v59, %s5403_s8  ;;  %v4734_v59 = vmul.f32 -1.442695, %v3355_v15  ;;  %v7213_v15 = vld [vmem:[#allocation7_spill] sm:$0xff] }
 0x5e1   :  { %5300 = vpow2.f32 %v4734_v59 }
 0x5e2   :  { %5302 = vpow2.f32 %v4735_v56 }
 0x5ee   :  { %v5301_v2 = vpop.eup %5300 }
 0x5ef   :  { %v3365_v11 = vadd.f32 1.0, %v5301_v2  ;;  %v5303_v33 = vpop.eup %5302 }
 0x5f0   :  { %v3366_v6 = vadd.f32 1.0, %v5303_v33  ;;  %v7210_v33 = vmov 0.0  }
 0x5f1   :  { %5304 = vrcp.f32 %v3365_v11 }
 0x5fe   :  { %v5305_v5 = vpop.eup %5304 }
 0x64d   :  { %v3477_v45 = vpop.permute.xlu1 %3476 }
 0x64e   :  { %v6909_v10 = vadd.f32 %v3477_v45, %v3469_v7 }
 0x650   :  { %5306 = vtanh.f32 %v6909_v10 }
 0x651   :  { %v3374_v54 = vpop.permute.xlu1 %3373  ;;  %5308 = vrcp.f32 %v3366_v6  ;;  %v4738_v6 = vmul.f32 -1.442695, %v6793_v60  ;;  %v7212_v60 = vld [vmem:[#allocation16_spill] sm:$0xff] }
 0x652   :  { %v6912_v31 = vmul.f32 %v5305_v5, %v3374_v54 }
 0x654   :  { %5310 = vtanh.f32 %v6912_v31 }
 0x655   :  { %5312 = vpow2.f32 %v4738_v6 }
 0x65d   :  { %v5307_v32 = vpop.eup %5306 }
 0x65e   :  { %3482 = vrot.lane.b32.xlu0 %v5307_v32, %s5403_s8  ;;  %v5309_v56 = vpop.eup %5308  ;;  %v7214_v32 = vld [vmem:[#allocation12_spill] sm:$0xff] }
 0x661   :  { %v5311_v11 = vpop.eup %5310 }
 0x662   :  { %v3378_v2 = vmul.f32 %v5311_v11, %v5309_v56  ;;  %v5313_v40 = vpop.eup %5312 }
 0x663   :  { %v3459_v7 = vadd.f32 1.0, %v5313_v40  ;;  %v7215_v40 = vld [vmem:[#allocation8_spill] sm:$0xff] }
 0x664   :  { %4740 = vmatmul.mubr.msk.f32.vlgmr.msra.gmra.mxu1 %vm1238_vm5, %v3378_v2 }
 0x665   :  { %3793 = vmatpush1.msra.mxu1 %v6571_v18  ;;  %3840 = vmatprep.mubr.f32.mxu1 %v7210_v33  ;;  %5314 = vrcp.f32 %v3459_v7 }
 0x666   :  { %3794 = vmatprep.subr.mxu1 %v6583_v24 }
 0x667   :  { %3795 = vmatpush1.msra.mxu1 %v6595_v28 }
 0x668   :  { %3796 = vmatprep.subr.mxu1 %v6605_v30 }
 0x669   :  { %3797 = vmatpush1.msra.mxu1 %v6620_v36 }
 0x66a   :  { %3798 = vmatprep.subr.mxu1 %v6635_v38 }
 0x66b   :  { %3799 = vmatpush1.msra.mxu1 %v6653_v41 }
 0x66c   :  { %3800 = vmatprep.subr.mxu1 %v6665_v1 }
 0x66d   :  { %3801 = vmatpush1.msra.mxu1 %v6677_v16 }
 0x66e   :  { %3802 = vmatprep.subr.mxu1 %v6689_v43 }
 0x66f   :  { %3803 = vmatpush1.msra.mxu1 %v6701_v46 }
 0x670   :  { %3804 = vmatprep.subr.mxu1 %v6713_v50 }
 0x671   :  { %3805 = vmatpush1.msra.mxu1 %v6725_v52 }
 0x672   :  { %3806 = vmatprep.subr.mxu1 %v6737_v23  ;;  %v5315_v63 = vpop.eup %5314 }
 0x673   :  { %3807 = vmatpush1.msra.mxu1 %v6749_v57 }
 0x674   :  { %3969 = vmatprep.subr.mxu1 %v6566_v8  ;;  %v7211_v8 = vld [vmem:[#allocation15_spill] sm:$0xff] }
 0x6d0   :  { %v3483_v19 = vpop.permute.xlu0 %3482 }
 0x6d1   :  { %v3485_v45 = vmul.f32 %v5315_v63, %v3483_v19  ;;  %v7216_v19 = vld [vmem:[#allocation10_spill] sm:$0xff] }
 0x6d3   :  { %4739 = vmatmul.mubr.msk.f32.vlgmr.msra.gmra.mxu0 %vm1238_vm5, %v3485_v45 }
 0x6d4   :  { %3687 = vmatpush1.msra.mxu0 %v6578_v22  ;;  %3734 = vmatprep.mubr.f32.mxu0 %v7210_v33 }
 0x6d5   :  { %3688 = vmatprep.subr.mxu0 %v6588_v25 }
 0x6d6   :  { %3689 = vmatpush1.msra.mxu0 %v6600_v29 }
 0x6d7   :  { %3690 = vmatprep.subr.mxu0 %v6615_v34 }
 0x6d8   :  { %3691 = vmatpush1.msra.mxu0 %v6625_v37 }
 0x6d9   :  { %3692 = vmatprep.subr.mxu0 %v6640_v39 }
 0x6da   :  { %3693 = vmatpush1.msra.mxu0 %v6658_v42 }
 0x6db   :  { %3694 = vmatprep.subr.mxu0 %v6670_v13 }
 0x6dc   :  { %3695 = vmatpush1.msra.mxu0 %v6682_v21 }
 0x6dd   :  { %3696 = vmatprep.subr.mxu0 %v6696_v44 }
 0x6de   :  { %3697 = vmatpush1.msra.mxu0 %v6708_v49 }
 0x6df   :  { %3698 = vmatprep.subr.mxu0 %v6720_v51 }
 0x6e0   :  { %3699 = vmatpush1.msra.mxu0 %v6732_v53 }
 0x6e1   :  { %3700 = vmatprep.subr.mxu0 %v6744_v55 }
 0x6e2   :  { %3701 = vmatpush1.msra.mxu0 %v6756_v58 }
 0x6e3   :  { %4743 = vmatmul.mubr.msk.f32.vlgmr.msra.gmra.mxu0 %vm1238_vm5, %v3485_v45  ;;  %3866 = vmatprep.subr.mxu0 %v6808_v0 }
 0x6e4   :  { %3867 = vmatpush1.msra.mxu0 %v6814_v4  ;;  %3914 = vmatprep.mubr.f32.mxu0 %v7210_v33 }
 0x6e5   :  { %3868 = vmatprep.subr.mxu0 %v6819_v48 }
 0x6e6   :  { %3869 = vmatpush1.msra.mxu0 %v6824_v12 }
 0x6e7   :  { %3870 = vmatprep.subr.mxu0 %v6830_v14 }
 0x6e8   :  { %3871 = vmatpush1.msra.mxu0 %v6836_v35 }
 0x6e9   :  { %3872 = vmatprep.subr.mxu0 %v6842_v17 }
 0x6ea   :  { %3873 = vmatpush1.msra.mxu0 %v6848_v9 }
 0x6eb   :  { %3874 = vmatprep.subr.mxu0 %v6854_v26 }
 0x6ec   :  { %3875 = vmatpush1.msra.mxu0 %v6860_v27 }
 0x6ed   :  { %3876 = vmatprep.subr.mxu0 %v6867_v47 }
 0x6ee   :  { %3877 = vmatpush1.msra.mxu0 %v6875_v61 }
 0x6ef   :  { %3878 = vmatprep.subr.mxu0 %v6880_v62 }
 0x6f0   :  { %3879 = vmatpush1.msra.mxu0 %v6885_v20 }
 0x6f1   :  { %3880 = vmatprep.subr.mxu0 %v7211_v8 }
 0x6f2   :  { %3881 = vmatpush1.msra.mxu0 %v7212_v60 }
 0x6f3   :  { %4075 = vmatprep.subr.mxu0 %v7213_v15 }
 0x724   :  { %v3629_v59 = vpop.f32.mrf.mxu1 }
 0x726   :  { %v3631_v11 = vpop.f32.mrf.mxu1 }
 0x793   :  { %v3555_v5 = vpop.f32.mrf.mxu0 }
 0x795   :  { %v3557_v54 = vpop.f32.mrf.mxu0 }
 0x796   :  { %v3558_v56 = vadd.f32 %v3557_v54, %v7214_v32  ;;  %v3556_v54 = vadd.f32 %v3555_v5, %v6906_v3 }
 0x798   :  { %v3635_v2 = vadd.f32 %v3631_v11, %v3558_v56  ;;  %v3634_v56 = vadd.f32 %v3629_v59, %v3556_v54 }
 0x79a   :  { %5316 = vtanh.f32 %v3635_v2  ;;  %v4741_v32 = vmul.f32 -1.442695, %v3634_v56 }
 0x7a3   :  { %v3736_v6 = vpop.f32.mrf.mxu0 }
 0x7a4   :  { %v3741_v7 = vadd.f32 %v3736_v6, %v7215_v40 }
 0x7a5   :  { %v3738_v63 = vpop.f32.mrf.mxu0 }
 0x7a6   :  { %v3742_v45 = vadd.f32 %v3738_v63, %v7216_v19  ;;  %v4744_v11 = vmul.f32 -1.442695, %v3741_v7 }
 0x7a7   :  { %v5317_v20 = vpop.eup %5316 }
 0x7a8   :  { %5318 = vtanh.f32 %v3742_v45  ;;  %3655 = vrot.lane.b32.xlu1 %v5317_v20, %s5403_s8 }
 0x7a9   :  { %5320 = vpow2.f32 %v4744_v11 }
 0x7aa   :  { %5322 = vpow2.f32 %v4741_v32 }
 0x7ac   :  { %3650 = vrot.lane.b32.xlu1 %v6912_v31, %s5403_s8 }
 0x7b5   :  { %v5319_v15 = vpop.eup %5318 }
 0x7b6   :  { %3758 = vrot.lane.b32.xlu0 %v5319_v15, %s5403_s8  ;;  %v5321_v6 = vpop.eup %5320 }
 0x7b7   :  { %v3749_v40 = vadd.f32 1.0, %v5321_v6  ;;  %v5323_v63 = vpop.eup %5322 }
 0x7b8   :  { %v3642_v19 = vadd.f32 1.0, %v5323_v63 }
 0x7b9   :  { %5324 = vrcp.f32 %v3749_v40 }
 0x7ba   :  { %5326 = vrcp.f32 %v3642_v19 }
 0x7c6   :  { %v5325_v20 = vpop.eup %5324 }
 0x7c7   :  { %v5327_v15 = vpop.eup %5326  ;;  %v3756_v59 = vmul.f32 %v5325_v20, %v6909_v10  ;;  %v4742_v10 = vmul.f32 -1.442695, %v3635_v2 }
 0x81a   :  { %v3656_v31 = vpop.permute.xlu1 %3655 }
 0x81b   :  { %v3658_v62 = vmul.f32 %v5327_v15, %v3656_v31 }
 0x81e   :  { %v3651_v5 = vpop.permute.xlu1 %3650 }
 0x81f   :  { %v3653_v54 = vmul.f32 %v5327_v15, %v3651_v5 }
 0x828   :  { %v3759_v60 = vpop.permute.xlu0 %3758 }
 0x829   :  { %v3761_v8 = vmul.f32 %v5325_v20, %v3759_v60 }
 0x82b   :  { %3763 = vrot.lane.b32.xlu0 %v3761_v8, %s5403_s8 }
 0x82f   :  { %3660 = vrot.lane.b32.xlu0 %v3658_v62, %s5403_s8  ;;  %v4745_v62 = vmul.f32 -1.442695, %v3742_v45 }
 0x89d   :  { %v3764_v32 = vpop.permute.xlu0 %3763 }
 0x89e   :  { %v6982_v7 = vadd.f32 %v3764_v32, %v3756_v59 }
 0x8a0   :  { %5328 = vtanh.f32 %v6982_v7 }
 0x8a1   :  { %v3661_v56 = vpop.permute.xlu0 %3660 }
 0x8a2   :  { %v6985_v11 = vadd.f32 %v3661_v56, %v3653_v54 }
 0x8a4   :  { %5330 = vtanh.f32 %v6985_v11 }
 0x8a5   :  { %5332 = vpow2.f32 %v4745_v62 }
 0x8a6   :  { %5334 = vpow2.f32 %v4742_v10 }
 0x8ad   :  { %v5329_v60 = vpop.eup %5328 }
 0x8ae   :  { %3769 = vrot.lane.b32.xlu1 %v5329_v60, %s5403_s8 }
 0x8b1   :  { %v5331_v8 = vpop.eup %5330 }
 0x8b2   :  { %3666 = vrot.lane.b32.xlu0 %v5331_v8, %s5403_s8  ;;  %v5333_v6 = vpop.eup %5332 }
 0x8b3   :  { %v3750_v40 = vadd.f32 1.0, %v5333_v6  ;;  %v5335_v63 = vpop.eup %5334 }
 0x8b4   :  { %v3643_v19 = vadd.f32 1.0, %v5335_v63 }
 0x8b5   :  { %5336 = vrcp.f32 %v3750_v40 }
 0x8b6   :  { %5338 = vrcp.f32 %v3643_v19 }
 0x8c2   :  { %v5337_v20 = vpop.eup %5336 }
 0x8c3   :  { %v5339_v59 = vpop.eup %5338 }
 0x920   :  { %v3770_v31 = vpop.permute.xlu1 %3769 }
 0x921   :  { %v3772_v15 = vmul.f32 %v5337_v20, %v3770_v31 }
 0x923   :  { %4746 = vmatmul.mubr.msk.f32.vlgmr.msra.gmra.mxu1 %vm1238_vm5, %v3772_v15 }
 0x924   :  { %3970 = vmatpush1.msra.mxu1 %v6578_v22  ;;  %v3667_v5 = vpop.permute.xlu0 %3666  ;;  %4017 = vmatprep.mubr.f32.mxu1 %v7210_v33  ;;  %v7218_v22 = vld [vmem:[#allocation14_spill] sm:$0xff] }
 0x925   :  { %v3669_v2 = vmul.f32 %v5339_v59, %v3667_v5  ;;  %3971 = vmatprep.subr.mxu1 %v6588_v25  ;;  %v7220_v25 = vld [vmem:[#allocation16_spill] sm:$0xff] }
 0x926   :  { %3972 = vmatpush1.msra.mxu1 %v6600_v29 }
 0x927   :  { %3973 = vmatprep.subr.mxu1 %v6615_v34  ;;  %4747 = vmatmul.mubr.msk.f32.vlgmr.msra.gmra.mxu0 %vm1238_vm5, %v3669_v2 }
 0x928   :  { %3974 = vmatpush1.msra.mxu1 %v6625_v37  ;;  %4076 = vmatpush1.msra.mxu0 %v6571_v18  ;;  %v7217_v18 = vld [vmem:[#allocation13_spill] sm:$0xff] }
 0x929   :  { %3975 = vmatprep.subr.mxu1 %v6640_v39  ;;  %4077 = vmatprep.subr.mxu0 %v6583_v24  ;;  %v7219_v24 = vld [vmem:[#allocation15_spill] sm:$0xff] }
 0x92a   :  { %3976 = vmatpush1.msra.mxu1 %v6658_v42  ;;  %4078 = vmatpush1.msra.mxu0 %v6595_v28 }
 0x92b   :  { %3977 = vmatprep.subr.mxu1 %v6670_v13  ;;  %4079 = vmatprep.subr.mxu0 %v6605_v30 }
 0x92c   :  { %3978 = vmatpush1.msra.mxu1 %v6682_v21  ;;  %4080 = vmatpush1.msra.mxu0 %v6620_v36  ;;  %v7221_v36 = vld [vmem:[#allocation12_spill] sm:$0xff]  ;;  %v7223_v21 = vld [vmem:[#allocation11_spill] sm:$0xff] }
 0x92d   :  { %3979 = vmatprep.subr.mxu1 %v6696_v44  ;;  %4081 = vmatprep.subr.mxu0 %v6635_v38 }
 0x92e   :  { %3980 = vmatpush1.msra.mxu1 %v6708_v49  ;;  %4082 = vmatpush1.msra.mxu0 %v6653_v41 }
 0x92f   :  { %3981 = vmatprep.subr.mxu1 %v6720_v51  ;;  %4083 = vmatprep.subr.mxu0 %v6665_v1  ;;  %v7222_v1 = vld [vmem:[#allocation9_spill] sm:$0xff] }
 0x930   :  { %3982 = vmatpush1.msra.mxu1 %v6732_v53  ;;  %4084 = vmatpush1.msra.mxu0 %v6677_v16 }
 0x931   :  { %3983 = vmatprep.subr.mxu1 %v6744_v55  ;;  %4085 = vmatprep.subr.mxu0 %v6689_v43 }
 0x932   :  { %3984 = vmatpush1.msra.mxu1 %v6756_v58  ;;  %4086 = vmatpush1.msra.mxu0 %v6701_v46 }
 0x933   :  { %4750 = vmatmul.mubr.msk.f32.vlgmr.msra.gmra.mxu1 %vm1238_vm5, %v3772_v15  ;;  %4149 = vmatprep.subr.mxu1 %v6808_v0 }
 0x934   :  { %4150 = vmatpush1.msra.mxu1 %v6814_v4  ;;  %4197 = vmatprep.mubr.f32.mxu1 %v7210_v33 }
 0x935   :  { %4151 = vmatprep.subr.mxu1 %v6819_v48  ;;  %4087 = vmatprep.subr.mxu0 %v6713_v50 }
 0x936   :  { %4152 = vmatpush1.msra.mxu1 %v6824_v12  ;;  %4088 = vmatpush1.msra.mxu0 %v6725_v52 }
 0x937   :  { %4153 = vmatprep.subr.mxu1 %v6830_v14  ;;  %4089 = vmatprep.subr.mxu0 %v6737_v23 }
 0x938   :  { %4154 = vmatpush1.msra.mxu1 %v6836_v35  ;;  %4090 = vmatpush1.msra.mxu0 %v6749_v57 }
 0x939   :  { %4155 = vmatprep.subr.mxu1 %v6842_v17  ;;  %4123 = vmatprep.mubr.f32.mxu0 %v7210_v33 }
 0x93a   :  { %4156 = vmatpush1.msra.mxu1 %v6848_v9  ;;  %5244 = vmatprep.subr.mxu0 %v7210_v33 }
 0x93b   :  { %4157 = vmatprep.subr.mxu1 %v6854_v26 }
 0x93c   :  { %4158 = vmatpush1.msra.mxu1 %v6860_v27 }
 0x93d   :  { %4159 = vmatprep.subr.mxu1 %v6867_v47 }
 0x93e   :  { %4160 = vmatpush1.msra.mxu1 %v6875_v61 }
 0x93f   :  { %4161 = vmatprep.subr.mxu1 %v7217_v18 }
 0x940   :  { %4162 = vmatpush1.msra.mxu1 %v7218_v22 }
 0x941   :  { %4163 = vmatprep.subr.mxu1 %v7219_v24 }
 0x942   :  { %4164 = vmatpush1.msra.mxu1 %v7220_v25 }
 0x943   :  { %5263 = vmatprep.subr.mxu1 %v7210_v33 }
 0x9e3   :  { %v3842_v28 = vpop.f32.mrf.mxu1 }
 0x9e4   :  { %v3843_v30 = vadd.f32 %v3842_v28, %v6906_v3 }
 0x9e5   :  { %v3844_v29 = vpop.f32.mrf.mxu1 }
 0x9e6   :  { %v3845_v37 = vadd.f32 %v3844_v29, %v7221_v36 }
 0x9e7   :  { %v3916_v34 = vpop.f32.mrf.mxu0 }
 0x9e8   :  { %v3921_v38 = vadd.f32 %v3916_v34, %v3843_v30  ;;  %v4258_v30 = vld [vmem:[%s7159_s18 + $0x30] sm:$0xff]  ;;  %v4257_v34 = vld [vmem:[%s7159_s18 + $0x28] sm:$0xff] }
 0x9e9   :  { %v3918_v39 = vpop.f32.mrf.mxu0 }
 0x9ea   :  { %v3922_v41 = vadd.f32 %v3918_v39, %v3845_v37  ;;  %v4748_v49 = vmul.f32 -1.442695, %v3921_v38  ;;  %v4255_v37 = vld [vmem:[%s7159_s18 + $0x18] sm:$0xff] }
 0x9ec   :  { %5340 = vtanh.f32 %v3922_v41  ;;  %v4749_v61 = vmul.f32 -1.442695, %v3922_v41 }
 0x9f3   :  { %v4019_v42 = vpop.f32.mrf.mxu1 }
 0x9f4   :  { %v4024_v13 = vadd.f32 %v4019_v42, %v7222_v1  ;;  %v4254_v42 = vld [vmem:[%s7159_s18 + $0x10] sm:$0xff]  ;;  %v4253_v1 = vld [vmem:[%s7159_s18 + $0x8] sm:$0xff] }
 0x9f5   :  { %v4021_v16 = vpop.f32.mrf.mxu1 }
 0x9f6   :  { %v4025_v43 = vadd.f32 %v4021_v16, %v7223_v21  ;;  %v4751_v50 = vmul.f32 -1.442695, %v4024_v13  ;;  %v4252_v13 = vld [vmem:[%s7159_s18] sm:$0xff] }
 0x9f8   :  { %5342 = vtanh.f32 %v4025_v43  ;;  %v4752_v45 = vmul.f32 -1.442695, %v4025_v43 }
 0x9f9   :  { %v5341_v44 = vpop.eup %5340  ;;  %5344 = vpow2.f32 %v4748_v49  ;;  %v4757_v49 = vld [vmem:[%s7157_s16] ss:$0 sm:$0xff] }
 0x9fa   :  { %3938 = vrot.lane.b32.xlu0 %v5341_v44, %s5403_s8  ;;  %5346 = vpow2.f32 %v4751_v50 }
 0xa05   :  { %v5343_v46 = vpop.eup %5342 }
 0xa06   :  { %4041 = vrot.lane.b32.xlu1 %v5343_v46, %s5403_s8  ;;  %v5345_v51 = vpop.eup %5344 }
 0xa07   :  { %v3929_v52 = vadd.f32 1.0, %v5345_v51  ;;  %v5347_v53 = vpop.eup %5346 }
 0xa08   :  { %v4032_v23 = vadd.f32 1.0, %v5347_v53 }
 0xa09   :  { %5348 = vrcp.f32 %v3929_v52  ;;  %v4758_v52 = vld [vmem:[%s7158_s17] ss:$0 sm:$0xff] }
 0xa0a   :  { %5350 = vrcp.f32 %v4032_v23 }
 0xa16   :  { %v5349_v55 = vpop.eup %5348 }
 0xa17   :  { %v5351_v0 = vpop.eup %5350  ;;  %v3936_v12 = vmul.f32 %v5349_v55, %v6985_v11 }
 0xa18   :  { %v4039_v17 = vmul.f32 %v5351_v0, %v6982_v7 }
 0xa6c   :  { %v3939_v57 = vpop.permute.xlu0 %3938 }
 0xa6d   :  { %v3941_v58 = vmul.f32 %v5349_v55, %v3939_v57  ;;  %v4359_v55 = vld [vmem:[%s7163_s22 + $0x18] sm:$0xff]  ;;  %v4358_v57 = vld [vmem:[%s7163_s22 + $0x10] sm:$0xff] }
 0xa6f   :  { %3943 = vrot.lane.b32.xlu0 %v3941_v58, %s5403_s8  ;;  %v4357_v58 = vld [vmem:[%s7163_s22 + $0x8] sm:$0xff] }
 0xa78   :  { %v4042_v4 = vpop.permute.xlu1 %4041 }
 0xa79   :  { %v4044_v48 = vmul.f32 %v5351_v0, %v4042_v4  ;;  %v4356_v0 = vld [vmem:[%s7163_s22] sm:$0xff] }
 0xa7a   :  { %v4759_v4 = vld [vmem:[%s7224_s2] ss:$0 sm:$0xff] }
 0xa7b   :  { %4046 = vrot.lane.b32.xlu1 %v4044_v48, %s5403_s8 }
 0xae1   :  { %v3944_v14 = vpop.permute.xlu0 %3943 }
 0xae2   :  { %v7053_v35 = vadd.f32 %v3944_v14, %v3936_v12  ;;  %v4761_v12 = vld [vmem:[%s7161_s20] ss:$0 sm:$0xff]  ;;  %s5405_s20 = smov [#allocation4]  }
 0xae4   :  { %5352 = vtanh.f32 %v7053_v35 }
 0xaed   :  { %v4047_v9 = vpop.permute.xlu1 %4046 }
 0xaee   :  { %v4049_v26 = vadd.f32 %v4047_v9, %v4039_v17 }
 0xaf0   :  { %5354 = vtanh.f32 %v4049_v26  ;;  %v4763_v26 = vld [vmem:[%s7164_s23] ss:$0 sm:$0xff] }
 0xaf1   :  { %v5353_v27 = vpop.eup %5352  ;;  %5356 = vpow2.f32 %v4749_v61 }
 0xaf2   :  { %3949 = vrot.lane.b32.xlu0 %v5353_v27, %s5403_s8  ;;  %5358 = vpow2.f32 %v4752_v45 }
 0xafd   :  { %v5355_v47 = vpop.eup %5354 }
 0xafe   :  { %4052 = vrot.lane.b32.xlu1 %v5355_v47, %s5403_s8  ;;  %v5357_v32 = vpop.eup %5356 }
 0xaff   :  { %v3930_v54 = vadd.f32 1.0, %v5357_v32  ;;  %v5359_v56 = vpop.eup %5358 }
 0xb00   :  { %v4033_v11 = vadd.f32 1.0, %v5359_v56 }
 0xb01   :  { %5360 = vrcp.f32 %v3930_v54 }
 0xb02   :  { %5362 = vrcp.f32 %v4033_v11 }
 0xb0e   :  { %v5361_v7 = vpop.eup %5360 }
 0xb0f   :  { %v5363_v62 = vpop.eup %5362 }
 0xb64   :  { %v3950_v60 = vpop.permute.xlu0 %3949 }
 0xb65   :  { %v3952_v8 = vmul.f32 %v5361_v7, %v3950_v60 }
 0xb67   :  { %4754 = vmatmul.mubr.msk.f32.vlgmr.msra.gmra.mxu1 %vm1238_vm5, %v3952_v8 }
 0xb68   :  { %5271 = vmatprep.mubr.msk.f32.mxu1 %vm5404_vm7, %v7210_v33  ;;  %5264 = vmatpush3.msra.mxu1 %v4359_v55 }
 0xb69   :  { %5265 = vmatprep.subr.mxu1 %v7210_v33 }
 0xb6a   :  { %5266 = vmatpush3.msra.mxu1 %v4358_v57 }
 0xb6b   :  { %5267 = vmatprep.subr.mxu1 %v7210_v33 }
 0xb6c   :  { %5268 = vmatpush3.msra.mxu1 %v4357_v58 }
 0xb6d   :  { %5269 = vmatprep.subr.mxu1 %v7210_v33 }
 0xb6e   :  { %5270 = vmatpush3.msra.mxu1 %v4356_v0 }
 0xb70   :  { %v4053_v10 = vpop.permute.xlu1 %4052 }
 0xb71   :  { %v4055_v6 = vmul.f32 %v5363_v62, %v4053_v10 }
 0xb73   :  { %4753 = vmatmul.mubr.msk.f32.vlgmr.msra.gmra.mxu0 %vm1238_vm5, %v4055_v6 }
 0xb74   :  { %5260 = vmatprep.mubr.msk.f32.mxu0 %vm5404_vm7, %v7210_v33 }
 0xc27   :  { %v4199_v40 = vpop.f32.mrf.mxu1 }
 0xc29   :  { %v4201_v59 = vpop.f32.mrf.mxu1 }
 0xc33   :  { %v4125_v63 = vpop.f32.mrf.mxu0 }
 0xc34   :  { %v4126_v19 = vadd.f32 %v4125_v63, %v6906_v3  ;;  %v4259_v3 = vld [vmem:[%s7159_s18 + $0x38] sm:$0xff] }
 0xc35   :  { %v4127_v20 = vpop.f32.mrf.mxu0  ;;  %5245 = vmatpush3.msra.mxu0 %v4259_v3 }
 0xc36   :  { %v4204_v31 = vadd.f32 %v4199_v40, %v4126_v19  ;;  %v4128_v15 = vadd.f32 %v4127_v20, %v7221_v36  ;;  %5246 = vmatprep.subr.mxu0 %v7210_v33  ;;  %v4256_v36 = vld [vmem:[%s7159_s18 + $0x20] sm:$0xff] }
 0xc37   :  { %5247 = vmatpush3.msra.mxu0 %v4258_v30 }
 0xc38   :  { %v4205_v5 = vadd.f32 %v4201_v59, %v4128_v15  ;;  %v4755_v18 = vmul.f32 -1.442695, %v4204_v31  ;;  %5248 = vmatprep.subr.mxu0 %v7210_v33 }
 0xc39   :  { %5249 = vmatpush3.msra.mxu0 %v4257_v34 }
 0xc3a   :  { %5364 = vtanh.f32 %v4205_v5  ;;  %5250 = vmatprep.subr.mxu0 %v7210_v33  ;;  %v4756_v21 = vmul.f32 -1.442695, %v4205_v5 }
 0xc3b   :  { %5366 = vpow2.f32 %v4755_v18  ;;  %5251 = vmatpush3.msra.mxu0 %v4256_v36 }
 0xc3c   :  { %5252 = vmatprep.subr.mxu0 %v7210_v33 }
 0xc3d   :  { %5253 = vmatpush3.msra.mxu0 %v4255_v37 }
 0xc3e   :  { %5254 = vmatprep.subr.mxu0 %v7210_v33 }
 0xc3f   :  { %5255 = vmatpush3.msra.mxu0 %v4254_v42 }
 0xc40   :  { %5256 = vmatprep.subr.mxu0 %v7210_v33 }
 0xc41   :  { %5257 = vmatpush3.msra.mxu0 %v4253_v1 }
 0xc42   :  { %5258 = vmatprep.subr.mxu0 %v7210_v33 }
 0xc43   :  { %5259 = vmatpush3.msra.mxu0 %v4252_v13 }
 0xc47   :  { %v5365_v2 = vpop.eup %5364 }
 0xc48   :  { %4221 = vrot.lane.b32.xlu1 %v5365_v2, %s5403_s8  ;;  %v5367_v22 = vpop.eup %5366 }
 0xc49   :  { %v4212_v24 = vadd.f32 1.0, %v5367_v22 }
 0xc4b   :  { %5368 = vrcp.f32 %v4212_v24 }
 0xc58   :  { %v5369_v25 = vpop.eup %5368 }
 0xc59   :  { %v4219_v38 = vmul.f32 %v5369_v25, %v7053_v35  ;;  %v4762_v35 = vld [vmem:[%s7162_s21] ss:$0 sm:$0xff]  ;;  %s4461_s21 = sshll.u32 %s5405_s20, 4  ;;  %s4462_s21 = int_to_ptr.vmem [resolvable:$true] %s4461_s21 }
 0xc5a   :  { %s5380_s23 = scalar_lea.vmem %s4462_s21, 32  ;;  %p5385_p1 = scmp.lt.s32.totalorder %s4462_s21, %s4462_s21 }
 0xc5b   :  { %p5381_p0 = scmp.ne.s32.totalorder %s4462_s21, %s5380_s23  ;;  %p5386_p2 = scmp.lt.s32.totalorder %s5380_s23, %s5380_s23 }
 0xc5d   :  { %p5387_p3 = por %p5386_p2, %p5385_p1 }
 0xc5f   :  { %p5388_p4 = pnand %p5387_p3, %p5381_p0 }
 0xcba   :  { %v4222_v28 = vpop.permute.xlu1 %4221 }
 0xcbb   :  { %v4224_v29 = vmul.f32 %v5369_v25, %v4222_v28 }
 0xcbd   :  { %4226 = vrot.lane.b32.xlu0 %v4224_v29, %s5403_s8 }
 0xd2f   :  { %v4227_v39 = vpop.permute.xlu0 %4226 }
 0xd30   :  { %v4229_v41 = vadd.f32 %v4227_v39, %v4219_v38 }
 0xd32   :  { %5370 = vtanh.f32 %v4229_v41 }
 0xd33   :  { %5372 = vpow2.f32 %v4756_v21 }
 0xd3f   :  { %v5371_v16 = vpop.eup %5370 }
 0xd40   :  { %4232 = vrot.lane.b32.xlu1 %v5371_v16, %s5403_s8  ;;  %v5373_v43 = vpop.eup %5372 }
 0xd41   :  { %v4213_v44 = vadd.f32 1.0, %v5373_v43 }
 0xd43   :  { %5374 = vrcp.f32 %v4213_v44 }
 0xd50   :  { %v5375_v46 = vpop.eup %5374 }
 0xdb2   :  { %v4233_v50 = vpop.permute.xlu1 %4232 }
 0xdb3   :  { %v4235_v51 = vmul.f32 %v5375_v46, %v4233_v50 }
 0xdb5   :  { %v4243_v53 = vmul.f32 %v4757_v49, %v4235_v51 }
 0xdb7   :  { %v4251_v23 = vadd.f32 %v4758_v52, %v4243_v53 }
 0xdb9   :  { %5261 = vmatmul.mubr.msk.f32.vlgmr.msra.gmra.mxu0 %vm1238_vm5, %v4251_v23 }
 0xe79   :  { %v4336_v48 = vpop.f32.mrf.mxu0 }
 0xe7a   :  { %v4337_v14 = vadd.f32 %v4759_v4, %v4336_v48 }
 0xe7b   :  { %v5262_v33 = vpop.f32.mrf.mxu0 }
 0xe7c   :  { %v4347_v17 = vmul.f32 %v4761_v12, %v4337_v14 }
 0xe7e   :  { %v4355_v9 = vadd.f32 %v4762_v35, %v4347_v17 }
 0xe80   :  { %5272 = vmatmul.mubr.msk.f32.vlgmr.msra.gmra.mxu1 %vm1924_vm6, %v4355_v9 }
 0xf40   :  { %v4436_v27 = vpop.f32.mrf.mxu1 }
 0xf41   :  { %v4437_v47 = vadd.f32 %v4763_v26, %v4436_v27 }
 0xf42   :  { %v5273_v61 = vpop.f32.mrf.mxu1 }
 0xf43   :  { %v4441_v45 = vsel %vm4440_vm8, %v4437_v47, -inf }
 0xf44   :  { %4442 = vmax.xlane.f32.xlu0 %v4441_v45 }
 0xfcd   :  { %v4443_v32 = vpop.xlane.xlu0 %4442 }
 0xfce   :  { %v4444_v54 = vsub.f32 %v4437_v47, %v4443_v32 }
 0xfd0   :  { %v4445_v56 = vmul.f32 1.442695, %v4444_v54 }
 0xfd2   :  { %5376 = vpow2.f32 %v4445_v56 }
 0xfdf   :  { %v5377_v11 = vpop.eup %5376 }
 0xfe0   :  { %v4447_v7 = vsel %vm4440_vm8, %v5377_v11, 0.0 }
 0xfe1   :  { %4448 = vadd.xlane.f32.xlu1 %v4447_v7 }
0x106a   :  { %v4449_v60 = vpop.xlane.xlu1 %4448 }
0x106b   :  { %5378 = vlog2.f32 %v4449_v60 }
0x1078   :  { %v5379_v8 = vpop.eup %5378 }
0x1079   :  { %v4451_v62 = vmul.f32 0.6931472, %v5379_v8 }
0x107b   :  { %v4452_v10 = vadd.f32 %v4451_v62, %v4443_v32 }
0x107d   :  { %v4453_v6 = vsub.f32 %v4437_v47, %v4452_v10 }
0x107f   :  { %4454 = vst.msk [vmem:[#allocation4] sm:$0x3] %vm4440_vm8, %v4453_v6 }
0x1080   :  { %5391 = shalt.err (!%p5388_p4)
}
0x1081   :  { %4464 = dma.vmem_to_hbm [thread:$0]  %s4462_s21, 32, %s7165_s24, [#allocation5]  }
0x1082   :  { %5400 = dma.done.wait [#allocation5], 32  }
0x1083   :  { %5401 = vsyncadd [#allocation5], 4294967264 }
0x1084   :  { %4468 = vsyncpa [#allocation5], 1 }

</bundles_post_ra>
